<compile_context>
chip_gen: v6e
topology: v6e:2x2x1
jax: 0.10.0
libtpu: 0.0.40
codegen_flags: <defaults>
</compile_context>

<pallas_src>
import functools

import numpy as np
import jax
import jax.numpy as jnp
from jax.experimental import pallas as pl
from jax.experimental.pallas import tpu as pltpu

F32 = jnp.float32


def _leaky_relu(x, slope=0.01):          # PyTorch nn.LeakyReLU() default negative_slope
    return jnp.where(x >= 0, x, slope * x)


def _elu(x):
    return jnp.where(x > 0, x, jnp.exp(x) - 1.0)


def _gat_kernel(
    x_ref, adj_ref, ws_ref,                          # per-block data
    w_ref, a1_ref, a2_ref,                           # W, split attention vector a
    s1_ref, s2_ref, fcwe_ref,                        # edge-shuffle selectors, fc weight (e part)
    fcc_w_ref, fcc_b_ref,                            # fcc
    wih_f_ref, wih_b_ref, bsum_f_ref, bsum_b_ref,    # LSTM input projections (+ b_ih + b_hh)
    whh_f_ref, whh_b_ref,                            # LSTM recurrent weights
    pin_f_ref, pin_b_ref, pf_ref, pb_ref,            # LSTM layout permutations
    wo_f_ref, wo_b_ref, wo_h1_ref, fco_b_ref,        # fc_out (pre-split)
    out_ref,
    xg_ref, lstm_ref,                                # VMEM scratch
    *, n_atoms, hidden, bb,
):
    N, H, Bb = n_atoms, hidden, bb
    R = Bb * N          # molecule*atom rows in this block
    S = 2 * Bb          # fused fwd+bwd LSTM rows per timestep

    # atom_feature = input @ W                                        (R, out)
    f_all = jnp.dot(x_ref[...].reshape(R, -1), w_ref[...], preferred_element_type=F32)

    # Edge scores. The torch repeat / cat(dim=1) / view shuffle pairs rows (i1, i2) per edge;
    # it is reproduced exactly by the block-diagonal selection matrices S1/S2 (built in glue).
    u = jnp.dot(f_all, a1_ref[...], preferred_element_type=F32)       # (R, e_out)
    v = jnp.dot(f_all, a2_ref[...], preferred_element_type=F32)
    e = (jnp.dot(s1_ref[...], u, preferred_element_type=F32)
         + jnp.dot(s2_ref[...], v, preferred_element_type=F32))       # (Bb*N*N, e_out)
    e = _leaky_relu(e).reshape(R, N, -1)                              # (R, N, e_out)
    # fc(): e-part contraction in-kernel; the bond part (leaky(weight_fc(w)) @ fc_w_wp + fc_b)
    # arrives precomputed as ws_ref (per-edge scalar map).
    sc = jnp.sum(e * fcwe_ref[...].reshape(1, 1, -1), axis=-1)        # (R, N)
    sc = sc + ws_ref[...].reshape(R, N)

    # attention = softmax(where(adj > 0, e, -9e15), dim=-1)
    adj = adj_ref[...].reshape(R, N)
    masked = jnp.where(adj > 0, sc, jnp.float32(-9e15))
    m = jnp.max(masked, axis=-1, keepdims=True)
    ex = jnp.exp(masked - m)
    att = ex * pl.reciprocal(jnp.sum(ex, axis=-1, keepdims=True), approx=True)
    # TODO(synk): training-mode dropout (args.gnn_dropout) omitted (inference identity).

    # hn[b,i,j] = leaky(fcc(att[b,i,j] * f[b,i,:])) == leaky(att * (f @ fcc_w) + fcc_b)
    fccp = jnp.dot(f_all, fcc_w_ref[...], preferred_element_type=F32)  # (R, 1)
    hn = _leaky_relu(att * fccp + fcc_b_ref[...])                      # (R, N)

    # h1 = attention @ atom_feature   (batched over the Bb molecules of this block)
    h1 = jnp.einsum("bij,bjd->bid", att.reshape(Bb, N, N), f_all.reshape(Bb, N, -1),
                    preferred_element_type=F32).reshape(R, -1)         # (R, out)

    # ---- bidirectional LSTM over the N atoms: both directions + Bb molecules fused -----------
    gf = jnp.dot(hn, wih_f_ref[...], preferred_element_type=F32) + bsum_f_ref[...]   # (R, 4H)
    gb = jnp.dot(hn, wih_b_ref[...], preferred_element_type=F32) + bsum_b_ref[...]
    # reorder to step-major fused layout: rows [s*S, s*S+Bb) = fwd input at t=s,
    #                                     rows [s*S+Bb, (s+1)*S) = bwd input at t=N-1-s
    xg_ref[...] = (jnp.dot(pin_f_ref[...], gf, preferred_element_type=F32)
                   + jnp.dot(pin_b_ref[...], gb, preferred_element_type=F32))

    row = jax.lax.broadcasted_iota(jnp.int32, (S, 1), 0)
    fmask = (row < Bb).astype(F32)       # top Bb rows carry the forward direction
    bmask = 1.0 - fmask
    whh_f = whh_f_ref[...]
    whh_b = whh_b_ref[...]

    h = jnp.zeros((S, H), F32)
    c = jnp.zeros((S, H), F32)
    for s in range(N):   # static unroll (N small); per-step outputs go to VMEM scratch
        xg = xg_ref[s * S:(s + 1) * S, :]                              # (S, 4H)
        gates = (xg
                 + jnp.dot(h * fmask, whh_f, preferred_element_type=F32)
                 + jnp.dot(h * bmask, whh_b, preferred_element_type=F32))
        i_g = jax.nn.sigmoid(gates[:, 0:H])
        f_g = jax.nn.sigmoid(gates[:, H:2 * H])
        g_g = jnp.tanh(gates[:, 2 * H:3 * H])
        o_g = jax.nn.sigmoid(gates[:, 3 * H:4 * H])
        c = f_g * c + i_g * g_g
        h = o_g * jnp.tanh(c)
        lstm_ref[s * S:(s + 1) * S, :] = h

    hcat = _leaky_relu(lstm_ref[...])                                  # (N*S, H) step-major
    hf = jnp.dot(pf_ref[...], hcat, preferred_element_type=F32)        # (R, H) batch-major fwd
    hb = jnp.dot(pb_ref[...], hcat, preferred_element_type=F32)        # (R, H) batch-major bwd

    # out = elu(fc_out(cat([hn_lstm, h1], -1)))  with fc_out weight pre-split (no lane concat)
    out2d = (jnp.dot(hf, wo_f_ref[...], preferred_element_type=F32)
             + jnp.dot(hb, wo_b_ref[...], preferred_element_type=F32)
             + jnp.dot(h1, wo_h1_ref[...], preferred_element_type=F32)
             + fco_b_ref[...])
    out_ref[...] = _elu(out2d).reshape(Bb, N, -1)


def _build_constants(N, Bb):
    """Numpy selector / permutation constants (baked at trace time)."""
    eye = np.eye(N, dtype=np.float32)
    part1 = np.tile(eye, (1, N)).reshape(N * N, N)       # row r -> e_{r // N}
    part2 = np.tile(eye, (N, 1))                         # row r -> e_{r %  N}
    cat = np.concatenate([part1, part2], axis=0).reshape(N, N, 2 * N)  # torch cat(dim=1).view
    s1 = cat[:, :, :N].reshape(N * N, N)
    s2 = cat[:, :, N:].reshape(N * N, N)
    eye_b = np.eye(Bb, dtype=np.float32)
    s1_blk = np.kron(eye_b, s1)                          # (Bb*N*N, Bb*N) block-diagonal
    s2_blk = np.kron(eye_b, s2)

    S = 2 * Bb
    pin_f = np.zeros((N * S, Bb * N), np.float32)
    pin_b = np.zeros((N * S, Bb * N), np.float32)
    pf = np.zeros((Bb * N, N * S), np.float32)
    pb = np.zeros((Bb * N, N * S), np.float32)
    for s in range(N):
        for b in range(Bb):
            pin_f[s * S + b, b * N + s] = 1.0                  # fwd step s consumes t = s
            pin_b[s * S + Bb + b, b * N + (N - 1 - s)] = 1.0   # bwd step s consumes t = N-1-s
            pf[b * N + s, s * S + b] = 1.0                     # fwd output for t = s
            pb[b * N + s, (N - 1 - s) * S + Bb + b] = 1.0      # bwd output for t = s
    return s1_blk, s2_blk, pin_f, pin_b, pf, pb


def init_params(key, *, in_f, out_f, e_out, bonds_in, bonds_out, ci_out, layer1, max_atom):
    ks = jax.random.split(key, 14)
    H = ci_out

    def xavier(k, shape, gain=1.0):
        lim = gain * np.sqrt(6.0 / (shape[0] + shape[1]))
        return jax.random.uniform(k, shape, F32, -lim, lim)

    sc = 1.0 / np.sqrt(H)
    return {
        "W": xavier(ks[0], (in_f, out_f), 1.414),
        "a": xavier(ks[1], (2 * out_f, e_out), 1.414),
        "wfb_wT": xavier(ks[2], (bonds_in, bonds_out)),
        "wfb_b": jnp.zeros((1, bonds_out), F32),
        "fc_wT": xavier(ks[3], (e_out + bonds_out, 1)),
        "fc_b": jnp.zeros((1, 1), F32),
        "fcc_wT": xavier(ks[4], (out_f, 1)),
        "fcc_b": jnp.zeros((1, 1), F32),
        "fco_wT": xavier(ks[5], (2 * H + out_f, layer1)),
        "fco_b": jnp.zeros((1, layer1), F32),
        "lstm_wihT_f": jax.random.uniform(ks[6], (max_atom, 4 * H), F32, -sc, sc),
        "lstm_whhT_f": jax.random.uniform(ks[7], (H, 4 * H), F32, -sc, sc),
        "lstm_bih_f": jax.random.uniform(ks[8], (1, 4 * H), F32, -sc, sc),
        "lstm_bhh_f": jax.random.uniform(ks[9], (1, 4 * H), F32, -sc, sc),
        "lstm_wihT_b": jax.random.uniform(ks[10], (max_atom, 4 * H), F32, -sc, sc),
        "lstm_whhT_b": jax.random.uniform(ks[11], (H, 4 * H), F32, -sc, sc),
        "lstm_bih_b": jax.random.uniform(ks[12], (1, 4 * H), F32, -sc, sc),
        "lstm_bhh_b": jax.random.uniform(ks[13], (1, 4 * H), F32, -sc, sc),
    }


@functools.partial(jax.jit, static_argnames=("block_batch",))
def gat_layer_forward(inp, adj, bond_weight, params, block_batch=4):
    B, N, in_f = inp.shape
    out_f = params["W"].shape[1]
    e_out = params["a"].shape[1]
    H = params["lstm_whhT_f"].shape[0]
    layer1 = params["fco_b"].shape[1]

    Bb = max(1, min(block_batch, B))
    while B % Bb:
        Bb -= 1

    # ---------------- plain-XLA glue: bond-score precompute + parameter splits ----------------
    a1, a2 = params["a"][:out_f], params["a"][out_f:]
    fc_w_e = params["fc_wT"][:e_out].reshape(1, e_out)               # e-part of fc weight
    fc_w_wp = params["fc_wT"][e_out:]                                # bond-part of fc weight
    wp = _leaky_relu(jnp.einsum("bijk,kl->bijl", bond_weight.astype(F32), params["wfb_wT"])
                     + params["wfb_b"].reshape(1, 1, 1, -1))
    wscore = jnp.einsum("bijk,kl->bijl", wp, fc_w_wp)[..., 0] + params["fc_b"][0, 0]  # (B,N,N)

    wo_f = params["fco_wT"][:H]
    wo_b = params["fco_wT"][H:2 * H]
    wo_h1 = params["fco_wT"][2 * H:]
    bsum_f = params["lstm_bih_f"] + params["lstm_bhh_f"]
    bsum_b = params["lstm_bih_b"] + params["lstm_bhh_b"]

    s1_blk, s2_blk, pin_f, pin_b, pf, pb = (jnp.asarray(c) for c in _build_constants(N, Bb))

    shared = [
        params["W"], a1, a2, s1_blk, s2_blk, fc_w_e,
        params["fcc_wT"], params["fcc_b"],
        params["lstm_wihT_f"], params["lstm_wihT_b"], bsum_f, bsum_b,
        params["lstm_whhT_f"], params["lstm_whhT_b"],
        pin_f, pin_b, pf, pb,
        wo_f, wo_b, wo_h1, params["fco_b"],
    ]

    in_specs = [
        pl.BlockSpec((Bb, N, in_f), lambda g: (g, 0, 0)),
        pl.BlockSpec((Bb, N, N), lambda g: (g, 0, 0)),
        pl.BlockSpec((Bb, N, N), lambda g: (g, 0, 0)),
    ] + [pl.BlockSpec(arr.shape, lambda g: (0, 0)) for arr in shared]

    kernel = functools.partial(_gat_kernel, n_atoms=N, hidden=H, bb=Bb)

    return pl.pallas_call(
        kernel,
        out_shape=jax.ShapeDtypeStruct((B, N, layer1), F32),
        grid=(B // Bb,),
        in_specs=in_specs,
        out_specs=pl.BlockSpec((Bb, N, layer1), lambda g: (g, 0, 0)),
        scratch_shapes=[pltpu.VMEM((2 * Bb * N, 4 * H), F32),
                        pltpu.VMEM((2 * Bb * N, H), F32)],
        compiler_params=pltpu.CompilerParams(dimension_semantics=("parallel",)),
    )(inp.astype(F32), adj.astype(F32), wscore, *shared)


if __name__ == "__main__":
    # module hyper-parameters (args)
    B = 8
    N = 8               # args.max_atom == number of atoms per molecule
    in_features = 16
    out_features = 32
    gat_e_out_dim = 8
    gat_bonds_input_dim = 4
    gat_bonds_out_dim = 8
    gat_ci_out = 16
    gat_layer1_out_dim = 16

    key = jax.random.PRNGKey(0)
    kp, k1, k2, k3 = jax.random.split(key, 4)

    params = init_params(
        kp, in_f=in_features, out_f=out_features, e_out=gat_e_out_dim,
        bonds_in=gat_bonds_input_dim, bonds_out=gat_bonds_out_dim,
        ci_out=gat_ci_out, layer1=gat_layer1_out_dim, max_atom=N)

    x = jax.random.normal(k1, (B, N, in_features), F32)
    adj = (jax.random.uniform(k2, (B, N, N)) > 0.4).astype(F32)
    adj = jnp.maximum(adj, jnp.eye(N, dtype=F32)[None])            # self-loops
    bond_weight = jax.random.normal(k3, (B, N, N, gat_bonds_input_dim), F32)

    out = gat_layer_forward(x, adj, bond_weight, params, block_batch=4)
    out = jax.block_until_ready(out)

    assert out.shape == (B, N, gat_layer1_out_dim)
    assert bool(jnp.all(jnp.isfinite(out)))
    print("KERNEL_OK")
</pallas_src>

<mosaic_0001>
module attributes {stable_mosaic.version = 11 : i64} {
  func.func @_gat_kernel(%arg0: i32, %arg1: memref<4x8x16xf32, #tpu.memory_space<vmem>>, %arg2: memref<4x8x8xf32, #tpu.memory_space<vmem>>, %arg3: memref<4x8x8xf32, #tpu.memory_space<vmem>>, %arg4: memref<16x32xf32, #tpu.memory_space<vmem>>, %arg5: memref<32x8xf32, #tpu.memory_space<vmem>>, %arg6: memref<32x8xf32, #tpu.memory_space<vmem>>, %arg7: memref<256x32xf32, #tpu.memory_space<vmem>>, %arg8: memref<256x32xf32, #tpu.memory_space<vmem>>, %arg9: memref<1x8xf32, #tpu.memory_space<vmem>>, %arg10: memref<32x1xf32, #tpu.memory_space<vmem>>, %arg11: memref<1x1xf32, #tpu.memory_space<vmem>>, %arg12: memref<8x64xf32, #tpu.memory_space<vmem>>, %arg13: memref<8x64xf32, #tpu.memory_space<vmem>>, %arg14: memref<1x64xf32, #tpu.memory_space<vmem>>, %arg15: memref<1x64xf32, #tpu.memory_space<vmem>>, %arg16: memref<16x64xf32, #tpu.memory_space<vmem>>, %arg17: memref<16x64xf32, #tpu.memory_space<vmem>>, %arg18: memref<64x32xf32, #tpu.memory_space<vmem>>, %arg19: memref<64x32xf32, #tpu.memory_space<vmem>>, %arg20: memref<32x64xf32, #tpu.memory_space<vmem>>, %arg21: memref<32x64xf32, #tpu.memory_space<vmem>>, %arg22: memref<16x16xf32, #tpu.memory_space<vmem>>, %arg23: memref<16x16xf32, #tpu.memory_space<vmem>>, %arg24: memref<32x16xf32, #tpu.memory_space<vmem>>, %arg25: memref<1x16xf32, #tpu.memory_space<vmem>>, %arg26: memref<4x8x16xf32, #tpu.memory_space<vmem>>, %arg27: memref<64x64xf32, #tpu.memory_space<vmem>>, %arg28: memref<64x16xf32, #tpu.memory_space<vmem>>) attributes {dimension_semantics = [#tpu.dimension_semantics<parallel>], iteration_bounds = array<i64: 2>, scalar_prefetch = 0 : i64, scratch_operands = 2 : i64, tpu.core_type = #tpu.core_type<tc>, window_params = [{transform_indices = @transform_0, window_bounds = array<i64: 4, 8, 16>}, {transform_indices = @transform_1, window_bounds = array<i64: 4, 8, 8>}, {transform_indices = @transform_2, window_bounds = array<i64: 4, 8, 8>}, {pipeline_mode = #tpu.pipeline_mode<synchronous>, transform_indices = @transform_3, window_bounds = array<i64: 16, 32>}, {pipeline_mode = #tpu.pipeline_mode<synchronous>, transform_indices = @transform_4, window_bounds = array<i64: 32, 8>}, {pipeline_mode = #tpu.pipeline_mode<synchronous>, transform_indices = @transform_5, window_bounds = array<i64: 32, 8>}, {pipeline_mode = #tpu.pipeline_mode<synchronous>, transform_indices = @transform_6, window_bounds = array<i64: 256, 32>}, {pipeline_mode = #tpu.pipeline_mode<synchronous>, transform_indices = @transform_7, window_bounds = array<i64: 256, 32>}, {pipeline_mode = #tpu.pipeline_mode<synchronous>, transform_indices = @transform_8, window_bounds = array<i64: 1, 8>}, {pipeline_mode = #tpu.pipeline_mode<synchronous>, transform_indices = @transform_9, window_bounds = array<i64: 32, 1>}, {pipeline_mode = #tpu.pipeline_mode<synchronous>, transform_indices = @transform_10, window_bounds = array<i64: 1, 1>}, {pipeline_mode = #tpu.pipeline_mode<synchronous>, transform_indices = @transform_11, window_bounds = array<i64: 8, 64>}, {pipeline_mode = #tpu.pipeline_mode<synchronous>, transform_indices = @transform_12, window_bounds = array<i64: 8, 64>}, {pipeline_mode = #tpu.pipeline_mode<synchronous>, transform_indices = @transform_13, window_bounds = array<i64: 1, 64>}, {pipeline_mode = #tpu.pipeline_mode<synchronous>, transform_indices = @transform_14, window_bounds = array<i64: 1, 64>}, {pipeline_mode = #tpu.pipeline_mode<synchronous>, transform_indices = @transform_15, window_bounds = array<i64: 16, 64>}, {pipeline_mode = #tpu.pipeline_mode<synchronous>, transform_indices = @transform_16, window_bounds = array<i64: 16, 64>}, {pipeline_mode = #tpu.pipeline_mode<synchronous>, transform_indices = @transform_17, window_bounds = array<i64: 64, 32>}, {pipeline_mode = #tpu.pipeline_mode<synchronous>, transform_indices = @transform_18, window_bounds = array<i64: 64, 32>}, {pipeline_mode = #tpu.pipeline_mode<synchronous>, transform_indices = @transform_19, window_bounds = array<i64: 32, 64>}, {pipeline_mode = #tpu.pipeline_mode<synchronous>, transform_indices = @transform_20, window_bounds = array<i64: 32, 64>}, {pipeline_mode = #tpu.pipeline_mode<synchronous>, transform_indices = @transform_21, window_bounds = array<i64: 16, 16>}, {pipeline_mode = #tpu.pipeline_mode<synchronous>, transform_indices = @transform_22, window_bounds = array<i64: 16, 16>}, {pipeline_mode = #tpu.pipeline_mode<synchronous>, transform_indices = @transform_23, window_bounds = array<i64: 32, 16>}, {pipeline_mode = #tpu.pipeline_mode<synchronous>, transform_indices = @transform_24, window_bounds = array<i64: 1, 16>}, {transform_indices = @transform_25, window_bounds = array<i64: 4, 8, 16>}]} {
    %c0 = arith.constant 0 : index
    %c0_0 = arith.constant 0 : index
    %c0_1 = arith.constant 0 : index
    %0 = vector.load %arg1[%c0, %c0_0, %c0_1] : memref<4x8x16xf32, #tpu.memory_space<vmem>>, vector<4x8x16xf32>
    %1 = vector.shape_cast %0 : vector<4x8x16xf32> to vector<32x16xf32>
    %c0_2 = arith.constant 0 : index
    %c0_3 = arith.constant 0 : index
    %2 = vector.load %arg4[%c0_2, %c0_3] : memref<16x32xf32, #tpu.memory_space<vmem>>, vector<16x32xf32>
    %cst = arith.constant dense<0.000000e+00> : vector<32x32xf32>
    %3 = tpu.matmul %1, %2, %cst {dimension_numbers = #tpu.dot_dimension_numbers<[1], [0], [0], [1], [0, 0, 1, 1], [], []>} : vector<32x16xf32>, vector<16x32xf32>, vector<32x32xf32> -> vector<32x32xf32>
    %c0_4 = arith.constant 0 : index
    %c0_5 = arith.constant 0 : index
    %4 = vector.load %arg5[%c0_4, %c0_5] : memref<32x8xf32, #tpu.memory_space<vmem>>, vector<32x8xf32>
    %cst_6 = arith.constant dense<0.000000e+00> : vector<32x8xf32>
    %5 = tpu.matmul %3, %4, %cst_6 {dimension_numbers = #tpu.dot_dimension_numbers<[1], [0], [0], [1], [0, 0, 1, 1], [], []>} : vector<32x32xf32>, vector<32x8xf32>, vector<32x8xf32> -> vector<32x8xf32>
    %c0_7 = arith.constant 0 : index
    %c0_8 = arith.constant 0 : index
    %6 = vector.load %arg6[%c0_7, %c0_8] : memref<32x8xf32, #tpu.memory_space<vmem>>, vector<32x8xf32>
    %cst_9 = arith.constant dense<0.000000e+00> : vector<32x8xf32>
    %7 = tpu.matmul %3, %6, %cst_9 {dimension_numbers = #tpu.dot_dimension_numbers<[1], [0], [0], [1], [0, 0, 1, 1], [], []>} : vector<32x32xf32>, vector<32x8xf32>, vector<32x8xf32> -> vector<32x8xf32>
    %c0_10 = arith.constant 0 : index
    %c0_11 = arith.constant 0 : index
    %8 = vector.load %arg7[%c0_10, %c0_11] : memref<256x32xf32, #tpu.memory_space<vmem>>, vector<256x32xf32>
    %cst_12 = arith.constant dense<0.000000e+00> : vector<256x8xf32>
    %9 = tpu.matmul %8, %5, %cst_12 {dimension_numbers = #tpu.dot_dimension_numbers<[1], [0], [0], [1], [0, 0, 1, 1], [], []>} : vector<256x32xf32>, vector<32x8xf32>, vector<256x8xf32> -> vector<256x8xf32>
    %c0_13 = arith.constant 0 : index
    %c0_14 = arith.constant 0 : index
    %10 = vector.load %arg8[%c0_13, %c0_14] : memref<256x32xf32, #tpu.memory_space<vmem>>, vector<256x32xf32>
    %cst_15 = arith.constant dense<0.000000e+00> : vector<256x8xf32>
    %11 = tpu.matmul %10, %7, %cst_15 {dimension_numbers = #tpu.dot_dimension_numbers<[1], [0], [0], [1], [0, 0, 1, 1], [], []>} : vector<256x32xf32>, vector<32x8xf32>, vector<256x8xf32> -> vector<256x8xf32>
    %12 = arith.addf %9, %11 : vector<256x8xf32>
    %cst_16 = arith.constant 0.000000e+00 : f32
    %13 = vector.broadcast %cst_16 : f32 to vector<256x8xf32>
    %14 = arith.cmpf oge, %12, %13 : vector<256x8xf32>
    %cst_17 = arith.constant 0.00999999977 : f32
    %15 = vector.broadcast %cst_17 : f32 to vector<256x8xf32>
    %16 = arith.mulf %15, %12 : vector<256x8xf32>
    %17 = arith.select %14, %12, %16 : vector<256x8xi1>, vector<256x8xf32>
    %18 = vector.shape_cast %17 : vector<256x8xf32> to vector<32x8x8xf32>
    %c0_18 = arith.constant 0 : index
    %c0_19 = arith.constant 0 : index
    %19 = vector.load %arg9[%c0_18, %c0_19] : memref<1x8xf32, #tpu.memory_space<vmem>>, vector<1x8xf32>
    %20 = vector.shape_cast %19 : vector<1x8xf32> to vector<1x1x8xf32>
    %21 = vector.broadcast %20 : vector<1x1x8xf32> to vector<32x8x8xf32>
    %22 = arith.mulf %18, %21 : vector<32x8x8xf32>
    %cst_20 = arith.constant dense<0.000000e+00> : vector<32x8xf32>
    %23 = vector.multi_reduction <add>, %22, %cst_20 [2] : vector<32x8x8xf32> to vector<32x8xf32>
    %c0_21 = arith.constant 0 : index
    %c0_22 = arith.constant 0 : index
    %c0_23 = arith.constant 0 : index
    %24 = vector.load %arg3[%c0_21, %c0_22, %c0_23] : memref<4x8x8xf32, #tpu.memory_space<vmem>>, vector<4x8x8xf32>
    %25 = vector.shape_cast %24 : vector<4x8x8xf32> to vector<32x8xf32>
    %26 = arith.addf %23, %25 : vector<32x8xf32>
    %c0_24 = arith.constant 0 : index
    %c0_25 = arith.constant 0 : index
    %c0_26 = arith.constant 0 : index
    %27 = vector.load %arg2[%c0_24, %c0_25, %c0_26] : memref<4x8x8xf32, #tpu.memory_space<vmem>>, vector<4x8x8xf32>
    %28 = vector.shape_cast %27 : vector<4x8x8xf32> to vector<32x8xf32>
    %cst_27 = arith.constant 0.000000e+00 : f32
    %29 = vector.broadcast %cst_27 : f32 to vector<32x8xf32>
    %30 = arith.cmpf ogt, %28, %29 : vector<32x8xf32>
    %cst_28 = arith.constant -9.000000e+15 : f32
    %31 = vector.broadcast %cst_28 : f32 to vector<32x8xf32>
    %32 = arith.select %30, %26, %31 : vector<32x8xi1>, vector<32x8xf32>
    %cst_29 = arith.constant dense<0xFF800000> : vector<32xf32>
    %33 = vector.multi_reduction <maximumf>, %32, %cst_29 [1] : vector<32x8xf32> to vector<32xf32>
    %34 = vector.shape_cast %33 : vector<32xf32> to vector<32x1xf32>
    %35 = vector.broadcast %34 : vector<32x1xf32> to vector<32x8xf32>
    %36 = arith.subf %32, %35 : vector<32x8xf32>
    %37 = math.exp %36 : vector<32x8xf32>
    %cst_30 = arith.constant dense<0.000000e+00> : vector<32xf32>
    %38 = vector.multi_reduction <add>, %37, %cst_30 [1] : vector<32x8xf32> to vector<32xf32>
    %39 = vector.shape_cast %38 : vector<32xf32> to vector<32x1xf32>
    %40 = tpu.reciprocal %39 {approx = true} : vector<32x1xf32> -> vector<32x1xf32>
    %41 = vector.broadcast %40 : vector<32x1xf32> to vector<32x8xf32>
    %42 = arith.mulf %37, %41 : vector<32x8xf32>
    %c0_31 = arith.constant 0 : index
    %c0_32 = arith.constant 0 : index
    %43 = vector.load %arg10[%c0_31, %c0_32] : memref<32x1xf32, #tpu.memory_space<vmem>>, vector<32x1xf32>
    %cst_33 = arith.constant dense<0.000000e+00> : vector<32x1xf32>
    %44 = tpu.matmul %3, %43, %cst_33 {dimension_numbers = #tpu.dot_dimension_numbers<[1], [0], [0], [1], [0, 0, 1, 1], [], []>} : vector<32x32xf32>, vector<32x1xf32>, vector<32x1xf32> -> vector<32x1xf32>
    %45 = vector.broadcast %44 : vector<32x1xf32> to vector<32x8xf32>
    %46 = arith.mulf %42, %45 : vector<32x8xf32>
    %c0_34 = arith.constant 0 : index
    %c0_35 = arith.constant 0 : index
    %47 = vector.load %arg11[%c0_34, %c0_35] : memref<1x1xf32, #tpu.memory_space<vmem>>, vector<1x1xf32>
    %48 = vector.broadcast %47 : vector<1x1xf32> to vector<32x8xf32>
    %49 = arith.addf %46, %48 : vector<32x8xf32>
    %cst_36 = arith.constant 0.000000e+00 : f32
    %50 = vector.broadcast %cst_36 : f32 to vector<32x8xf32>
    %51 = arith.cmpf oge, %49, %50 : vector<32x8xf32>
    %cst_37 = arith.constant 0.00999999977 : f32
    %52 = vector.broadcast %cst_37 : f32 to vector<32x8xf32>
    %53 = arith.mulf %52, %49 : vector<32x8xf32>
    %54 = arith.select %51, %49, %53 : vector<32x8xi1>, vector<32x8xf32>
    %55 = vector.shape_cast %42 : vector<32x8xf32> to vector<4x8x8xf32>
    %56 = vector.shape_cast %3 : vector<32x32xf32> to vector<4x8x32xf32>
    "tpu.trace_start"() <{level = 10 : i32, message = "bij,bjd->bid"}> : () -> ()
    %cst_38 = arith.constant dense<0.000000e+00> : vector<4x8x32xf32>
    %57 = tpu.matmul %55, %56, %cst_38 {dimension_numbers = #tpu.dot_dimension_numbers<[2], [1], [1], [2], [0, 0, 0, 1, 1, 2], [0], [0]>} : vector<4x8x8xf32>, vector<4x8x32xf32>, vector<4x8x32xf32> -> vector<4x8x32xf32>
    "tpu.trace_stop"() : () -> ()
    %58 = vector.shape_cast %57 : vector<4x8x32xf32> to vector<32x32xf32>
    %c0_39 = arith.constant 0 : index
    %c0_40 = arith.constant 0 : index
    %59 = vector.load %arg12[%c0_39, %c0_40] : memref<8x64xf32, #tpu.memory_space<vmem>>, vector<8x64xf32>
    %cst_41 = arith.constant dense<0.000000e+00> : vector<32x64xf32>
    %60 = tpu.matmul %54, %59, %cst_41 {dimension_numbers = #tpu.dot_dimension_numbers<[1], [0], [0], [1], [0, 0, 1, 1], [], []>} : vector<32x8xf32>, vector<8x64xf32>, vector<32x64xf32> -> vector<32x64xf32>
    %c0_42 = arith.constant 0 : index
    %c0_43 = arith.constant 0 : index
    %61 = vector.load %arg14[%c0_42, %c0_43] : memref<1x64xf32, #tpu.memory_space<vmem>>, vector<1x64xf32>
    %62 = vector.broadcast %61 : vector<1x64xf32> to vector<32x64xf32>
    %63 = arith.addf %60, %62 : vector<32x64xf32>
    %c0_44 = arith.constant 0 : index
    %c0_45 = arith.constant 0 : index
    %64 = vector.load %arg13[%c0_44, %c0_45] : memref<8x64xf32, #tpu.memory_space<vmem>>, vector<8x64xf32>
    %cst_46 = arith.constant dense<0.000000e+00> : vector<32x64xf32>
    %65 = tpu.matmul %54, %64, %cst_46 {dimension_numbers = #tpu.dot_dimension_numbers<[1], [0], [0], [1], [0, 0, 1, 1], [], []>} : vector<32x8xf32>, vector<8x64xf32>, vector<32x64xf32> -> vector<32x64xf32>
    %c0_47 = arith.constant 0 : index
    %c0_48 = arith.constant 0 : index
    %66 = vector.load %arg15[%c0_47, %c0_48] : memref<1x64xf32, #tpu.memory_space<vmem>>, vector<1x64xf32>
    %67 = vector.broadcast %66 : vector<1x64xf32> to vector<32x64xf32>
    %68 = arith.addf %65, %67 : vector<32x64xf32>
    %c0_49 = arith.constant 0 : index
    %c0_50 = arith.constant 0 : index
    %69 = vector.load %arg18[%c0_49, %c0_50] : memref<64x32xf32, #tpu.memory_space<vmem>>, vector<64x32xf32>
    %cst_51 = arith.constant dense<0.000000e+00> : vector<64x64xf32>
    %70 = tpu.matmul %69, %63, %cst_51 {dimension_numbers = #tpu.dot_dimension_numbers<[1], [0], [0], [1], [0, 0, 1, 1], [], []>} : vector<64x32xf32>, vector<32x64xf32>, vector<64x64xf32> -> vector<64x64xf32>
    %c0_52 = arith.constant 0 : index
    %c0_53 = arith.constant 0 : index
    %71 = vector.load %arg19[%c0_52, %c0_53] : memref<64x32xf32, #tpu.memory_space<vmem>>, vector<64x32xf32>
    %cst_54 = arith.constant dense<0.000000e+00> : vector<64x64xf32>
    %72 = tpu.matmul %71, %68, %cst_54 {dimension_numbers = #tpu.dot_dimension_numbers<[1], [0], [0], [1], [0, 0, 1, 1], [], []>} : vector<64x32xf32>, vector<32x64xf32>, vector<64x64xf32> -> vector<64x64xf32>
    %73 = arith.addf %70, %72 : vector<64x64xf32>
    %c0_55 = arith.constant 0 : index
    %c0_56 = arith.constant 0 : index
    %74 = vector.load %arg27[%c0_55, %c0_56] : memref<64x64xf32, #tpu.memory_space<vmem>>, vector<64x64xf32>
    tpu.vector_store %arg27[%c0_55, %c0_56], %73 {strides = array<i32>} : memref<64x64xf32, #tpu.memory_space<vmem>>, vector<64x64xf32>,
    %75 = tpu.iota {dimensions = array<i32: 0>} : vector<8x1xi32>
    %c4_i32 = arith.constant 4 : i32
    %76 = vector.broadcast %c4_i32 : i32 to vector<8x1xi32>
    %77 = arith.cmpi slt, %75, %76 : vector<8x1xi32>
    %78 = arith.extui %77 : vector<8x1xi1> to vector<8x1xi32>
    %79 = arith.sitofp %78 : vector<8x1xi32> to vector<8x1xf32>
    %cst_57 = arith.constant 1.000000e+00 : f32
    %80 = vector.broadcast %cst_57 : f32 to vector<8x1xf32>
    %81 = arith.subf %80, %79 : vector<8x1xf32>
    %c0_58 = arith.constant 0 : index
    %c0_59 = arith.constant 0 : index
    %82 = vector.load %arg16[%c0_58, %c0_59] : memref<16x64xf32, #tpu.memory_space<vmem>>, vector<16x64xf32>
    %c0_60 = arith.constant 0 : index
    %c0_61 = arith.constant 0 : index
    %83 = vector.load %arg17[%c0_60, %c0_61] : memref<16x64xf32, #tpu.memory_space<vmem>>, vector<16x64xf32>
    %cst_62 = arith.constant 0.000000e+00 : f32
    %84 = vector.broadcast %cst_62 : f32 to vector<8x16xf32>
    %cst_63 = arith.constant 0.000000e+00 : f32
    %85 = vector.broadcast %cst_63 : f32 to vector<8x16xf32>
    %c0_64 = arith.constant 0 : index
    %c0_65 = arith.constant 0 : index
    %86 = vector.load %arg27[%c0_64, %c0_65] : memref<64x64xf32, #tpu.memory_space<vmem>>, vector<8x64xf32>
    %87 = vector.broadcast %79 : vector<8x1xf32> to vector<8x16xf32>
    %88 = arith.mulf %84, %87 : vector<8x16xf32>
    %cst_66 = arith.constant dense<0.000000e+00> : vector<8x64xf32>
    %89 = tpu.matmul %88, %82, %cst_66 {dimension_numbers = #tpu.dot_dimension_numbers<[1], [0], [0], [1], [0, 0, 1, 1], [], []>} : vector<8x16xf32>, vector<16x64xf32>, vector<8x64xf32> -> vector<8x64xf32>
    %90 = arith.addf %86, %89 : vector<8x64xf32>
    %91 = vector.broadcast %81 : vector<8x1xf32> to vector<8x16xf32>
    %92 = arith.mulf %84, %91 : vector<8x16xf32>
    %cst_67 = arith.constant dense<0.000000e+00> : vector<8x64xf32>
    %93 = tpu.matmul %92, %83, %cst_67 {dimension_numbers = #tpu.dot_dimension_numbers<[1], [0], [0], [1], [0, 0, 1, 1], [], []>} : vector<8x16xf32>, vector<16x64xf32>, vector<8x64xf32> -> vector<8x64xf32>
    %94 = arith.addf %90, %93 : vector<8x64xf32>
    %95 = vector.extract_strided_slice %94 {offsets = [0, 0], sizes = [8, 16], strides = [1, 1]} : vector<8x64xf32> to vector<8x16xf32>
    %96 = arith.negf %95 : vector<8x16xf32>
    %97 = math.exp %96 : vector<8x16xf32>
    %cst_68 = arith.constant 1.000000e+00 : f32
    %98 = vector.broadcast %cst_68 : f32 to vector<8x16xf32>
    %99 = arith.addf %98, %97 : vector<8x16xf32>
    %100 = arith.divf %98, %99 : vector<8x16xf32>
    %101 = vector.extract_strided_slice %94 {offsets = [0, 16], sizes = [8, 16], strides = [1, 1]} : vector<8x64xf32> to vector<8x16xf32>
    %102 = arith.negf %101 : vector<8x16xf32>
    %103 = math.exp %102 : vector<8x16xf32>
    %cst_69 = arith.constant 1.000000e+00 : f32
    %104 = vector.broadcast %cst_69 : f32 to vector<8x16xf32>
    %105 = arith.addf %104, %103 : vector<8x16xf32>
    %106 = arith.divf %104, %105 : vector<8x16xf32>
    %107 = vector.extract_strided_slice %94 {offsets = [0, 32], sizes = [8, 16], strides = [1, 1]} : vector<8x64xf32> to vector<8x16xf32>
    %108 = math.tanh %107 : vector<8x16xf32>
    %109 = vector.extract_strided_slice %94 {offsets = [0, 48], sizes = [8, 16], strides = [1, 1]} : vector<8x64xf32> to vector<8x16xf32>
    %110 = arith.negf %109 : vector<8x16xf32>
    %111 = math.exp %110 : vector<8x16xf32>
    %cst_70 = arith.constant 1.000000e+00 : f32
    %112 = vector.broadcast %cst_70 : f32 to vector<8x16xf32>
    %113 = arith.addf %112, %111 : vector<8x16xf32>
    %114 = arith.divf %112, %113 : vector<8x16xf32>
    %115 = arith.mulf %106, %85 : vector<8x16xf32>
    %116 = arith.mulf %100, %108 : vector<8x16xf32>
    %117 = arith.addf %115, %116 : vector<8x16xf32>
    %118 = math.tanh %117 : vector<8x16xf32>
    %119 = arith.mulf %114, %118 : vector<8x16xf32>
    %c0_71 = arith.constant 0 : index
    %c0_72 = arith.constant 0 : index
    %120 = vector.load %arg28[%c0_71, %c0_72] : memref<64x16xf32, #tpu.memory_space<vmem>>, vector<8x16xf32>
    tpu.vector_store %arg28[%c0_71, %c0_72], %119 {strides = array<i32>} : memref<64x16xf32, #tpu.memory_space<vmem>>, vector<8x16xf32>,
    %c8 = arith.constant 8 : index
    %c0_73 = arith.constant 0 : index
    %121 = vector.load %arg27[%c8, %c0_73] : memref<64x64xf32, #tpu.memory_space<vmem>>, vector<8x64xf32>
    %122 = vector.broadcast %79 : vector<8x1xf32> to vector<8x16xf32>
    %123 = arith.mulf %119, %122 : vector<8x16xf32>
    %cst_74 = arith.constant dense<0.000000e+00> : vector<8x64xf32>
    %124 = tpu.matmul %123, %82, %cst_74 {dimension_numbers = #tpu.dot_dimension_numbers<[1], [0], [0], [1], [0, 0, 1, 1], [], []>} : vector<8x16xf32>, vector<16x64xf32>, vector<8x64xf32> -> vector<8x64xf32>
    %125 = arith.addf %121, %124 : vector<8x64xf32>
    %126 = vector.broadcast %81 : vector<8x1xf32> to vector<8x16xf32>
    %127 = arith.mulf %119, %126 : vector<8x16xf32>
    %cst_75 = arith.constant dense<0.000000e+00> : vector<8x64xf32>
    %128 = tpu.matmul %127, %83, %cst_75 {dimension_numbers = #tpu.dot_dimension_numbers<[1], [0], [0], [1], [0, 0, 1, 1], [], []>} : vector<8x16xf32>, vector<16x64xf32>, vector<8x64xf32> -> vector<8x64xf32>
    %129 = arith.addf %125, %128 : vector<8x64xf32>
    %130 = vector.extract_strided_slice %129 {offsets = [0, 0], sizes = [8, 16], strides = [1, 1]} : vector<8x64xf32> to vector<8x16xf32>
    %131 = arith.negf %130 : vector<8x16xf32>
    %132 = math.exp %131 : vector<8x16xf32>
    %cst_76 = arith.constant 1.000000e+00 : f32
    %133 = vector.broadcast %cst_76 : f32 to vector<8x16xf32>
    %134 = arith.addf %133, %132 : vector<8x16xf32>
    %135 = arith.divf %133, %134 : vector<8x16xf32>
    %136 = vector.extract_strided_slice %129 {offsets = [0, 16], sizes = [8, 16], strides = [1, 1]} : vector<8x64xf32> to vector<8x16xf32>
    %137 = arith.negf %136 : vector<8x16xf32>
    %138 = math.exp %137 : vector<8x16xf32>
    %cst_77 = arith.constant 1.000000e+00 : f32
    %139 = vector.broadcast %cst_77 : f32 to vector<8x16xf32>
    %140 = arith.addf %139, %138 : vector<8x16xf32>
    %141 = arith.divf %139, %140 : vector<8x16xf32>
    %142 = vector.extract_strided_slice %129 {offsets = [0, 32], sizes = [8, 16], strides = [1, 1]} : vector<8x64xf32> to vector<8x16xf32>
    %143 = math.tanh %142 : vector<8x16xf32>
    %144 = vector.extract_strided_slice %129 {offsets = [0, 48], sizes = [8, 16], strides = [1, 1]} : vector<8x64xf32> to vector<8x16xf32>
    %145 = arith.negf %144 : vector<8x16xf32>
    %146 = math.exp %145 : vector<8x16xf32>
    %cst_78 = arith.constant 1.000000e+00 : f32
    %147 = vector.broadcast %cst_78 : f32 to vector<8x16xf32>
    %148 = arith.addf %147, %146 : vector<8x16xf32>
    %149 = arith.divf %147, %148 : vector<8x16xf32>
    %150 = arith.mulf %141, %117 : vector<8x16xf32>
    %151 = arith.mulf %135, %143 : vector<8x16xf32>
    %152 = arith.addf %150, %151 : vector<8x16xf32>
    %153 = math.tanh %152 : vector<8x16xf32>
    %154 = arith.mulf %149, %153 : vector<8x16xf32>
    %c8_79 = arith.constant 8 : index
    %c0_80 = arith.constant 0 : index
    %155 = vector.load %arg28[%c8_79, %c0_80] : memref<64x16xf32, #tpu.memory_space<vmem>>, vector<8x16xf32>
    tpu.vector_store %arg28[%c8_79, %c0_80], %154 {strides = array<i32>} : memref<64x16xf32, #tpu.memory_space<vmem>>, vector<8x16xf32>,
    %c16 = arith.constant 16 : index
    %c0_81 = arith.constant 0 : index
    %156 = vector.load %arg27[%c16, %c0_81] : memref<64x64xf32, #tpu.memory_space<vmem>>, vector<8x64xf32>
    %157 = vector.broadcast %79 : vector<8x1xf32> to vector<8x16xf32>
    %158 = arith.mulf %154, %157 : vector<8x16xf32>
    %cst_82 = arith.constant dense<0.000000e+00> : vector<8x64xf32>
    %159 = tpu.matmul %158, %82, %cst_82 {dimension_numbers = #tpu.dot_dimension_numbers<[1], [0], [0], [1], [0, 0, 1, 1], [], []>} : vector<8x16xf32>, vector<16x64xf32>, vector<8x64xf32> -> vector<8x64xf32>
    %160 = arith.addf %156, %159 : vector<8x64xf32>
    %161 = vector.broadcast %81 : vector<8x1xf32> to vector<8x16xf32>
    %162 = arith.mulf %154, %161 : vector<8x16xf32>
    %cst_83 = arith.constant dense<0.000000e+00> : vector<8x64xf32>
    %163 = tpu.matmul %162, %83, %cst_83 {dimension_numbers = #tpu.dot_dimension_numbers<[1], [0], [0], [1], [0, 0, 1, 1], [], []>} : vector<8x16xf32>, vector<16x64xf32>, vector<8x64xf32> -> vector<8x64xf32>
    %164 = arith.addf %160, %163 : vector<8x64xf32>
    %165 = vector.extract_strided_slice %164 {offsets = [0, 0], sizes = [8, 16], strides = [1, 1]} : vector<8x64xf32> to vector<8x16xf32>
    %166 = arith.negf %165 : vector<8x16xf32>
    %167 = math.exp %166 : vector<8x16xf32>
    %cst_84 = arith.constant 1.000000e+00 : f32
    %168 = vector.broadcast %cst_84 : f32 to vector<8x16xf32>
    %169 = arith.addf %168, %167 : vector<8x16xf32>
    %170 = arith.divf %168, %169 : vector<8x16xf32>
    %171 = vector.extract_strided_slice %164 {offsets = [0, 16], sizes = [8, 16], strides = [1, 1]} : vector<8x64xf32> to vector<8x16xf32>
    %172 = arith.negf %171 : vector<8x16xf32>
    %173 = math.exp %172 : vector<8x16xf32>
    %cst_85 = arith.constant 1.000000e+00 : f32
    %174 = vector.broadcast %cst_85 : f32 to vector<8x16xf32>
    %175 = arith.addf %174, %173 : vector<8x16xf32>
    %176 = arith.divf %174, %175 : vector<8x16xf32>
    %177 = vector.extract_strided_slice %164 {offsets = [0, 32], sizes = [8, 16], strides = [1, 1]} : vector<8x64xf32> to vector<8x16xf32>
    %178 = math.tanh %177 : vector<8x16xf32>
    %179 = vector.extract_strided_slice %164 {offsets = [0, 48], sizes = [8, 16], strides = [1, 1]} : vector<8x64xf32> to vector<8x16xf32>
    %180 = arith.negf %179 : vector<8x16xf32>
    %181 = math.exp %180 : vector<8x16xf32>
    %cst_86 = arith.constant 1.000000e+00 : f32
    %182 = vector.broadcast %cst_86 : f32 to vector<8x16xf32>
    %183 = arith.addf %182, %181 : vector<8x16xf32>
    %184 = arith.divf %182, %183 : vector<8x16xf32>
    %185 = arith.mulf %176, %152 : vector<8x16xf32>
    %186 = arith.mulf %170, %178 : vector<8x16xf32>
    %187 = arith.addf %185, %186 : vector<8x16xf32>
    %188 = math.tanh %187 : vector<8x16xf32>
    %189 = arith.mulf %184, %188 : vector<8x16xf32>
    %c16_87 = arith.constant 16 : index
    %c0_88 = arith.constant 0 : index
    %190 = vector.load %arg28[%c16_87, %c0_88] : memref<64x16xf32, #tpu.memory_space<vmem>>, vector<8x16xf32>
    tpu.vector_store %arg28[%c16_87, %c0_88], %189 {strides = array<i32>} : memref<64x16xf32, #tpu.memory_space<vmem>>, vector<8x16xf32>,
    %c24 = arith.constant 24 : index
    %c0_89 = arith.constant 0 : index
    %191 = vector.load %arg27[%c24, %c0_89] : memref<64x64xf32, #tpu.memory_space<vmem>>, vector<8x64xf32>
    %192 = vector.broadcast %79 : vector<8x1xf32> to vector<8x16xf32>
    %193 = arith.mulf %189, %192 : vector<8x16xf32>
    %cst_90 = arith.constant dense<0.000000e+00> : vector<8x64xf32>
    %194 = tpu.matmul %193, %82, %cst_90 {dimension_numbers = #tpu.dot_dimension_numbers<[1], [0], [0], [1], [0, 0, 1, 1], [], []>} : vector<8x16xf32>, vector<16x64xf32>, vector<8x64xf32> -> vector<8x64xf32>
    %195 = arith.addf %191, %194 : vector<8x64xf32>
    %196 = vector.broadcast %81 : vector<8x1xf32> to vector<8x16xf32>
    %197 = arith.mulf %189, %196 : vector<8x16xf32>
    %cst_91 = arith.constant dense<0.000000e+00> : vector<8x64xf32>
    %198 = tpu.matmul %197, %83, %cst_91 {dimension_numbers = #tpu.dot_dimension_numbers<[1], [0], [0], [1], [0, 0, 1, 1], [], []>} : vector<8x16xf32>, vector<16x64xf32>, vector<8x64xf32> -> vector<8x64xf32>
    %199 = arith.addf %195, %198 : vector<8x64xf32>
    %200 = vector.extract_strided_slice %199 {offsets = [0, 0], sizes = [8, 16], strides = [1, 1]} : vector<8x64xf32> to vector<8x16xf32>
    %201 = arith.negf %200 : vector<8x16xf32>
    %202 = math.exp %201 : vector<8x16xf32>
    %cst_92 = arith.constant 1.000000e+00 : f32
    %203 = vector.broadcast %cst_92 : f32 to vector<8x16xf32>
    %204 = arith.addf %203, %202 : vector<8x16xf32>
    %205 = arith.divf %203, %204 : vector<8x16xf32>
    %206 = vector.extract_strided_slice %199 {offsets = [0, 16], sizes = [8, 16], strides = [1, 1]} : vector<8x64xf32> to vector<8x16xf32>
    %207 = arith.negf %206 : vector<8x16xf32>
    %208 = math.exp %207 : vector<8x16xf32>
    %cst_93 = arith.constant 1.000000e+00 : f32
    %209 = vector.broadcast %cst_93 : f32 to vector<8x16xf32>
    %210 = arith.addf %209, %208 : vector<8x16xf32>
    %211 = arith.divf %209, %210 : vector<8x16xf32>
    %212 = vector.extract_strided_slice %199 {offsets = [0, 32], sizes = [8, 16], strides = [1, 1]} : vector<8x64xf32> to vector<8x16xf32>
    %213 = math.tanh %212 : vector<8x16xf32>
    %214 = vector.extract_strided_slice %199 {offsets = [0, 48], sizes = [8, 16], strides = [1, 1]} : vector<8x64xf32> to vector<8x16xf32>
    %215 = arith.negf %214 : vector<8x16xf32>
    %216 = math.exp %215 : vector<8x16xf32>
    %cst_94 = arith.constant 1.000000e+00 : f32
    %217 = vector.broadcast %cst_94 : f32 to vector<8x16xf32>
    %218 = arith.addf %217, %216 : vector<8x16xf32>
    %219 = arith.divf %217, %218 : vector<8x16xf32>
    %220 = arith.mulf %211, %187 : vector<8x16xf32>
    %221 = arith.mulf %205, %213 : vector<8x16xf32>
    %222 = arith.addf %220, %221 : vector<8x16xf32>
    %223 = math.tanh %222 : vector<8x16xf32>
    %224 = arith.mulf %219, %223 : vector<8x16xf32>
    %c24_95 = arith.constant 24 : index
    %c0_96 = arith.constant 0 : index
    %225 = vector.load %arg28[%c24_95, %c0_96] : memref<64x16xf32, #tpu.memory_space<vmem>>, vector<8x16xf32>
    tpu.vector_store %arg28[%c24_95, %c0_96], %224 {strides = array<i32>} : memref<64x16xf32, #tpu.memory_space<vmem>>, vector<8x16xf32>,
    %c32 = arith.constant 32 : index
    %c0_97 = arith.constant 0 : index
    %226 = vector.load %arg27[%c32, %c0_97] : memref<64x64xf32, #tpu.memory_space<vmem>>, vector<8x64xf32>
    %227 = vector.broadcast %79 : vector<8x1xf32> to vector<8x16xf32>
    %228 = arith.mulf %224, %227 : vector<8x16xf32>
    %cst_98 = arith.constant dense<0.000000e+00> : vector<8x64xf32>
    %229 = tpu.matmul %228, %82, %cst_98 {dimension_numbers = #tpu.dot_dimension_numbers<[1], [0], [0], [1], [0, 0, 1, 1], [], []>} : vector<8x16xf32>, vector<16x64xf32>, vector<8x64xf32> -> vector<8x64xf32>
    %230 = arith.addf %226, %229 : vector<8x64xf32>
    %231 = vector.broadcast %81 : vector<8x1xf32> to vector<8x16xf32>
    %232 = arith.mulf %224, %231 : vector<8x16xf32>
    %cst_99 = arith.constant dense<0.000000e+00> : vector<8x64xf32>
    %233 = tpu.matmul %232, %83, %cst_99 {dimension_numbers = #tpu.dot_dimension_numbers<[1], [0], [0], [1], [0, 0, 1, 1], [], []>} : vector<8x16xf32>, vector<16x64xf32>, vector<8x64xf32> -> vector<8x64xf32>
    %234 = arith.addf %230, %233 : vector<8x64xf32>
    %235 = vector.extract_strided_slice %234 {offsets = [0, 0], sizes = [8, 16], strides = [1, 1]} : vector<8x64xf32> to vector<8x16xf32>
    %236 = arith.negf %235 : vector<8x16xf32>
    %237 = math.exp %236 : vector<8x16xf32>
    %cst_100 = arith.constant 1.000000e+00 : f32
    %238 = vector.broadcast %cst_100 : f32 to vector<8x16xf32>
    %239 = arith.addf %238, %237 : vector<8x16xf32>
    %240 = arith.divf %238, %239 : vector<8x16xf32>
    %241 = vector.extract_strided_slice %234 {offsets = [0, 16], sizes = [8, 16], strides = [1, 1]} : vector<8x64xf32> to vector<8x16xf32>
    %242 = arith.negf %241 : vector<8x16xf32>
    %243 = math.exp %242 : vector<8x16xf32>
    %cst_101 = arith.constant 1.000000e+00 : f32
    %244 = vector.broadcast %cst_101 : f32 to vector<8x16xf32>
    %245 = arith.addf %244, %243 : vector<8x16xf32>
    %246 = arith.divf %244, %245 : vector<8x16xf32>
    %247 = vector.extract_strided_slice %234 {offsets = [0, 32], sizes = [8, 16], strides = [1, 1]} : vector<8x64xf32> to vector<8x16xf32>
    %248 = math.tanh %247 : vector<8x16xf32>
    %249 = vector.extract_strided_slice %234 {offsets = [0, 48], sizes = [8, 16], strides = [1, 1]} : vector<8x64xf32> to vector<8x16xf32>
    %250 = arith.negf %249 : vector<8x16xf32>
    %251 = math.exp %250 : vector<8x16xf32>
    %cst_102 = arith.constant 1.000000e+00 : f32
    %252 = vector.broadcast %cst_102 : f32 to vector<8x16xf32>
    %253 = arith.addf %252, %251 : vector<8x16xf32>
    %254 = arith.divf %252, %253 : vector<8x16xf32>
    %255 = arith.mulf %246, %222 : vector<8x16xf32>
    %256 = arith.mulf %240, %248 : vector<8x16xf32>
    %257 = arith.addf %255, %256 : vector<8x16xf32>
    %258 = math.tanh %257 : vector<8x16xf32>
    %259 = arith.mulf %254, %258 : vector<8x16xf32>
    %c32_103 = arith.constant 32 : index
    %c0_104 = arith.constant 0 : index
    %260 = vector.load %arg28[%c32_103, %c0_104] : memref<64x16xf32, #tpu.memory_space<vmem>>, vector<8x16xf32>
    tpu.vector_store %arg28[%c32_103, %c0_104], %259 {strides = array<i32>} : memref<64x16xf32, #tpu.memory_space<vmem>>, vector<8x16xf32>,
    %c40 = arith.constant 40 : index
    %c0_105 = arith.constant 0 : index
    %261 = vector.load %arg27[%c40, %c0_105] : memref<64x64xf32, #tpu.memory_space<vmem>>, vector<8x64xf32>
    %262 = vector.broadcast %79 : vector<8x1xf32> to vector<8x16xf32>
    %263 = arith.mulf %259, %262 : vector<8x16xf32>
    %cst_106 = arith.constant dense<0.000000e+00> : vector<8x64xf32>
    %264 = tpu.matmul %263, %82, %cst_106 {dimension_numbers = #tpu.dot_dimension_numbers<[1], [0], [0], [1], [0, 0, 1, 1], [], []>} : vector<8x16xf32>, vector<16x64xf32>, vector<8x64xf32> -> vector<8x64xf32>
    %265 = arith.addf %261, %264 : vector<8x64xf32>
    %266 = vector.broadcast %81 : vector<8x1xf32> to vector<8x16xf32>
    %267 = arith.mulf %259, %266 : vector<8x16xf32>
    %cst_107 = arith.constant dense<0.000000e+00> : vector<8x64xf32>
    %268 = tpu.matmul %267, %83, %cst_107 {dimension_numbers = #tpu.dot_dimension_numbers<[1], [0], [0], [1], [0, 0, 1, 1], [], []>} : vector<8x16xf32>, vector<16x64xf32>, vector<8x64xf32> -> vector<8x64xf32>
    %269 = arith.addf %265, %268 : vector<8x64xf32>
    %270 = vector.extract_strided_slice %269 {offsets = [0, 0], sizes = [8, 16], strides = [1, 1]} : vector<8x64xf32> to vector<8x16xf32>
    %271 = arith.negf %270 : vector<8x16xf32>
    %272 = math.exp %271 : vector<8x16xf32>
    %cst_108 = arith.constant 1.000000e+00 : f32
    %273 = vector.broadcast %cst_108 : f32 to vector<8x16xf32>
    %274 = arith.addf %273, %272 : vector<8x16xf32>
    %275 = arith.divf %273, %274 : vector<8x16xf32>
    %276 = vector.extract_strided_slice %269 {offsets = [0, 16], sizes = [8, 16], strides = [1, 1]} : vector<8x64xf32> to vector<8x16xf32>
    %277 = arith.negf %276 : vector<8x16xf32>
    %278 = math.exp %277 : vector<8x16xf32>
    %cst_109 = arith.constant 1.000000e+00 : f32
    %279 = vector.broadcast %cst_109 : f32 to vector<8x16xf32>
    %280 = arith.addf %279, %278 : vector<8x16xf32>
    %281 = arith.divf %279, %280 : vector<8x16xf32>
    %282 = vector.extract_strided_slice %269 {offsets = [0, 32], sizes = [8, 16], strides = [1, 1]} : vector<8x64xf32> to vector<8x16xf32>
    %283 = math.tanh %282 : vector<8x16xf32>
    %284 = vector.extract_strided_slice %269 {offsets = [0, 48], sizes = [8, 16], strides = [1, 1]} : vector<8x64xf32> to vector<8x16xf32>
    %285 = arith.negf %284 : vector<8x16xf32>
    %286 = math.exp %285 : vector<8x16xf32>
    %cst_110 = arith.constant 1.000000e+00 : f32
    %287 = vector.broadcast %cst_110 : f32 to vector<8x16xf32>
    %288 = arith.addf %287, %286 : vector<8x16xf32>
    %289 = arith.divf %287, %288 : vector<8x16xf32>
    %290 = arith.mulf %281, %257 : vector<8x16xf32>
    %291 = arith.mulf %275, %283 : vector<8x16xf32>
    %292 = arith.addf %290, %291 : vector<8x16xf32>
    %293 = math.tanh %292 : vector<8x16xf32>
    %294 = arith.mulf %289, %293 : vector<8x16xf32>
    %c40_111 = arith.constant 40 : index
    %c0_112 = arith.constant 0 : index
    %295 = vector.load %arg28[%c40_111, %c0_112] : memref<64x16xf32, #tpu.memory_space<vmem>>, vector<8x16xf32>
    tpu.vector_store %arg28[%c40_111, %c0_112], %294 {strides = array<i32>} : memref<64x16xf32, #tpu.memory_space<vmem>>, vector<8x16xf32>,
    %c48 = arith.constant 48 : index
    %c0_113 = arith.constant 0 : index
    %296 = vector.load %arg27[%c48, %c0_113] : memref<64x64xf32, #tpu.memory_space<vmem>>, vector<8x64xf32>
    %297 = vector.broadcast %79 : vector<8x1xf32> to vector<8x16xf32>
    %298 = arith.mulf %294, %297 : vector<8x16xf32>
    %cst_114 = arith.constant dense<0.000000e+00> : vector<8x64xf32>
    %299 = tpu.matmul %298, %82, %cst_114 {dimension_numbers = #tpu.dot_dimension_numbers<[1], [0], [0], [1], [0, 0, 1, 1], [], []>} : vector<8x16xf32>, vector<16x64xf32>, vector<8x64xf32> -> vector<8x64xf32>
    %300 = arith.addf %296, %299 : vector<8x64xf32>
    %301 = vector.broadcast %81 : vector<8x1xf32> to vector<8x16xf32>
    %302 = arith.mulf %294, %301 : vector<8x16xf32>
    %cst_115 = arith.constant dense<0.000000e+00> : vector<8x64xf32>
    %303 = tpu.matmul %302, %83, %cst_115 {dimension_numbers = #tpu.dot_dimension_numbers<[1], [0], [0], [1], [0, 0, 1, 1], [], []>} : vector<8x16xf32>, vector<16x64xf32>, vector<8x64xf32> -> vector<8x64xf32>
    %304 = arith.addf %300, %303 : vector<8x64xf32>
    %305 = vector.extract_strided_slice %304 {offsets = [0, 0], sizes = [8, 16], strides = [1, 1]} : vector<8x64xf32> to vector<8x16xf32>
    %306 = arith.negf %305 : vector<8x16xf32>
    %307 = math.exp %306 : vector<8x16xf32>
    %cst_116 = arith.constant 1.000000e+00 : f32
    %308 = vector.broadcast %cst_116 : f32 to vector<8x16xf32>
    %309 = arith.addf %308, %307 : vector<8x16xf32>
    %310 = arith.divf %308, %309 : vector<8x16xf32>
    %311 = vector.extract_strided_slice %304 {offsets = [0, 16], sizes = [8, 16], strides = [1, 1]} : vector<8x64xf32> to vector<8x16xf32>
    %312 = arith.negf %311 : vector<8x16xf32>
    %313 = math.exp %312 : vector<8x16xf32>
    %cst_117 = arith.constant 1.000000e+00 : f32
    %314 = vector.broadcast %cst_117 : f32 to vector<8x16xf32>
    %315 = arith.addf %314, %313 : vector<8x16xf32>
    %316 = arith.divf %314, %315 : vector<8x16xf32>
    %317 = vector.extract_strided_slice %304 {offsets = [0, 32], sizes = [8, 16], strides = [1, 1]} : vector<8x64xf32> to vector<8x16xf32>
    %318 = math.tanh %317 : vector<8x16xf32>
    %319 = vector.extract_strided_slice %304 {offsets = [0, 48], sizes = [8, 16], strides = [1, 1]} : vector<8x64xf32> to vector<8x16xf32>
    %320 = arith.negf %319 : vector<8x16xf32>
    %321 = math.exp %320 : vector<8x16xf32>
    %cst_118 = arith.constant 1.000000e+00 : f32
    %322 = vector.broadcast %cst_118 : f32 to vector<8x16xf32>
    %323 = arith.addf %322, %321 : vector<8x16xf32>
    %324 = arith.divf %322, %323 : vector<8x16xf32>
    %325 = arith.mulf %316, %292 : vector<8x16xf32>
    %326 = arith.mulf %310, %318 : vector<8x16xf32>
    %327 = arith.addf %325, %326 : vector<8x16xf32>
    %328 = math.tanh %327 : vector<8x16xf32>
    %329 = arith.mulf %324, %328 : vector<8x16xf32>
    %c48_119 = arith.constant 48 : index
    %c0_120 = arith.constant 0 : index
    %330 = vector.load %arg28[%c48_119, %c0_120] : memref<64x16xf32, #tpu.memory_space<vmem>>, vector<8x16xf32>
    tpu.vector_store %arg28[%c48_119, %c0_120], %329 {strides = array<i32>} : memref<64x16xf32, #tpu.memory_space<vmem>>, vector<8x16xf32>,
    %c56 = arith.constant 56 : index
    %c0_121 = arith.constant 0 : index
    %331 = vector.load %arg27[%c56, %c0_121] : memref<64x64xf32, #tpu.memory_space<vmem>>, vector<8x64xf32>
    %332 = vector.broadcast %79 : vector<8x1xf32> to vector<8x16xf32>
    %333 = arith.mulf %329, %332 : vector<8x16xf32>
    %cst_122 = arith.constant dense<0.000000e+00> : vector<8x64xf32>
    %334 = tpu.matmul %333, %82, %cst_122 {dimension_numbers = #tpu.dot_dimension_numbers<[1], [0], [0], [1], [0, 0, 1, 1], [], []>} : vector<8x16xf32>, vector<16x64xf32>, vector<8x64xf32> -> vector<8x64xf32>
    %335 = arith.addf %331, %334 : vector<8x64xf32>
    %336 = vector.broadcast %81 : vector<8x1xf32> to vector<8x16xf32>
    %337 = arith.mulf %329, %336 : vector<8x16xf32>
    %cst_123 = arith.constant dense<0.000000e+00> : vector<8x64xf32>
    %338 = tpu.matmul %337, %83, %cst_123 {dimension_numbers = #tpu.dot_dimension_numbers<[1], [0], [0], [1], [0, 0, 1, 1], [], []>} : vector<8x16xf32>, vector<16x64xf32>, vector<8x64xf32> -> vector<8x64xf32>
    %339 = arith.addf %335, %338 : vector<8x64xf32>
    %340 = vector.extract_strided_slice %339 {offsets = [0, 0], sizes = [8, 16], strides = [1, 1]} : vector<8x64xf32> to vector<8x16xf32>
    %341 = arith.negf %340 : vector<8x16xf32>
    %342 = math.exp %341 : vector<8x16xf32>
    %cst_124 = arith.constant 1.000000e+00 : f32
    %343 = vector.broadcast %cst_124 : f32 to vector<8x16xf32>
    %344 = arith.addf %343, %342 : vector<8x16xf32>
    %345 = arith.divf %343, %344 : vector<8x16xf32>
    %346 = vector.extract_strided_slice %339 {offsets = [0, 16], sizes = [8, 16], strides = [1, 1]} : vector<8x64xf32> to vector<8x16xf32>
    %347 = arith.negf %346 : vector<8x16xf32>
    %348 = math.exp %347 : vector<8x16xf32>
    %cst_125 = arith.constant 1.000000e+00 : f32
    %349 = vector.broadcast %cst_125 : f32 to vector<8x16xf32>
    %350 = arith.addf %349, %348 : vector<8x16xf32>
    %351 = arith.divf %349, %350 : vector<8x16xf32>
    %352 = vector.extract_strided_slice %339 {offsets = [0, 32], sizes = [8, 16], strides = [1, 1]} : vector<8x64xf32> to vector<8x16xf32>
    %353 = math.tanh %352 : vector<8x16xf32>
    %354 = vector.extract_strided_slice %339 {offsets = [0, 48], sizes = [8, 16], strides = [1, 1]} : vector<8x64xf32> to vector<8x16xf32>
    %355 = arith.negf %354 : vector<8x16xf32>
    %356 = math.exp %355 : vector<8x16xf32>
    %cst_126 = arith.constant 1.000000e+00 : f32
    %357 = vector.broadcast %cst_126 : f32 to vector<8x16xf32>
    %358 = arith.addf %357, %356 : vector<8x16xf32>
    %359 = arith.divf %357, %358 : vector<8x16xf32>
    %360 = arith.mulf %351, %327 : vector<8x16xf32>
    %361 = arith.mulf %345, %353 : vector<8x16xf32>
    %362 = arith.addf %360, %361 : vector<8x16xf32>
    %363 = math.tanh %362 : vector<8x16xf32>
    %364 = arith.mulf %359, %363 : vector<8x16xf32>
    %c56_127 = arith.constant 56 : index
    %c0_128 = arith.constant 0 : index
    %365 = vector.load %arg28[%c56_127, %c0_128] : memref<64x16xf32, #tpu.memory_space<vmem>>, vector<8x16xf32>
    tpu.vector_store %arg28[%c56_127, %c0_128], %364 {strides = array<i32>} : memref<64x16xf32, #tpu.memory_space<vmem>>, vector<8x16xf32>,
    %c0_129 = arith.constant 0 : index
    %c0_130 = arith.constant 0 : index
    %366 = vector.load %arg28[%c0_129, %c0_130] : memref<64x16xf32, #tpu.memory_space<vmem>>, vector<64x16xf32>
    %cst_131 = arith.constant 0.000000e+00 : f32
    %367 = vector.broadcast %cst_131 : f32 to vector<64x16xf32>
    %368 = arith.cmpf oge, %366, %367 : vector<64x16xf32>
    %cst_132 = arith.constant 0.00999999977 : f32
    %369 = vector.broadcast %cst_132 : f32 to vector<64x16xf32>
    %370 = arith.mulf %369, %366 : vector<64x16xf32>
    %371 = arith.select %368, %366, %370 : vector<64x16xi1>, vector<64x16xf32>
    %c0_133 = arith.constant 0 : index
    %c0_134 = arith.constant 0 : index
    %372 = vector.load %arg20[%c0_133, %c0_134] : memref<32x64xf32, #tpu.memory_space<vmem>>, vector<32x64xf32>
    %cst_135 = arith.constant dense<0.000000e+00> : vector<32x16xf32>
    %373 = tpu.matmul %372, %371, %cst_135 {dimension_numbers = #tpu.dot_dimension_numbers<[1], [0], [0], [1], [0, 0, 1, 1], [], []>} : vector<32x64xf32>, vector<64x16xf32>, vector<32x16xf32> -> vector<32x16xf32>
    %c0_136 = arith.constant 0 : index
    %c0_137 = arith.constant 0 : index
    %374 = vector.load %arg21[%c0_136, %c0_137] : memref<32x64xf32, #tpu.memory_space<vmem>>, vector<32x64xf32>
    %cst_138 = arith.constant dense<0.000000e+00> : vector<32x16xf32>
    %375 = tpu.matmul %374, %371, %cst_138 {dimension_numbers = #tpu.dot_dimension_numbers<[1], [0], [0], [1], [0, 0, 1, 1], [], []>} : vector<32x64xf32>, vector<64x16xf32>, vector<32x16xf32> -> vector<32x16xf32>
    %c0_139 = arith.constant 0 : index
    %c0_140 = arith.constant 0 : index
    %376 = vector.load %arg22[%c0_139, %c0_140] : memref<16x16xf32, #tpu.memory_space<vmem>>, vector<16x16xf32>
    %cst_141 = arith.constant dense<0.000000e+00> : vector<32x16xf32>
    %377 = tpu.matmul %373, %376, %cst_141 {dimension_numbers = #tpu.dot_dimension_numbers<[1], [0], [0], [1], [0, 0, 1, 1], [], []>} : vector<32x16xf32>, vector<16x16xf32>, vector<32x16xf32> -> vector<32x16xf32>
    %c0_142 = arith.constant 0 : index
    %c0_143 = arith.constant 0 : index
    %378 = vector.load %arg23[%c0_142, %c0_143] : memref<16x16xf32, #tpu.memory_space<vmem>>, vector<16x16xf32>
    %cst_144 = arith.constant dense<0.000000e+00> : vector<32x16xf32>
    %379 = tpu.matmul %375, %378, %cst_144 {dimension_numbers = #tpu.dot_dimension_numbers<[1], [0], [0], [1], [0, 0, 1, 1], [], []>} : vector<32x16xf32>, vector<16x16xf32>, vector<32x16xf32> -> vector<32x16xf32>
    %380 = arith.addf %377, %379 : vector<32x16xf32>
    %c0_145 = arith.constant 0 : index
    %c0_146 = arith.constant 0 : index
    %381 = vector.load %arg24[%c0_145, %c0_146] : memref<32x16xf32, #tpu.memory_space<vmem>>, vector<32x16xf32>
    %cst_147 = arith.constant dense<0.000000e+00> : vector<32x16xf32>
    %382 = tpu.matmul %58, %381, %cst_147 {dimension_numbers = #tpu.dot_dimension_numbers<[1], [0], [0], [1], [0, 0, 1, 1], [], []>} : vector<32x32xf32>, vector<32x16xf32>, vector<32x16xf32> -> vector<32x16xf32>
    %383 = arith.addf %380, %382 : vector<32x16xf32>
    %c0_148 = arith.constant 0 : index
    %c0_149 = arith.constant 0 : index
    %384 = vector.load %arg25[%c0_148, %c0_149] : memref<1x16xf32, #tpu.memory_space<vmem>>, vector<1x16xf32>
    %385 = vector.broadcast %384 : vector<1x16xf32> to vector<32x16xf32>
    %386 = arith.addf %383, %385 : vector<32x16xf32>
    %cst_150 = arith.constant 0.000000e+00 : f32
    %387 = vector.broadcast %cst_150 : f32 to vector<32x16xf32>
    %388 = arith.cmpf ogt, %386, %387 : vector<32x16xf32>
    %389 = math.exp %386 : vector<32x16xf32>
    %cst_151 = arith.constant 1.000000e+00 : f32
    %390 = vector.broadcast %cst_151 : f32 to vector<32x16xf32>
    %391 = arith.subf %389, %390 : vector<32x16xf32>
    %392 = arith.select %388, %386, %391 : vector<32x16xi1>, vector<32x16xf32>
    %393 = vector.shape_cast %392 : vector<32x16xf32> to vector<4x8x16xf32>
    %c0_152 = arith.constant 0 : index
    %c0_153 = arith.constant 0 : index
    %c0_154 = arith.constant 0 : index
    %394 = vector.load %arg26[%c0_152, %c0_153, %c0_154] : memref<4x8x16xf32, #tpu.memory_space<vmem>>, vector<4x8x16xf32>
    tpu.vector_store %arg26[%c0_152, %c0_153, %c0_154], %393 {strides = array<i32>} : memref<4x8x16xf32, #tpu.memory_space<vmem>>, vector<4x8x16xf32>,
    return
  }
  func.func @transform_0(%arg0: i32) -> (i32, i32, i32) {
    %c0_i32 = arith.constant 0 : i32
    %c0_i32_0 = arith.constant 0 : i32
    %c0_i32_1 = arith.constant 0 : i32
    return %arg0, %c0_i32, %c0_i32_0 : i32, i32, i32
  }
  func.func @transform_1(%arg0: i32) -> (i32, i32, i32) {
    %c0_i32 = arith.constant 0 : i32
    %c0_i32_0 = arith.constant 0 : i32
    %c0_i32_1 = arith.constant 0 : i32
    return %arg0, %c0_i32, %c0_i32_0 : i32, i32, i32
  }
  func.func @transform_2(%arg0: i32) -> (i32, i32, i32) {
    %c0_i32 = arith.constant 0 : i32
    %c0_i32_0 = arith.constant 0 : i32
    %c0_i32_1 = arith.constant 0 : i32
    return %arg0, %c0_i32, %c0_i32_0 : i32, i32, i32
  }
  func.func @transform_3(%arg0: i32) -> (i32, i32) {
    %c0_i32 = arith.constant 0 : i32
    %c0_i32_0 = arith.constant 0 : i32
    %c0_i32_1 = arith.constant 0 : i32
    return %c0_i32, %c0_i32_0 : i32, i32
  }
  func.func @transform_4(%arg0: i32) -> (i32, i32) {
    %c0_i32 = arith.constant 0 : i32
    %c0_i32_0 = arith.constant 0 : i32
    %c0_i32_1 = arith.constant 0 : i32
    return %c0_i32, %c0_i32_0 : i32, i32
  }
  func.func @transform_5(%arg0: i32) -> (i32, i32) {
    %c0_i32 = arith.constant 0 : i32
    %c0_i32_0 = arith.constant 0 : i32
    %c0_i32_1 = arith.constant 0 : i32
    return %c0_i32, %c0_i32_0 : i32, i32
  }
  func.func @transform_6(%arg0: i32) -> (i32, i32) {
    %c0_i32 = arith.constant 0 : i32
    %c0_i32_0 = arith.constant 0 : i32
    %c0_i32_1 = arith.constant 0 : i32
    return %c0_i32, %c0_i32_0 : i32, i32
  }
  func.func @transform_7(%arg0: i32) -> (i32, i32) {
    %c0_i32 = arith.constant 0 : i32
    %c0_i32_0 = arith.constant 0 : i32
    %c0_i32_1 = arith.constant 0 : i32
    return %c0_i32, %c0_i32_0 : i32, i32
  }
  func.func @transform_8(%arg0: i32) -> (i32, i32) {
    %c0_i32 = arith.constant 0 : i32
    %c0_i32_0 = arith.constant 0 : i32
    %c0_i32_1 = arith.constant 0 : i32
    return %c0_i32, %c0_i32_0 : i32, i32
  }
  func.func @transform_9(%arg0: i32) -> (i32, i32) {
    %c0_i32 = arith.constant 0 : i32
    %c0_i32_0 = arith.constant 0 : i32
    %c0_i32_1 = arith.constant 0 : i32
    return %c0_i32, %c0_i32_0 : i32, i32
  }
  func.func @transform_10(%arg0: i32) -> (i32, i32) {
    %c0_i32 = arith.constant 0 : i32
    %c0_i32_0 = arith.constant 0 : i32
    %c0_i32_1 = arith.constant 0 : i32
    return %c0_i32, %c0_i32_0 : i32, i32
  }
  func.func @transform_11(%arg0: i32) -> (i32, i32) {
    %c0_i32 = arith.constant 0 : i32
    %c0_i32_0 = arith.constant 0 : i32
    %c0_i32_1 = arith.constant 0 : i32
    return %c0_i32, %c0_i32_0 : i32, i32
  }
  func.func @transform_12(%arg0: i32) -> (i32, i32) {
    %c0_i32 = arith.constant 0 : i32
    %c0_i32_0 = arith.constant 0 : i32
    %c0_i32_1 = arith.constant 0 : i32
    return %c0_i32, %c0_i32_0 : i32, i32
  }
  func.func @transform_13(%arg0: i32) -> (i32, i32) {
    %c0_i32 = arith.constant 0 : i32
    %c0_i32_0 = arith.constant 0 : i32
    %c0_i32_1 = arith.constant 0 : i32
    return %c0_i32, %c0_i32_0 : i32, i32
  }
  func.func @transform_14(%arg0: i32) -> (i32, i32) {
    %c0_i32 = arith.constant 0 : i32
    %c0_i32_0 = arith.constant 0 : i32
    %c0_i32_1 = arith.constant 0 : i32
    return %c0_i32, %c0_i32_0 : i32, i32
  }
  func.func @transform_15(%arg0: i32) -> (i32, i32) {
    %c0_i32 = arith.constant 0 : i32
    %c0_i32_0 = arith.constant 0 : i32
    %c0_i32_1 = arith.constant 0 : i32
    return %c0_i32, %c0_i32_0 : i32, i32
  }
  func.func @transform_16(%arg0: i32) -> (i32, i32) {
    %c0_i32 = arith.constant 0 : i32
    %c0_i32_0 = arith.constant 0 : i32
    %c0_i32_1 = arith.constant 0 : i32
    return %c0_i32, %c0_i32_0 : i32, i32
  }
  func.func @transform_17(%arg0: i32) -> (i32, i32) {
    %c0_i32 = arith.constant 0 : i32
    %c0_i32_0 = arith.constant 0 : i32
    %c0_i32_1 = arith.constant 0 : i32
    return %c0_i32, %c0_i32_0 : i32, i32
  }
  func.func @transform_18(%arg0: i32) -> (i32, i32) {
    %c0_i32 = arith.constant 0 : i32
    %c0_i32_0 = arith.constant 0 : i32
    %c0_i32_1 = arith.constant 0 : i32
    return %c0_i32, %c0_i32_0 : i32, i32
  }
  func.func @transform_19(%arg0: i32) -> (i32, i32) {
    %c0_i32 = arith.constant 0 : i32
    %c0_i32_0 = arith.constant 0 : i32
    %c0_i32_1 = arith.constant 0 : i32
    return %c0_i32, %c0_i32_0 : i32, i32
  }
  func.func @transform_20(%arg0: i32) -> (i32, i32) {
    %c0_i32 = arith.constant 0 : i32
    %c0_i32_0 = arith.constant 0 : i32
    %c0_i32_1 = arith.constant 0 : i32
    return %c0_i32, %c0_i32_0 : i32, i32
  }
  func.func @transform_21(%arg0: i32) -> (i32, i32) {
    %c0_i32 = arith.constant 0 : i32
    %c0_i32_0 = arith.constant 0 : i32
    %c0_i32_1 = arith.constant 0 : i32
    return %c0_i32, %c0_i32_0 : i32, i32
  }
  func.func @transform_22(%arg0: i32) -> (i32, i32) {
    %c0_i32 = arith.constant 0 : i32
    %c0_i32_0 = arith.constant 0 : i32
    %c0_i32_1 = arith.constant 0 : i32
    return %c0_i32, %c0_i32_0 : i32, i32
  }
  func.func @transform_23(%arg0: i32) -> (i32, i32) {
    %c0_i32 = arith.constant 0 : i32
    %c0_i32_0 = arith.constant 0 : i32
    %c0_i32_1 = arith.constant 0 : i32
    return %c0_i32, %c0_i32_0 : i32, i32
  }
  func.func @transform_24(%arg0: i32) -> (i32, i32) {
    %c0_i32 = arith.constant 0 : i32
    %c0_i32_0 = arith.constant 0 : i32
    %c0_i32_1 = arith.constant 0 : i32
    return %c0_i32, %c0_i32_0 : i32, i32
  }
  func.func @transform_25(%arg0: i32) -> (i32, i32, i32) {
    %c0_i32 = arith.constant 0 : i32
    %c0_i32_0 = arith.constant 0 : i32
    %c0_i32_1 = arith.constant 0 : i32
    return %arg0, %c0_i32, %c0_i32_0 : i32, i32, i32
  }
}

</mosaic_0001>

<bundles_post_ra>
// kernel: gat_layer_forward.1
= control target key start
LH: loop header
LB: loop body
LE: loop exit
PB: predicated region body
PF: predicated region fallthrough
CT: control target
= control target key end

     0   :  { %s8120_s0 = inlined_call_operand.vmem [shape: f32[8,8,16], index: 0, kind: input, shape index: {}]   ;;  %s8121_s1 = inlined_call_operand.vmem [shape: f32[8,8,8], index: 1, kind: input, shape index: {}]   ;;  %s8122_s2 = inlined_call_operand.vmem [shape: f32[8,8,8], index: 2, kind: input, shape index: {}]   ;;  %s8123_s3 = inlined_call_operand.vmem [shape: f32[16,32], index: 3, kind: input, shape index: {}]   ;;  %s8124_s4 = inlined_call_operand.vmem [shape: f32[32,8], index: 4, kind: input, shape index: {}]   ;;  %s8125_s5 = inlined_call_operand.vmem [shape: f32[32,8], index: 5, kind: input, shape index: {}]   ;;  %s8126_s6 = inlined_call_operand.vmem [shape: f32[256,32], index: 6, kind: input, shape index: {}]   ;;  %s8127_s7 = inlined_call_operand.vmem [shape: f32[256,32], index: 7, kind: input, shape index: {}]   ;;  %s8128_s8 = inlined_call_operand.vmem [shape: f32[1,8], index: 8, kind: input, shape index: {}]   ;;  %s8129_s9 = inlined_call_operand.vmem [shape: f32[32,1], index: 9, kind: input, shape index: {}]   ;;  %s8130_s10 = inlined_call_operand.<no memory space> [shape: f32[1,1], index: 10, kind: input, shape index: {}]   ;;  %s8131_s11 = inlined_call_operand.vmem [shape: f32[8,64], index: 11, kind: input, shape index: {}]   ;;  %s8132_s12 = inlined_call_operand.vmem [shape: f32[8,64], index: 12, kind: input, shape index: {}]   ;;  %s8133_s13 = inlined_call_operand.vmem [shape: f32[1,64], index: 13, kind: input, shape index: {}]   ;;  %s8134_s14 = inlined_call_operand.vmem [shape: f32[1,64], index: 14, kind: input, shape index: {}]   ;;  %s8135_s15 = inlined_call_operand.vmem [shape: f32[16,64], index: 15, kind: input, shape index: {}]   ;;  %s8136_s16 = inlined_call_operand.vmem [shape: f32[16,64], index: 16, kind: input, shape index: {}]   ;;  %s8137_s17 = inlined_call_operand.vmem [shape: f32[64,32], index: 17, kind: input, shape index: {}]   ;;  %s8138_s18 = inlined_call_operand.vmem [shape: f32[64,32], index: 18, kind: input, shape index: {}]   ;;  %s8139_s19 = inlined_call_operand.vmem [shape: f32[32,64], index: 19, kind: input, shape index: {}]   ;;  %s8140_s20 = inlined_call_operand.vmem [shape: f32[32,64], index: 20, kind: input, shape index: {}]   ;;  %s8141_s21 = inlined_call_operand.vmem [shape: f32[16,16], index: 21, kind: input, shape index: {}]   ;;  %s8142_s22 = inlined_call_operand.vmem [shape: f32[16,16], index: 22, kind: input, shape index: {}]   ;;  %s8143_s23 = inlined_call_operand.vmem [shape: f32[32,16], index: 23, kind: input, shape index: {}]   ;;  %s8144_s24 = inlined_call_operand.vmem [shape: f32[1,16], index: 24, kind: input, shape index: {}]   ;;  %s8145_s25 = inlined_call_operand.hbm [shape: f32[8,8,16], index: 25, kind: output, shape index: {}]  }
   0x1   :  { %8164 = sst [smem:[#allocation14_spill]] %s8120_s0  ;;  %v30_v0 = vstv %s8130_s10 }
   0x2   :  { %8165 = sst [smem:[#allocation15_spill]] %s8121_s1  ;;  %31 = vst [vmem:[#allocation4] sm:$0x1] %v30_v0 }
   0x3   :  { %8166 = sst [smem:[#allocation16_spill]] %s8122_s2 }
   0x4   :  { %8167 = sst [smem:[#allocation17_spill]] %s8123_s3 }
   0x5   :  { %8168 = sst [smem:[#allocation18_spill]] %s8124_s4 }
   0x6   :  { %8169 = sst [smem:[#allocation19_spill]] %s8125_s5 }
   0x7   :  { %8170 = sst [smem:[#allocation20_spill]] %s8126_s6 }
   0x8   :  { %8171 = sst [smem:[#allocation21_spill]] %s8127_s7 }
   0x9   :  { %8172 = sst [smem:[#allocation22_spill]] %s8128_s8 }
   0xa   :  { %8173 = sst [smem:[#allocation23_spill]] %s8129_s9 }
   0xb   :  { %8174 = sst [smem:[#allocation24_spill]] %s8145_s25 }
   0xc   :  { %32 = vsyncpa [#allocation6], 0 }
   0xd   :  { %34 = vsyncpa [#allocation6 + $0x1], 0  ;;  %s6944_s6 = smov 0   ;;  %s6946_s30 = smov 0  }
   0xe   :  { %s6948_s7 = smov 0   ;;  %s6950_s3 = smov 0  }
   0xf LB: > { %8175 = sst [smem:[#allocation8_spill]] %s6787_s6  ;;  %s6965_s10 = sadd.s32 4294967295, %s6799_s3   ;;  %s6799_s3 = sphi %s6950_s3, %s8199_s3   ;;  %s6795_s7 = sphi %s6948_s7, %s8201_s7   ;;  %s6791_s30 = sphi %s6946_s30, %s8203_s30   ;;  %s6787_s6 = sphi %s6944_s6, %s8202_s6  }
  0x10   : > { %8176 = sst [smem:[#allocation9_spill]] %s6795_s7  ;;  %s5756_s26 = sadd.s32 4294967294, %s6799_s3  }
  0x11   : > { %8177 = sst [smem:[#allocation10_spill]] %s6799_s3  ;;  %s6969_s1 = sadd.s32 1, %s6799_s3  }
  0x12   : > { %8178 = sst [smem:[#allocation11_spill]] %s6969_s1  ;;  %s587_s8 = sadd.s32 1, %s6795_s7 }
  0x13   : > { %s584_s27 = ssub.s32 %s6799_s3, %s6969_s1  ;;  %p597_p0 = scmp.ne.s32.totalorder %s6795_s7, %s6791_s30 }
  0x14   : > { %p585_p1 = scmp.eq.s32.totalorder %s584_s27, 0  ;;  %p598_p2 = scmp.eq.s32.totalorder %s6965_s10, 1 }
  0x15   : > { %p603_p3 = scmp.ne.s32.totalorder %s6791_s30, %s6787_s6  ;;  %p604_p4 = scmp.eq.s32.totalorder %s5756_s26, 1 }
  0x16   : > { %s6980_s4 = scalar_select %p585_p1, %s6795_s7, %s587_s8  }
  0x17   : > { %p6982_p5 = por %p598_p2, %p597_p0  ;;  %p6986_p6 = por %p604_p4, %p603_p3 }
  0x18   : > { %8179 = sst [smem:[#allocation12_spill]] %s6980_s4  ;;  %p5759_p7 = scmp.ge.s32.totalorder %s6799_s3, 1 }
  0x19   : > { %s8181_s9 = scalar_select %p6986_p6, 1, 0 }
  0x1a   : > { %p715_p8 = scmp.lt.s32.totalorder %s6799_s3, 3 }
  0x1b   : > { %8182 = sst [smem:[#allocation13_spill]] %s8181_s9 }
  0x1c   : > { %p716_p9 = pnand %p5759_p7, %p715_p8 }
  0x1d   : > { %s8183_s29 = sld [smem:[#allocation17_spill]] (!%p716_p9)  ;;  %s5761_s8 = sshll.u32 (!%p716_p9), %s6965_s10, 2 }
  0x1e   : > { %719 = sbr.rel (%p716_p9) target bundleno = 7533 (0x1d6d), region = 120  ;;  %s8184_s7 = sld [smem:[#allocation18_spill]] (!%p716_p9) }
  0x1f   : > { %p794_p10 = scmp.lt.s32.totalorder (!%p716_p9), %s5761_s8, 7  ;;  %s8186_s3 = sld [smem:[#allocation19_spill]] (!%p716_p9) }
  0x20   : > { %s8188_s6 = sld [smem:[#allocation14_spill]] (!%p716_p9)  ;;  %s6805_s2 = smov (!%p716_p9), 16  }
  0x21   : > { %s8190_s0 = sld [smem:[#allocation20_spill]] (!%p716_p9) }
  0x22   : > { %s8192_s27 = sld [smem:[#allocation23_spill]] (!%p716_p9) }
  0x23   : > { %v817_v1 = vld [vmem:[%s8183_s29 + $0x8] sm:$0xff]  ;;  %v816_v2 = vld [vmem:[%s8183_s29] sm:$0xff]  ;;  %s8205_s8 = smov (!%p794_p10, %s5761_s8), 7  ;;  %vm818_vm0 = vcmask 130048   ;;  %vm920_vm1 = vcmask 261120   ;;  %v2053_v21 = vlaneseq  ;;  %vm1948_vm3 = vcmask 64512  }
  0x24   : > { %s8185_s1 = smov %s8184_s7  ;;  %v919_v3 = vld [vmem:[%s8184_s7 + $0x18] sm:$0xff]  ;;  %6171 = vmatprep.subr.mxu0 %v817_v1  ;;  %s7008_s4 = sshll.u32 %s8205_s8, 3 }
  0x25   : > { %6181 = vmatprep.subr.mxu1 %v919_v3  ;;  %v918_v4 = vld [vmem:[%s8185_s1 + $0x10] sm:$0xff]  ;;  %6172 = vmatpush3.msra.mxu0 %v817_v1  ;;  %s8187_s25 = smov %s8186_s3  ;;  %v1021_v5 = vld [vmem:[%s8186_s3 + $0x18] sm:$0xff]  ;;  %v917_v11 = vld [vmem:[%s8185_s1 + $0x8] sm:$0xff]  ;;  %s8189_s8 = sld [smem:[#allocation21_spill]]  ;;  %v7072_v22 = vshrl.u32 %v2053_v21, 7 }
  0x26   : > { %6182 = vmatpush3.msra.mxu1 %v919_v3  ;;  %6173 = vmatprep.subr.mxu0 %v816_v2  ;;  %s797_s9 = scalar_lea.vmem %s8188_s6, %s7008_s4  ;;  %v1020_v8 = vld [vmem:[%s8187_s25 + $0x10] sm:$0xff]  ;;  %v1019_v12 = vld [vmem:[%s8187_s25 + $0x8] sm:$0xff]  ;;  %v916_v13 = vld [vmem:[%s8185_s1] sm:$0xff]  ;;  %s8191_s6 = sld [smem:[#allocation16_spill]] }
  0x27   : > { %6183 = vmatprep.subr.mxu1 %v918_v4  ;;  %6174 = vmatpush3.msra.mxu0 %v816_v2  ;;  %v812_v6 = vld [vmem:[%s797_s9] sm:$0xff]  ;;  %v813_v7 = vld [vmem:[%s797_s9 + $0x8] sm:$0xff]  ;;  %v814_v9 = vld [vmem:[%s797_s9 + $0x10] sm:$0xff]  ;;  %v2062_v24 = vsub.s32 1, %v7072_v22  ;;  %v2055_v25 = vsub.s32 0, %v7072_v22  ;;  %v7078_v26 = vsub.s32 3, %v7072_v22 }
  0x28   : > { %6184 = vmatpush3.msra.mxu1 %v918_v4  ;;  %6195 = vmatprep.subr.mxu0 %v1021_v5  ;;  %v815_v10 = vld [vmem:[%s797_s9 + $0x18] sm:$0xff]  ;;  %v1018_v14 = vld [vmem:[%s8187_s25] sm:$0xff]  ;;  %v2069_v27 = vsub.s32 2, %v7072_v22  ;;  %v7083_v32 = vsub.s32 5, %v7072_v22  ;;  %v7086_v33 = vsub.s32 4, %v7072_v22  ;;  %v7092_v39 = vsub.s32 6, %v7072_v22 }
  0x29   : > { %6175 = vmatprep.mubr.msk.f32.mxu0 %vm818_vm0, %v812_v6  ;;  %6185 = vmatprep.subr.mxu1 %v917_v11  ;;  %v1107_v20 = vld [vmem:[%s8190_s0] sm:$0xff]  ;;  %v7096_v42 = vsub.s32 7, %v7072_v22  ;;  %v1108_v2 = vld [vmem:[%s8190_s0 + $0x8] sm:$0xff]  ;;  %v1109_v4 = vld [vmem:[%s8190_s0 + $0x10] sm:$0xff]  ;;  %s8194_s26 = sld [smem:[#allocation15_spill]]  ;;  %s6804_s1 = smov 96  }
  0x2a   : > { %6176 = vmatmul.mubr.msk.f32.vlgmr.msra.gmra.mxu0 %vm818_vm0, %v813_v7  ;;  %6186 = vmatpush3.msra.mxu1 %v917_v11  ;;  %v2697_v6 = vld [vmem:[%s8192_s27 + $0x18] sm:$0xff]  ;;  %v6801_v7 = vmov 0.0   ;;  %v1111_v11 = vld [vmem:[%s8190_s0 + $0x20] sm:$0xff]  ;;  %s5934_s7 = sshll.u32 %s6965_s10, 9  ;;  %s6808_s3 = smov [#allocation5]  }
  0x2b   : > { %6178 = vmatprep.mubr.msk.f32.mxu0 %vm818_vm0, %v814_v9  ;;  %6196 = vmatpush3.msra.mxu0 %v1021_v5  ;;  %v1139_v19 = vld [vmem:[%s8189_s8] sm:$0xff]  ;;  %v1140_v1 = vld [vmem:[%s8189_s8 + $0x8] sm:$0xff]  ;;  %v1141_v3 = vld [vmem:[%s8189_s8 + $0x10] sm:$0xff] }
  0x2c   : > { %6197 = vmatprep.subr.mxu0 %v1020_v8  ;;  %6187 = vmatprep.subr.mxu1 %v916_v13  ;;  %s7069_s9 = scalar_lea.vmem %s8191_s6, %s7008_s4  ;;  %v1110_v9 = vld [vmem:[%s8190_s0 + $0x18] sm:$0xff]  ;;  %s8193_s6 = sld [smem:[#allocation22_spill]] }
  0x2d   : > { %6198 = vmatpush3.msra.mxu0 %v1020_v8  ;;  %6188 = vmatpush3.msra.mxu1 %v916_v13  ;;  %v2045_v23 = vld [vmem:[%s7069_s9] sm:$0xff]  ;;  %v2046_v36 = vld [vmem:[%s7069_s9 + $0x8] sm:$0xff]  ;;  %v7103_v47 = vld [vmem:[%s7069_s9 + $0x10] sm:$0xff] }
  0x2e   : > { %6179 = vmatmul.mubr.msk.f32.gmra.mxu0 %vm818_vm0, %v815_v10  ;;  %6199 = vmatprep.subr.mxu0 %v1019_v12  ;;  %v2063_v28 = vrot.slane %v2045_v23, %v2062_v24  ;;  %v2056_v29 = vrot.slane %v2045_v23, %v2055_v25  ;;  %v2077_v30 = vrot.slane %v2045_v23, %v7078_v26  ;;  %v7108_v50 = vld [vmem:[%s7069_s9 + $0x18] sm:$0xff]  ;;  %v1143_v10 = vld [vmem:[%s8189_s8 + $0x20] sm:$0xff]  ;;  %s6807_s9 = smov 80  }
  0x2f   : > { %6200 = vmatpush3.msra.mxu0 %v1019_v12  ;;  %v2070_v31 = vrot.slane %v2045_v23, %v2069_v27  ;;  %v2091_v34 = vrot.slane %v2045_v23, %v7083_v32  ;;  %v2084_v35 = vrot.slane %v2045_v23, %v7086_v33  ;;  %v2119_v37 = vrot.slane %v2046_v36, %v2062_v24  ;;  %v1142_v8 = vld [vmem:[%s8189_s8 + $0x18] sm:$0xff]  ;;  %s7560_s5 = scalar_lea.vmem %s8194_s26, %s7008_s4  ;;  %s790_s26 = sand.u32 1, %s6791_s30  }
  0x30   : > { %6201 = vmatprep.subr.mxu0 %v1018_v14  ;;  %2065 = vbcast.lane.b32.xlu1 %v2063_v28, 256  ;;  %v2112_v38 = vrot.slane %v2046_v36, %v2055_v25  ;;  %v2126_v40 = vrot.slane %v2046_v36, %v2069_v27  ;;  %v2098_v41 = vrot.slane %v2045_v23, %v7092_v39  ;;  %v1146_v28 = vld [vmem:[%s8189_s8 + $0x38] sm:$0xff]  ;;  %s8080_s10 = scalar_lea.sflag [#allocation6], %s790_s26 }
  0x31   : > { %6202 = vmatpush3.msra.mxu0 %v1018_v14  ;;  %2058 = vbcast.lane.b32.xlu0 %v2056_v29, 256  ;;  %v2133_v43 = vrot.slane %v2046_v36, %v7078_v26  ;;  %v2105_v44 = vrot.slane %v2045_v23, %v7096_v42  ;;  %v2147_v45 = vrot.slane %v2046_v36, %v7083_v32  ;;  %v2696_v14 = vld [vmem:[%s8192_s27 + $0x10] sm:$0xff]  ;;  %v1114_v29 = vld [vmem:[%s8190_s0 + $0x38] sm:$0xff] }
  0x32   : > { %v2140_v46 = vrot.slane %v2046_v36, %v7086_v33  ;;  %v2175_v48 = vrot.slane %v7103_v47, %v2062_v24  ;;  %v2168_v49 = vrot.slane %v7103_v47, %v2055_v25  ;;  %v2231_v51 = vrot.slane %v7108_v50, %v2062_v24  ;;  %v1145_v23 = vld [vmem:[%s8189_s8 + $0x30] sm:$0xff] }
  0x33   : > { %v2224_v52 = vrot.slane %v7108_v50, %v2055_v25  ;;  %v2182_v53 = vrot.slane %v7103_v47, %v2069_v27  ;;  %v2154_v54 = vrot.slane %v2046_v36, %v7092_v39  ;;  %v2161_v55 = vrot.slane %v2046_v36, %v7096_v42  ;;  %v1113_v24 = vld [vmem:[%s8190_s0 + $0x30] sm:$0xff]  ;;  %v1116_v36 = vld [vmem:[%s8190_s0 + $0x48] sm:$0xff] }
  0x34   : > { %2079 = vbcast.lane.b32.xlu1 %v2077_v30, 256  ;;  %v2238_v56 = vrot.slane %v7108_v50, %v2069_v27  ;;  %v2245_v5 = vrot.slane %v7108_v50, %v7078_v26  ;;  %v2189_v12 = vrot.slane %v7103_v47, %v7078_v26  ;;  %v2252_v13 = vrot.slane %v7108_v50, %v7086_v33  ;;  %v2695_v27 = vld [vmem:[%s8192_s27 + $0x8] sm:$0xff]  ;;  %v1147_v30 = vld [vmem:[%s8189_s8 + $0x40] sm:$0xff] }
  0x35   : > { %2072 = vbcast.lane.b32.xlu0 %v2070_v31, 256  ;;  %v2196_v25 = vrot.slane %v7103_v47, %v7086_v33  ;;  %v2259_v26 = vrot.slane %v7108_v50, %v7083_v32  ;;  %v1115_v31 = vld [vmem:[%s8190_s0 + $0x40] sm:$0xff]  ;;  %v2203_v33 = vrot.slane %v7103_v47, %v7083_v32  ;;  %v1148_v32 = vld [vmem:[%s8189_s8 + $0x48] sm:$0xff] }
  0x38   : > { %2093 = vbcast.lane.b32.xlu1 %v2091_v34, 256  ;;  %v2266_v34 = vrot.slane %v7108_v50, %v7092_v39 }
  0x39   : > { %2086 = vbcast.lane.b32.xlu0 %v2084_v35, 256  ;;  %v2694_v35 = vld [vmem:[%s8192_s27] sm:$0xff] }
  0x3c   : > { %2121 = vbcast.lane.b32.xlu1 %v2119_v37, 256  ;;  %v1149_v37 = vld [vmem:[%s8189_s8 + $0x50] sm:$0xff] }
  0x3d   : > { %2114 = vbcast.lane.b32.xlu0 %v2112_v38, 256  ;;  %v1117_v38 = vld [vmem:[%s8190_s0 + $0x50] sm:$0xff] }
  0x40   : > { %2128 = vbcast.lane.b32.xlu1 %v2126_v40, 256  ;;  %v2210_v40 = vrot.slane %v7103_v47, %v7092_v39  ;;  %v1118_v39 = vld [vmem:[%s8190_s0 + $0x58] sm:$0xff] }
  0x41   : > { %2100 = vbcast.lane.b32.xlu0 %v2098_v41, 256  ;;  %v2273_v41 = vrot.slane %v7108_v50, %v7096_v42  ;;  %v1154_v50 = vld [vmem:[%s8189_s8 + $0x78] sm:$0xff] }
  0x44   : > { %2135 = vbcast.lane.b32.xlu1 %v2133_v43, 256  ;;  %v1150_v43 = vld [vmem:[%s8189_s8 + $0x58] sm:$0xff] }
  0x45   : > { %2107 = vbcast.lane.b32.xlu0 %v2105_v44, 256  ;;  %v1151_v44 = vld [vmem:[%s8189_s8 + $0x60] sm:$0xff] }
  0x48   : > { %2149 = vbcast.lane.b32.xlu1 %v2147_v45, 256  ;;  %v1119_v45 = vld [vmem:[%s8190_s0 + $0x60] sm:$0xff] }
  0x49   : > { %2142 = vbcast.lane.b32.xlu0 %v2140_v46, 256  ;;  %v2217_v46 = vrot.slane %v7103_v47, %v7096_v42  ;;  %v1153_v42 = vld [vmem:[%s8189_s8 + $0x70] sm:$0xff] }
  0x4a   : > { %v1121_v47 = vld [vmem:[%s8190_s0 + $0x70] sm:$0xff] }
  0x4c   : > { %2177 = vbcast.lane.b32.xlu1 %v2175_v48, 256  ;;  %v1152_v48 = vld [vmem:[%s8189_s8 + $0x68] sm:$0xff] }
  0x4d   : > { %2170 = vbcast.lane.b32.xlu0 %v2168_v49, 256  ;;  %v1120_v49 = vld [vmem:[%s8190_s0 + $0x68] sm:$0xff] }
  0x50   : > { %2233 = vbcast.lane.b32.xlu1 %v2231_v51, 256  ;;  %v1122_v51 = vld [vmem:[%s8190_s0 + $0x78] sm:$0xff] }
  0x51   : > { %2226 = vbcast.lane.b32.xlu0 %v2224_v52, 256  ;;  %v1155_v52 = vld [vmem:[%s8189_s8 + $0x80] sm:$0xff] }
  0x54   : > { %2184 = vbcast.lane.b32.xlu1 %v2182_v53, 256  ;;  %v1123_v53 = vld [vmem:[%s8190_s0 + $0x80] sm:$0xff] }
  0x55   : > { %2156 = vbcast.lane.b32.xlu0 %v2154_v54, 256  ;;  %v1156_v54 = vld [vmem:[%s8189_s8 + $0x88] sm:$0xff] }
  0x58   : > { %2163 = vbcast.lane.b32.xlu1 %v2161_v55, 256  ;;  %v1124_v55 = vld [vmem:[%s8190_s0 + $0x88] sm:$0xff] }
  0x59   : > { %2240 = vbcast.lane.b32.xlu0 %v2238_v56, 256  ;;  %v1157_v56 = vld [vmem:[%s8189_s8 + $0x90] sm:$0xff] }
  0x5c   : > { %2247 = vbcast.lane.b32.xlu1 %v2245_v5, 256  ;;  %v1131_v5 = vld [vmem:[%s8190_s0 + $0xc0] sm:$0xff] }
  0x5d   : > { %2191 = vbcast.lane.b32.xlu0 %v2189_v12, 256  ;;  %v1134_v12 = vld [vmem:[%s8190_s0 + $0xd8] sm:$0xff] }
  0x60   : > { %2254 = vbcast.lane.b32.xlu1 %v2252_v13, 256  ;;  %v1167_v13 = vld [vmem:[%s8189_s8 + $0xe0] sm:$0xff] }
  0x61   : > { %2198 = vbcast.lane.b32.xlu0 %v2196_v25, 256  ;;  %v1170_v25 = vld [vmem:[%s8189_s8 + $0xf8] sm:$0xff] }
  0x64   : > { %2261 = vbcast.lane.b32.xlu1 %v2259_v26, 256  ;;  %v1138_v26 = vld [vmem:[%s8190_s0 + $0xf8] sm:$0xff] }
  0x65   : > { %2205 = vbcast.lane.b32.xlu0 %v2203_v33, 256 }
  0x68   : > { %2268 = vbcast.lane.b32.xlu1 %v2266_v34, 256 }
  0x69   : > { %2212 = vbcast.lane.b32.xlu0 %v2210_v40, 256 }
  0x6c   : > { %2275 = vbcast.lane.b32.xlu1 %v2273_v41, 256 }
  0x6d   : > { %2219 = vbcast.lane.b32.xlu0 %v2217_v46, 256 }
  0xea   : > { %v7033_v15 = vpop.f32.mrf.mxu0 }
  0xec   : > { %v7035_v16 = vpop.f32.mrf.mxu0 }
  0xed   : > { %6189 = vmatprep.mubr.msk.f32.mxu1 %vm920_vm1, %v7035_v16  ;;  %6203 = vmatprep.mubr.msk.f32.mxu0 %vm920_vm1, %v7035_v16 }
  0xee   : > { %v7041_v17 = vpop.f32.mrf.mxu0  ;;  %6190 = vmatmul.mubr.msk.f32.vlgmr.msra.gmra.mxu1 %vm920_vm1, %v7033_v15  ;;  %6204 = vmatmul.mubr.msk.f32.vlgmr.msra.gmra.mxu0 %vm920_vm1, %v7033_v15 }
  0xf0   : > { %v7047_v18 = vpop.f32.mrf.mxu0 }
  0xf1   : > { %6192 = vmatprep.mubr.msk.f32.mxu1 %vm920_vm1, %v7047_v18  ;;  %6206 = vmatprep.mubr.msk.f32.mxu0 %vm920_vm1, %v7047_v18 }
  0xf2   : > { %6193 = vmatmul.mubr.msk.f32.gmra.mxu1 %vm920_vm1, %v7041_v17  ;;  %6207 = vmatmul.mubr.msk.f32.gmra.mxu0 %vm920_vm1, %v7041_v17 }
  0xf3   : > { %6217 = vmatprep.mubr.msk.f32.mxu1 %vm920_vm1, %v1139_v19  ;;  %6273 = vmatprep.mubr.msk.f32.mxu0 %vm920_vm1, %v1107_v20  ;;  %v1144_v19 = vld [vmem:[%s8189_s8 + $0x28] sm:$0xff] }
  0xf4   : > { %v1112_v20 = vld [vmem:[%s8190_s0 + $0x28] sm:$0xff] }
 0x1ae   : > { %v6191_v57 = vpop.f32.mrf.mxu1  ;;  %v6205_v58 = vpop.f32.mrf.mxu0 }
 0x1b0   : > { %v999_v59 = vpop.f32.mrf.mxu1  ;;  %v1088_v60 = vpop.f32.mrf.mxu0 }
 0x1b2   : > { %v6194_v61 = vpop.f32.mrf.mxu1  ;;  %v6208_v62 = vpop.f32.mrf.mxu0 }
 0x1b3   : > { %6209 = vmatprep.subr.mxu1 %v6208_v62  ;;  %6265 = vmatprep.subr.mxu0 %v6194_v61 }
 0x1b4   : > { %v1009_v63 = vpop.f32.mrf.mxu1  ;;  %v1098_v0 = vpop.f32.mrf.mxu0  ;;  %6210 = vmatpush3.msra.mxu1 %v6208_v62  ;;  %6266 = vmatpush3.msra.mxu0 %v6194_v61  ;;  %v1127_v61 = vld [vmem:[%s8190_s0 + $0xa0] sm:$0xff]  ;;  %v1160_v62 = vld [vmem:[%s8189_s8 + $0xa8] sm:$0xff] }
 0x1b5   : > { %6211 = vmatprep.subr.mxu1 %v1098_v0  ;;  %6267 = vmatprep.subr.mxu0 %v1009_v63 }
 0x1b6   : > { %6212 = vmatpush3.msra.mxu1 %v1098_v0  ;;  %6268 = vmatpush3.msra.mxu0 %v1009_v63  ;;  %v1128_v63 = vld [vmem:[%s8190_s0 + $0xa8] sm:$0xff]  ;;  %v1161_v0 = vld [vmem:[%s8189_s8 + $0xb0] sm:$0xff] }
 0x1b7   : > { %6213 = vmatprep.subr.mxu1 %v6205_v58  ;;  %6269 = vmatprep.subr.mxu0 %v6191_v57 }
 0x1b8   : > { %6214 = vmatpush3.msra.mxu1 %v6205_v58  ;;  %6270 = vmatpush3.msra.mxu0 %v6191_v57  ;;  %v1125_v57 = vld [vmem:[%s8190_s0 + $0x90] sm:$0xff]  ;;  %v1158_v58 = vld [vmem:[%s8189_s8 + $0x98] sm:$0xff] }
 0x1b9   : > { %6215 = vmatprep.subr.mxu1 %v1088_v60  ;;  %6271 = vmatprep.subr.mxu0 %v999_v59 }
 0x1ba   : > { %6216 = vmatpush3.msra.mxu1 %v1088_v60  ;;  %6272 = vmatpush3.msra.mxu0 %v999_v59  ;;  %v1126_v59 = vld [vmem:[%s8190_s0 + $0x98] sm:$0xff]  ;;  %v1159_v60 = vld [vmem:[%s8189_s8 + $0xa0] sm:$0xff] }
 0x1bb   : > { %6218 = vmatmul.mubr.msk.f32.vlgmr.msra.gmra.mxu1 %vm920_vm1, %v1140_v1  ;;  %6274 = vmatmul.mubr.msk.f32.vlgmr.msra.gmra.mxu0 %vm920_vm1, %v1108_v2  ;;  %v1129_v1 = vld [vmem:[%s8190_s0 + $0xb0] sm:$0xff]  ;;  %v1162_v2 = vld [vmem:[%s8189_s8 + $0xb8] sm:$0xff] }
 0x1bc   : > { %6335 = vmatprep.subr.mxu0 %v6801_v7  ;;  %6220 = vmatprep.mubr.msk.f32.mxu1 %vm920_vm1, %v1141_v3  ;;  %v1130_v3 = vld [vmem:[%s8190_s0 + $0xb8] sm:$0xff] }
 0x1bd   : > { %6336 = vmatpush3.msra.mxu0 %v7035_v16  ;;  %6276 = vmatprep.mubr.msk.f32.mxu0 %vm920_vm1, %v1109_v4  ;;  %v1163_v4 = vld [vmem:[%s8189_s8 + $0xc0] sm:$0xff] }
 0x1be   : > { %6321 = vmatprep.subr.mxu1 %v2697_v6  ;;  %6340 = vmatprep.subr.mxu0 %v6801_v7 }
 0x1bf   : > { %6221 = vmatmul.mubr.msk.f32.gmra.mxu1 %vm920_vm1, %v1142_v8  ;;  %6277 = vmatmul.mubr.msk.f32.gmra.mxu0 %vm920_vm1, %v1110_v9  ;;  %v1132_v8 = vld [vmem:[%s8190_s0 + $0xc8] sm:$0xff]  ;;  %v1165_v9 = vld [vmem:[%s8189_s8 + $0xd0] sm:$0xff] }
 0x1c0   : > { %6223 = vmatprep.mubr.msk.f32.mxu1 %vm920_vm1, %v1143_v10  ;;  %6279 = vmatprep.mubr.msk.f32.mxu0 %vm920_vm1, %v1111_v11  ;;  %v1133_v10 = vld [vmem:[%s8190_s0 + $0xd0] sm:$0xff]  ;;  %v1166_v11 = vld [vmem:[%s8189_s8 + $0xd8] sm:$0xff] }
 0x1c1   : > { %6322 = vmatpush3.msra.mxu1 %v2697_v6  ;;  %v1164_v6 = vld [vmem:[%s8189_s8 + $0xc8] sm:$0xff] }
 0x1c2   : > { %6323 = vmatprep.subr.mxu1 %v2696_v14 }
 0x1c3   : > { %6224 = vmatmul.mubr.msk.f32.gmra.mxu1 %vm920_vm1, %v1144_v19  ;;  %6280 = vmatmul.mubr.msk.f32.gmra.mxu0 %vm920_vm1, %v1112_v20  ;;  %v1168_v19 = vld [vmem:[%s8189_s8 + $0xe8] sm:$0xff] }
 0x1c4   : > { %6226 = vmatprep.mubr.msk.f32.mxu1 %vm920_vm1, %v1145_v23  ;;  %6282 = vmatprep.mubr.msk.f32.mxu0 %vm920_vm1, %v1113_v24  ;;  %v1136_v20 = vld [vmem:[%s8190_s0 + $0xe8] sm:$0xff]  ;;  %v1169_v23 = vld [vmem:[%s8189_s8 + $0xf0] sm:$0xff] }
 0x1c5   : > { %6324 = vmatpush3.msra.mxu1 %v2696_v14  ;;  %v1135_v14 = vld [vmem:[%s8190_s0 + $0xe0] sm:$0xff]  ;;  %v1137_v24 = vld [vmem:[%s8190_s0 + $0xf0] sm:$0xff] }
 0x1c6   : > { %6325 = vmatprep.subr.mxu1 %v2695_v27 }
 0x1c7   : > { %6227 = vmatmul.mubr.msk.f32.gmra.mxu1 %vm920_vm1, %v1146_v28  ;;  %6283 = vmatmul.mubr.msk.f32.gmra.mxu0 %vm920_vm1, %v1114_v29 }
 0x1c8   : > { %6229 = vmatprep.mubr.msk.f32.mxu1 %vm920_vm1, %v1147_v30  ;;  %6285 = vmatprep.mubr.msk.f32.mxu0 %vm920_vm1, %v1115_v31 }
 0x1c9   : > { %6326 = vmatpush3.msra.mxu1 %v2695_v27 }
 0x1ca   : > { %6327 = vmatprep.subr.mxu1 %v2694_v35 }
 0x1cb   : > { %6230 = vmatmul.mubr.msk.f32.gmra.mxu1 %vm920_vm1, %v1148_v32  ;;  %6286 = vmatmul.mubr.msk.f32.gmra.mxu0 %vm920_vm1, %v1116_v36 }
 0x1cc   : > { %6232 = vmatprep.mubr.msk.f32.mxu1 %vm920_vm1, %v1149_v37  ;;  %6288 = vmatprep.mubr.msk.f32.mxu0 %vm920_vm1, %v1117_v38 }
 0x1cd   : > { %6328 = vmatpush3.msra.mxu1 %v2694_v35 }
 0x1ce   : > { %6345 = vmatprep.subr.mxu1 %v6801_v7 }
 0x1cf   : > { %6233 = vmatmul.mubr.msk.f32.gmra.mxu1 %vm920_vm1, %v1150_v43  ;;  %6289 = vmatmul.mubr.msk.f32.gmra.mxu0 %vm920_vm1, %v1118_v39 }
 0x1d0   : > { %6235 = vmatprep.mubr.msk.f32.mxu1 %vm920_vm1, %v1151_v44  ;;  %6291 = vmatprep.mubr.msk.f32.mxu0 %vm920_vm1, %v1119_v45 }
 0x1d3   : > { %6236 = vmatmul.mubr.msk.f32.gmra.mxu1 %vm920_vm1, %v1152_v48  ;;  %6292 = vmatmul.mubr.msk.f32.gmra.mxu0 %vm920_vm1, %v1120_v49 }
 0x1d4   : > { %6238 = vmatprep.mubr.msk.f32.mxu1 %vm920_vm1, %v1153_v42  ;;  %6294 = vmatprep.mubr.msk.f32.mxu0 %vm920_vm1, %v1121_v47 }
 0x1d7   : > { %6239 = vmatmul.mubr.msk.f32.gmra.mxu1 %vm920_vm1, %v1154_v50  ;;  %6295 = vmatmul.mubr.msk.f32.gmra.mxu0 %vm920_vm1, %v1122_v51 }
 0x1d8   : > { %6241 = vmatprep.mubr.msk.f32.mxu1 %vm920_vm1, %v1155_v52  ;;  %6297 = vmatprep.mubr.msk.f32.mxu0 %vm920_vm1, %v1123_v53 }
 0x1db   : > { %6242 = vmatmul.mubr.msk.f32.gmra.mxu1 %vm920_vm1, %v1156_v54  ;;  %6298 = vmatmul.mubr.msk.f32.gmra.mxu0 %vm920_vm1, %v1124_v55 }
 0x1dc   : > { %6244 = vmatprep.mubr.msk.f32.mxu1 %vm920_vm1, %v1157_v56  ;;  %6300 = vmatprep.mubr.msk.f32.mxu0 %vm920_vm1, %v1125_v57 }
 0x1df   : > { %6245 = vmatmul.mubr.msk.f32.gmra.mxu1 %vm920_vm1, %v1158_v58  ;;  %6301 = vmatmul.mubr.msk.f32.gmra.mxu0 %vm920_vm1, %v1126_v59 }
 0x1e0   : > { %6247 = vmatprep.mubr.msk.f32.mxu1 %vm920_vm1, %v1159_v60  ;;  %6303 = vmatprep.mubr.msk.f32.mxu0 %vm920_vm1, %v1127_v61 }
 0x1e3   : > { %6248 = vmatmul.mubr.msk.f32.gmra.mxu1 %vm920_vm1, %v1160_v62  ;;  %6304 = vmatmul.mubr.msk.f32.gmra.mxu0 %vm920_vm1, %v1128_v63 }
 0x1e4   : > { %6250 = vmatprep.mubr.msk.f32.mxu1 %vm920_vm1, %v1161_v0  ;;  %6306 = vmatprep.mubr.msk.f32.mxu0 %vm920_vm1, %v1129_v1 }
 0x1e7   : > { %6251 = vmatmul.mubr.msk.f32.gmra.mxu1 %vm920_vm1, %v1162_v2  ;;  %6307 = vmatmul.mubr.msk.f32.gmra.mxu0 %vm920_vm1, %v1130_v3 }
 0x1e8   : > { %6253 = vmatprep.mubr.msk.f32.mxu1 %vm920_vm1, %v1163_v4  ;;  %6309 = vmatprep.mubr.msk.f32.mxu0 %vm920_vm1, %v1131_v5 }
 0x1eb   : > { %6254 = vmatmul.mubr.msk.f32.gmra.mxu1 %vm920_vm1, %v1164_v6  ;;  %6310 = vmatmul.mubr.msk.f32.gmra.mxu0 %vm920_vm1, %v1132_v8 }
 0x1ec   : > { %6256 = vmatprep.mubr.msk.f32.mxu1 %vm920_vm1, %v1165_v9  ;;  %6312 = vmatprep.mubr.msk.f32.mxu0 %vm920_vm1, %v1133_v10 }
 0x1ef   : > { %6257 = vmatmul.mubr.msk.f32.gmra.mxu1 %vm920_vm1, %v1166_v11  ;;  %6313 = vmatmul.mubr.msk.f32.gmra.mxu0 %vm920_vm1, %v1134_v12 }
 0x1f0   : > { %6259 = vmatprep.mubr.msk.f32.mxu1 %vm920_vm1, %v1167_v13  ;;  %6315 = vmatprep.mubr.msk.f32.mxu0 %vm920_vm1, %v1135_v14 }
 0x1f3   : > { %6260 = vmatmul.mubr.msk.f32.gmra.mxu1 %vm920_vm1, %v1168_v19  ;;  %6316 = vmatmul.mubr.msk.f32.gmra.mxu0 %vm920_vm1, %v1136_v20 }
 0x1f4   : > { %6262 = vmatprep.mubr.msk.f32.mxu1 %vm920_vm1, %v1169_v23  ;;  %6318 = vmatprep.mubr.msk.f32.mxu0 %vm920_vm1, %v1137_v24 }
 0x1f7   : > { %6263 = vmatmul.mubr.msk.f32.gmra.mxu1 %vm920_vm1, %v1170_v25  ;;  %6319 = vmatmul.mubr.msk.f32.gmra.mxu0 %vm920_vm1, %v1138_v26 }
 0x1f8   : > { %6329 = vmatprep.mubr.msk.f32.mxu1 %vm920_vm1, %v7035_v16  ;;  %v7412_v16 = vld [vmem:[%s8193_s6] ss:$0 sm:$0xff]  ;;  %s6806_s6 = smov 32  }
 0x1fb   : > { %6330 = vmatmul.mubr.msk.f32.vlgmr.msra.gmra.mxu1 %vm920_vm1, %v7033_v15 }
 0x1fc   : > { %6346 = vmatpush3.msra.mxu1 %v7047_v18  ;;  %6332 = vmatprep.mubr.msk.f32.mxu1 %vm920_vm1, %v7047_v18 }
 0x1ff   : > { %6333 = vmatmul.mubr.msk.f32.gmra.mxu1 %vm920_vm1, %v7041_v17 }
 0x27b   : > { %v6219_v27 = vpop.f32.mrf.mxu1  ;;  %v6275_v28 = vpop.f32.mrf.mxu0 }
 0x27c   : > { %v1660_v29 = vadd.f32 %v6275_v28, %v6219_v27 }
 0x27d   : > { %v1333_v30 = vpop.f32.mrf.mxu1  ;;  %v1654_v31 = vpop.f32.mrf.mxu0 }
 0x27e   : > { %vm1814_vm2 = vcmp.ge.f32.partialorder %v1660_v29, 0.0  ;;  %v1846_v33 = vmul.f32 0.01, %v1660_v29  ;;  %v1655_v34 = vadd.f32 %v1654_v31, %v1333_v30 }
 0x27f   : > { %v6222_v35 = vpop.f32.mrf.mxu1  ;;  %v6278_v32 = vpop.f32.mrf.mxu0 }
 0x280   : > { %vm1813_vm4 = vcmp.ge.f32.partialorder %v1655_v34, 0.0  ;;  %v1845_v18 = vmul.f32 0.01, %v1655_v34  ;;  %v1670_v36 = vadd.f32 %v6278_v32, %v6222_v35  ;;  %v1878_v37 = vsel %vm1814_vm2, %v1660_v29, %v1846_v33 }
 0x281   : > { %v1343_v38 = vpop.f32.mrf.mxu1  ;;  %v1664_v40 = vpop.f32.mrf.mxu0  ;;  %v1917_v41 = vmul.f32 %v7412_v16, %v1878_v37  ;;  %v6802_v35 = vmov 0  }
 0x282   : > { %vm1816_vm5 = vcmp.ge.f32.partialorder %v1670_v36, 0.0  ;;  %v1848_v43 = vmul.f32 0.01, %v1670_v36  ;;  %v1665_v39 = vadd.f32 %v1664_v40, %v1343_v38  ;;  %v1877_v44 = vsel %vm1813_vm4, %v1655_v34, %v1845_v18  ;;  %6650 = vset.pattern.permute.xlu0 %v6802_v35  ;;  %6649 = vset.pattern.permute.xlu1 %v6802_v35 }
 0x283   : > { %v6225_v45 = vpop.f32.mrf.mxu1  ;;  %v6281_v46 = vpop.f32.mrf.mxu0  ;;  %v1952_v48 = vsel %vm1948_vm3, %v1917_v41, 0.0  ;;  %v1916_v49 = vmul.f32 %v7412_v16, %v1877_v44 }
 0x284   : > { %vm1815_vm6 = vcmp.ge.f32.partialorder %v1665_v39, 0.0  ;;  %v1847_v42 = vmul.f32 0.01, %v1665_v39  ;;  %v1680_v47 = vadd.f32 %v6281_v46, %v6225_v45  ;;  %1953 = vadd.xlane.f32.xlu0 %v1952_v48  ;;  %v1880_v50 = vsel %vm1816_vm5, %v1670_v36, %v1848_v43 }
 0x285   : > { %v1353_v51 = vpop.f32.mrf.mxu1  ;;  %v1674_v52 = vpop.f32.mrf.mxu0  ;;  %v1919_v53 = vmul.f32 %v7412_v16, %v1880_v50  ;;  %v1949_v59 = vsel %vm1948_vm3, %v1916_v49, 0.0 }
 0x286   : > { %vm1818_vm7 = vcmp.ge.f32.partialorder %v1680_v47, 0.0  ;;  %v1850_v54 = vmul.f32 0.01, %v1680_v47  ;;  %v1675_v55 = vadd.f32 %v1674_v52, %v1353_v51  ;;  %v1879_v56 = vsel %vm1815_vm6, %v1665_v39, %v1847_v42 }
 0x287   : > { %v6228_v57 = vpop.f32.mrf.mxu1  ;;  %v6284_v58 = vpop.f32.mrf.mxu0  ;;  %v1958_v60 = vsel %vm1948_vm3, %v1919_v53, 0.0  ;;  %v1918_v61 = vmul.f32 %v7412_v16, %v1879_v56 }
 0x288   : > { %vm1817_vm8 = vcmp.ge.f32.partialorder %v1675_v55, 0.0  ;;  %v1849_v62 = vmul.f32 0.01, %v1675_v55  ;;  %v1690_v63 = vadd.f32 %v6284_v58, %v6228_v57  ;;  %1950 = vadd.xlane.f32.xlu0 %v1949_v59  ;;  %1959 = vadd.xlane.f32.xlu1 %v1958_v60  ;;  %v1882_v0 = vsel %vm1818_vm7, %v1680_v47, %v1850_v54 }
 0x289   : > { %v1363_v1 = vpop.f32.mrf.mxu1  ;;  %v1684_v2 = vpop.f32.mrf.mxu0  ;;  %v1955_v9 = vsel %vm1948_vm3, %v1918_v61, 0.0  ;;  %v1921_v11 = vmul.f32 %v7412_v16, %v1882_v0 }
 0x28a   : > { %vm1820_vm9 = vcmp.ge.f32.partialorder %v1690_v63, 0.0  ;;  %v1852_v3 = vmul.f32 0.01, %v1690_v63  ;;  %v1685_v4 = vadd.f32 %v1684_v2, %v1363_v1  ;;  %v1881_v5 = vsel %vm1817_vm8, %v1675_v55, %v1849_v62 }
 0x28b   : > { %v6231_v6 = vpop.f32.mrf.mxu1  ;;  %v6287_v8 = vpop.f32.mrf.mxu0  ;;  %v1920_v10 = vmul.f32 %v7412_v16, %v1881_v5  ;;  %v1964_v30 = vsel %vm1948_vm3, %v1921_v11, 0.0 }
 0x28c   : > { %vm1819_vm10 = vcmp.ge.f32.partialorder %v1685_v4, 0.0  ;;  %v1851_v12 = vmul.f32 0.01, %v1685_v4  ;;  %v1700_v13 = vadd.f32 %v6287_v8, %v6231_v6  ;;  %1956 = vadd.xlane.f32.xlu1 %v1955_v9  ;;  %v1884_v14 = vsel %vm1820_vm9, %v1690_v63, %v1852_v3 }
 0x28d   : > { %v1373_v19 = vpop.f32.mrf.mxu1  ;;  %v1694_v20 = vpop.f32.mrf.mxu0  ;;  %v1961_v23 = vsel %vm1948_vm3, %v1920_v10, 0.0  ;;  %v1923_v24 = vmul.f32 %v7412_v16, %v1884_v14 }
 0x28e   : > { %vm1822_vm11 = vcmp.ge.f32.partialorder %v1700_v13, 0.0  ;;  %v1854_v25 = vmul.f32 0.01, %v1700_v13  ;;  %v1695_v26 = vadd.f32 %v1694_v20, %v1373_v19  ;;  %1962 = vadd.xlane.f32.xlu0 %v1961_v23  ;;  %v1883_v27 = vsel %vm1819_vm10, %v1685_v4, %v1851_v12 }
 0x28f   : > { %v6234_v28 = vpop.f32.mrf.mxu1  ;;  %v6290_v29 = vpop.f32.mrf.mxu0  ;;  %v1970_v36 = vsel %vm1948_vm3, %v1923_v24, 0.0  ;;  %v1922_v38 = vmul.f32 %v7412_v16, %v1883_v27 }
 0x290   : > { %vm1821_vm12 = vcmp.ge.f32.partialorder %v1695_v26, 0.0  ;;  %v1853_v31 = vmul.f32 0.01, %v1695_v26  ;;  %v1710_v33 = vadd.f32 %v6290_v29, %v6234_v28  ;;  %1965 = vadd.xlane.f32.xlu1 %v1964_v30  ;;  %v1886_v34 = vsel %vm1822_vm11, %v1700_v13, %v1854_v25 }
 0x291   : > { %v1383_v32 = vpop.f32.mrf.mxu1  ;;  %v1704_v18 = vpop.f32.mrf.mxu0  ;;  %v1925_v37 = vmul.f32 %v7412_v16, %v1886_v34  ;;  %v1967_v50 = vsel %vm1948_vm3, %v1922_v38, 0.0 }
 0x292   : > { %vm1824_vm13 = vcmp.ge.f32.partialorder %v1710_v33, 0.0  ;;  %v1856_v40 = vmul.f32 0.01, %v1710_v33  ;;  %v1705_v41 = vadd.f32 %v1704_v18, %v1383_v32  ;;  %1971 = vadd.xlane.f32.xlu0 %v1970_v36  ;;  %v1885_v43 = vsel %vm1821_vm12, %v1695_v26, %v1853_v31 }
 0x293   : > { %v6237_v39 = vpop.f32.mrf.mxu1  ;;  %v6293_v44 = vpop.f32.mrf.mxu0  ;;  %v1976_v45 = vsel %vm1948_vm3, %v1925_v37, 0.0  ;;  %v1924_v52 = vmul.f32 %v7412_v16, %v1885_v43 }
 0x294   : > { %vm1823_vm14 = vcmp.ge.f32.partialorder %v1705_v41, 0.0  ;;  %v1855_v46 = vmul.f32 0.01, %v1705_v41  ;;  %v1720_v48 = vadd.f32 %v6293_v44, %v6237_v39  ;;  %1977 = vadd.xlane.f32.xlu1 %v1976_v45  ;;  %v1888_v49 = vsel %vm1824_vm13, %v1710_v33, %v1856_v40 }
 0x295   : > { %v1393_v42 = vpop.f32.mrf.mxu1  ;;  %v1714_v47 = vpop.f32.mrf.mxu0  ;;  %v1927_v51 = vmul.f32 %v7412_v16, %v1888_v49  ;;  %v1973_v1 = vsel %vm1948_vm3, %v1924_v52, 0.0 }
 0x296   : > { %vm1826_vm15 = vcmp.ge.f32.partialorder %v1720_v48, 0.0  ;;  %v1858_v53 = vmul.f32 0.01, %v1720_v48  ;;  %v1715_v54 = vadd.f32 %v1714_v47, %v1393_v42  ;;  %1968 = vadd.xlane.f32.xlu0 %v1967_v50  ;;  %v1887_v55 = vsel %vm1823_vm14, %v1705_v41, %v1855_v46 }
 0x297   : > { %v6240_v56 = vpop.f32.mrf.mxu1  ;;  %v6296_v57 = vpop.f32.mrf.mxu0  ;;  %v1982_v58 = vsel %vm1948_vm3, %v1927_v51, 0.0  ;;  %v1926_v59 = vmul.f32 %v7412_v16, %v1887_v55 }
 0x298   : > { %vm1825_vm2 = vcmp.ge.f32.partialorder %v1715_v54, 0.0  ;;  %v1857_v60 = vmul.f32 0.01, %v1715_v54  ;;  %v1730_v61 = vadd.f32 %v6296_v57, %v6240_v56  ;;  %1983 = vadd.xlane.f32.xlu1 %v1982_v58  ;;  %v1890_v62 = vsel %vm1826_vm15, %v1720_v48, %v1858_v53 }
 0x299   : > { %v1403_v63 = vpop.f32.mrf.mxu1  ;;  %v1724_v0 = vpop.f32.mrf.mxu0  ;;  %v1979_v8 = vsel %vm1948_vm3, %v1926_v59, 0.0  ;;  %v1929_v10 = vmul.f32 %v7412_v16, %v1890_v62 }
 0x29a   : > { %vm1828_vm4 = vcmp.ge.f32.partialorder %v1730_v61, 0.0  ;;  %v1860_v2 = vmul.f32 0.01, %v1730_v61  ;;  %v1725_v3 = vadd.f32 %v1724_v0, %v1403_v63  ;;  %1974 = vadd.xlane.f32.xlu0 %v1973_v1  ;;  %v1889_v4 = vsel %vm1825_vm2, %v1715_v54, %v1857_v60 }
 0x29b   : > { %v6243_v5 = vpop.f32.mrf.mxu1  ;;  %v6299_v6 = vpop.f32.mrf.mxu0  ;;  %v1928_v9 = vmul.f32 %v7412_v16, %v1889_v4  ;;  %v1988_v28 = vsel %vm1948_vm3, %v1929_v10, 0.0 }
 0x29c   : > { %vm1827_vm5 = vcmp.ge.f32.partialorder %v1725_v3, 0.0  ;;  %v1859_v11 = vmul.f32 0.01, %v1725_v3  ;;  %v1740_v12 = vadd.f32 %v6299_v6, %v6243_v5  ;;  %1980 = vadd.xlane.f32.xlu1 %v1979_v8  ;;  %v1892_v13 = vsel %vm1828_vm4, %v1730_v61, %v1860_v2 }
 0x29d   : > { %v1413_v14 = vpop.f32.mrf.mxu1  ;;  %v1734_v19 = vpop.f32.mrf.mxu0  ;;  %v1985_v20 = vsel %vm1948_vm3, %v1928_v9, 0.0  ;;  %v1931_v30 = vmul.f32 %v7412_v16, %v1892_v13 }
 0x29e   : > { %vm1830_vm6 = vcmp.ge.f32.partialorder %v1740_v12, 0.0  ;;  %v1862_v23 = vmul.f32 0.01, %v1740_v12  ;;  %v1735_v24 = vadd.f32 %v1734_v19, %v1413_v14  ;;  %1986 = vadd.xlane.f32.xlu0 %v1985_v20  ;;  %v1891_v25 = vsel %vm1827_vm5, %v1725_v3, %v1859_v11  ;;  %v7459_v20 = vpop.permute.xlu0 %2058 }
 0x29f   : > { %v6246_v26 = vpop.f32.mrf.mxu1  ;;  %v6302_v27 = vpop.f32.mrf.mxu0  ;;  %v1930_v29 = vmul.f32 %v7412_v16, %v1891_v25  ;;  %v1994_v43 = vsel %vm1948_vm3, %v1931_v30, 0.0 }
 0x2a0   : > { %vm1829_vm7 = vcmp.ge.f32.partialorder %v1735_v24, 0.0  ;;  %v1861_v31 = vmul.f32 0.01, %v1735_v24  ;;  %v1750_v33 = vadd.f32 %v6302_v27, %v6246_v26  ;;  %1989 = vadd.xlane.f32.xlu1 %v1988_v28  ;;  %v1894_v34 = vsel %vm1830_vm6, %v1740_v12, %v1862_v23 }
 0x2a1   : > { %v1423_v35 = vpop.f32.mrf.mxu1  ;;  %v1744_v32 = vpop.f32.mrf.mxu0  ;;  %v1991_v18 = vsel %vm1948_vm3, %v1930_v29, 0.0  ;;  %v1933_v44 = vmul.f32 %v7412_v16, %v1894_v34 }
 0x2a2   : > { %vm1832_vm8 = vcmp.ge.f32.partialorder %v1750_v33, 0.0  ;;  %v1864_v36 = vmul.f32 0.01, %v1750_v33  ;;  %v1745_v37 = vadd.f32 %v1744_v32, %v1423_v35  ;;  %1992 = vadd.xlane.f32.xlu0 %v1991_v18  ;;  %v1893_v38 = vsel %vm1829_vm7, %v1735_v24, %v1861_v31  ;;  %v7464_v18 = vpop.permute.xlu1 %2065 }
 0x2a3   : > { %v6249_v40 = vpop.f32.mrf.mxu1  ;;  %v6305_v41 = vpop.f32.mrf.mxu0  ;;  %v1932_v39 = vmul.f32 %v7412_v16, %v1893_v38  ;;  %v2000_v56 = vsel %vm1948_vm3, %v1933_v44, 0.0 }
 0x2a4   : > { %vm1831_vm9 = vcmp.ge.f32.partialorder %v1745_v37, 0.0  ;;  %v1863_v45 = vmul.f32 0.01, %v1745_v37  ;;  %v1760_v46 = vadd.f32 %v6305_v41, %v6249_v40  ;;  %1995 = vadd.xlane.f32.xlu1 %v1994_v43  ;;  %v1896_v48 = vsel %vm1832_vm8, %v1750_v33, %v1864_v36 }
 0x2a5   : > { %v1433_v49 = vpop.f32.mrf.mxu1  ;;  %v1754_v42 = vpop.f32.mrf.mxu0  ;;  %v1997_v47 = vsel %vm1948_vm3, %v1932_v39, 0.0  ;;  %v1935_v50 = vmul.f32 %v7412_v16, %v1896_v48 }
 0x2a6   : > { %vm1834_vm10 = vcmp.ge.f32.partialorder %v1760_v46, 0.0  ;;  %v1866_v51 = vmul.f32 0.01, %v1760_v46  ;;  %v1755_v52 = vadd.f32 %v1754_v42, %v1433_v49  ;;  %1998 = vadd.xlane.f32.xlu0 %v1997_v47  ;;  %v1895_v53 = vsel %vm1831_vm9, %v1745_v37, %v1863_v45  ;;  %v7469_v45 = vpop.permute.xlu0 %2072 }
 0x2a7   : > { %v6252_v54 = vpop.f32.mrf.mxu1  ;;  %v6308_v55 = vpop.f32.mrf.mxu0  ;;  %v1934_v57 = vmul.f32 %v7412_v16, %v1895_v53  ;;  %v2006_v63 = vsel %vm1948_vm3, %v1935_v50, 0.0  ;;  %vm2607_vm9 = vcmask 1041409  }
 0x2a8   : > { %vm1833_vm11 = vcmp.ge.f32.partialorder %v1755_v52, 0.0  ;;  %v1865_v58 = vmul.f32 0.01, %v1755_v52  ;;  %v1770_v59 = vadd.f32 %v6308_v55, %v6252_v54  ;;  %2001 = vadd.xlane.f32.xlu1 %v2000_v56  ;;  %v1898_v60 = vsel %vm1834_vm10, %v1760_v46, %v1866_v51 }
 0x2a9   : > { %v1443_v61 = vpop.f32.mrf.mxu1  ;;  %v1764_v62 = vpop.f32.mrf.mxu0  ;;  %v1937_v0 = vmul.f32 %v7412_v16, %v1898_v60  ;;  %v2003_v6 = vsel %vm1948_vm3, %v1934_v57, 0.0  ;;  %vm2609_vm10 = vcmask 1042434  }
 0x2aa   : > { %vm1836_vm12 = vcmp.ge.f32.partialorder %v1770_v59, 0.0  ;;  %v1868_v1 = vmul.f32 0.01, %v1770_v59  ;;  %v1765_v2 = vadd.f32 %v1764_v62, %v1443_v61  ;;  %2007 = vadd.xlane.f32.xlu0 %v2006_v63  ;;  %v1897_v3 = vsel %vm1833_vm11, %v1755_v52, %v1865_v58 }
 0x2ab   : > { %v6255_v4 = vpop.f32.mrf.mxu1  ;;  %v6311_v5 = vpop.f32.mrf.mxu0  ;;  %v2012_v13 = vsel %vm1948_vm3, %v1937_v0, 0.0  ;;  %v1936_v19 = vmul.f32 %v7412_v16, %v1897_v3  ;;  %vm2611_vm11 = vcmask 1043459  }
 0x2ac   : > { %vm1835_vm13 = vcmp.ge.f32.partialorder %v1765_v2, 0.0  ;;  %v1867_v8 = vmul.f32 0.01, %v1765_v2  ;;  %v1780_v9 = vadd.f32 %v6311_v5, %v6255_v4  ;;  %2004 = vadd.xlane.f32.xlu1 %v2003_v6  ;;  %v1900_v10 = vsel %vm1836_vm12, %v1770_v59, %v1868_v1  ;;  %v7475_v59 = vpop.permute.xlu1 %2079  ;;  %v7478_v3 = vpop.permute.xlu0 %2086 }
 0x2ad   : > { %v1453_v11 = vpop.f32.mrf.mxu1  ;;  %v1774_v12 = vpop.f32.mrf.mxu0  ;;  %v1939_v14 = vmul.f32 %v7412_v16, %v1900_v10  ;;  %v2009_v32 = vsel %vm1948_vm3, %v1936_v19, 0.0  ;;  %vm2613_vm12 = vcmask 1044484  }
 0x2ae   : > { %vm1838_vm14 = vcmp.ge.f32.partialorder %v1780_v9, 0.0  ;;  %v1870_v23 = vmul.f32 0.01, %v1780_v9  ;;  %v1775_v24 = vadd.f32 %v1774_v12, %v1453_v11  ;;  %2013 = vadd.xlane.f32.xlu0 %v2012_v13  ;;  %v1899_v25 = vsel %vm1835_vm13, %v1765_v2, %v1867_v8 }
 0x2af   : > { %v6258_v26 = vpop.f32.mrf.mxu1  ;;  %v6314_v27 = vpop.f32.mrf.mxu0  ;;  %v2018_v28 = vsel %vm1948_vm3, %v1939_v14, 0.0  ;;  %v1938_v29 = vmul.f32 %v7412_v16, %v1899_v25  ;;  %vm2615_vm13 = vcmask 1045509  }
 0x2b0   : > { %vm1837_vm15 = vcmp.ge.f32.partialorder %v1775_v24, 0.0  ;;  %v1869_v30 = vmul.f32 0.01, %v1775_v24  ;;  %v1790_v31 = vadd.f32 %v6314_v27, %v6258_v26  ;;  %2019 = vadd.xlane.f32.xlu1 %v2018_v28  ;;  %v1902_v33 = vsel %vm1838_vm14, %v1780_v9, %v1870_v23  ;;  %v2094_v11 = vpop.permute.xlu1 %2093  ;;  %v7485_v23 = vpop.permute.xlu0 %2114 }
 0x2b1   : > { %v1463_v34 = vpop.f32.mrf.mxu1  ;;  %v1784_v35 = vpop.f32.mrf.mxu0  ;;  %v2015_v43 = vsel %vm1948_vm3, %v1938_v29, 0.0  ;;  %v1941_v44 = vmul.f32 %v7412_v16, %v1902_v33  ;;  %vm2617_vm14 = vcmask 1046534  }
 0x2b2   : > { %vm1840_vm2 = vcmp.ge.f32.partialorder %v1790_v31, 0.0  ;;  %v1872_v36 = vmul.f32 0.01, %v1790_v31  ;;  %v1785_v37 = vadd.f32 %v1784_v35, %v1463_v34  ;;  %2010 = vadd.xlane.f32.xlu0 %v2009_v32  ;;  %v1901_v38 = vsel %vm1837_vm15, %v1775_v24, %v1869_v30 }
 0x2b3   : > { %v6261_v40 = vpop.f32.mrf.mxu1  ;;  %v6317_v41 = vpop.f32.mrf.mxu0  ;;  %v1940_v39 = vmul.f32 %v7412_v16, %v1901_v38  ;;  %v2024_v56 = vsel %vm1948_vm3, %v1941_v44, 0.0  ;;  %vm2619_vm15 = vcmask 1047559  }
 0x2b4   : > { %vm1839_vm4 = vcmp.ge.f32.partialorder %v1785_v37, 0.0  ;;  %v1871_v46 = vmul.f32 0.01, %v1785_v37  ;;  %v1800_v48 = vadd.f32 %v6317_v41, %v6261_v40  ;;  %2016 = vadd.xlane.f32.xlu1 %v2015_v43  ;;  %v1904_v49 = vsel %vm1840_vm2, %v1790_v31, %v1872_v36  ;;  %v2122_v27 = vpop.permute.xlu1 %2121  ;;  %v2101_v28 = vpop.permute.xlu0 %2100 }
 0x2b5   : > { %v1473_v42 = vpop.f32.mrf.mxu1  ;;  %v1794_v47 = vpop.f32.mrf.mxu0  ;;  %v2021_v50 = vsel %vm1948_vm3, %v1940_v39, 0.0  ;;  %v1943_v58 = vmul.f32 %v7412_v16, %v1904_v49 }
 0x2b6   : > { %vm1842_vm5 = vcmp.ge.f32.partialorder %v1800_v48, 0.0  ;;  %v1874_v51 = vmul.f32 0.01, %v1800_v48  ;;  %v1795_v52 = vadd.f32 %v1794_v47, %v1473_v42  ;;  %2022 = vadd.xlane.f32.xlu0 %v2021_v50  ;;  %v1903_v53 = vsel %vm1839_vm4, %v1785_v37, %v1871_v46 }
 0x2b7   : > { %v6264_v54 = vpop.f32.mrf.mxu1  ;;  %v6320_v55 = vpop.f32.mrf.mxu0  ;;  %v1942_v57 = vmul.f32 %v7412_v16, %v1903_v53  ;;  %v2030_v4 = vsel %vm1948_vm3, %v1943_v58, 0.0 }
 0x2b8   : > { %v1873_v60 = vmul.f32 0.01, %v1795_v52  ;;  %v1810_v61 = vadd.f32 %v6320_v55, %v6264_v54  ;;  %2025 = vadd.xlane.f32.xlu1 %v2024_v56  ;;  %v1906_v62 = vsel %vm1842_vm5, %v1800_v48, %v1874_v51  ;;  %vm1841_vm6 = vcmp.ge.f32.partialorder %v1795_v52, 0.0  ;;  %v2129_v30 = vpop.permute.xlu1 %2128  ;;  %v2108_v31 = vpop.permute.xlu0 %2107 }
 0x2b9   : > { %v1483_v63 = vpop.f32.mrf.mxu1  ;;  %v1804_v0 = vpop.f32.mrf.mxu0  ;;  %v2027_v1 = vsel %vm1948_vm3, %v1942_v57, 0.0  ;;  %v1945_v5 = vmul.f32 %v7412_v16, %v1906_v62 }
 0x2ba   : > { %v1805_v2 = vadd.f32 %v1804_v0, %v1483_v63  ;;  %2028 = vadd.xlane.f32.xlu0 %v2027_v1  ;;  %v1876_v6 = vmul.f32 0.01, %v1810_v61  ;;  %v1905_v9 = vsel %vm1841_vm6, %v1795_v52, %v1873_v60  ;;  %vm1844_vm8 = vcmp.ge.f32.partialorder %v1810_v61, 0.0 }
 0x2bb   : > { %v2036_v12 = vsel %vm1948_vm3, %v1945_v5, 0.0  ;;  %v1944_v14 = vmul.f32 %v7412_v16, %v1905_v9 }
 0x2bc   : > { %vm1843_vm7 = vcmp.ge.f32.partialorder %v1805_v2, 0.0  ;;  %v1875_v8 = vmul.f32 0.01, %v1805_v2  ;;  %2031 = vadd.xlane.f32.xlu1 %v2030_v4  ;;  %v1908_v19 = vsel %vm1844_vm8, %v1810_v61, %v1876_v6  ;;  %v2136_v33 = vpop.permute.xlu1 %2135  ;;  %v2143_v34 = vpop.permute.xlu0 %2142 }
 0x2bd   : > { %v2033_v25 = vsel %vm1948_vm3, %v1944_v14, 0.0  ;;  %v1947_v26 = vmul.f32 %v7412_v16, %v1908_v19 }
 0x2be   : > { %v1907_v10 = vsel %vm1843_vm7, %v1805_v2, %v1875_v8  ;;  %vm6803_vm7 = vmmov 0  }
 0x2bf   : > { %v1946_v13 = vmul.f32 %v7412_v16, %v1907_v10  ;;  %v2042_v29 = vsel %vm1948_vm3, %v1947_v26, 0.0  ;;  %6337 = vmatprep.mubr.msk.f32.mxu0 %vm6803_vm7, %v6801_v7  ;;  %6347 = vmatprep.mubr.msk.f32.mxu1 %vm6803_vm7, %v6801_v7 }
 0x2c0   : > { %2037 = vadd.xlane.f32.xlu1 %v2036_v12  ;;  %v2150_v35 = vpop.permute.xlu1 %2149  ;;  %v7491_v32 = vpop.permute.xlu0 %2170 }
 0x2c1   : > { %v2039_v24 = vsel %vm1948_vm3, %v1946_v13, 0.0 }
 0x2c2   : > { %2040 = vadd.xlane.f32.xlu0 %v2039_v24 }
 0x2c4   : > { %2034 = vadd.xlane.f32.xlu1 %v2033_v25  ;;  %v7493_v36 = vpop.permute.xlu1 %2177  ;;  %v7495_v37 = vpop.permute.xlu0 %2226 }
 0x2c8   : > { %2043 = vadd.xlane.f32.xlu1 %v2042_v29  ;;  %v7497_v38 = vpop.permute.xlu1 %2233  ;;  %v2157_v16 = vpop.permute.xlu0 %2156 }
 0x2cc   : > { %v7499_v40 = vpop.permute.xlu1 %2184  ;;  %v7501_v41 = vpop.permute.xlu0 %2240 }
 0x2d0   : > { %v2164_v43 = vpop.permute.xlu1 %2163  ;;  %v7503_v39 = vpop.permute.xlu0 %2191 }
 0x2d4   : > { %v7505_v44 = vpop.permute.xlu1 %2247  ;;  %v7507_v46 = vpop.permute.xlu0 %2198 }
 0x2d8   : > { %v7509_v48 = vpop.permute.xlu1 %2254  ;;  %v7511_v49 = vpop.permute.xlu0 %2205 }
 0x2dc   : > { %v7513_v42 = vpop.permute.xlu1 %2261  ;;  %v7515_v47 = vpop.permute.xlu0 %2212 }
 0x2e0   : > { %v7517_v50 = vpop.permute.xlu1 %2268  ;;  %v7519_v51 = vpop.permute.xlu0 %2219 }
 0x2e4   : > { %v7521_v52 = vpop.permute.xlu1 %2275 }
 0x30d   : > { %v1954_v53 = vpop.xlane.xlu0 %1953 }
 0x30e   : > { %v2310_v54 = vadd.f32 %v7464_v18, %v1954_v53 }
 0x310   : > { %2385 = vperm.xlu1 %6649, %v2310_v54  }
 0x311   : > { %v1951_v55 = vpop.xlane.xlu0 %1950  ;;  %v1960_v56 = vpop.xlane.xlu1 %1959 }
 0x312   : > { %v2309_v57 = vadd.f32 %v7459_v20, %v1951_v55  ;;  %v2312_v60 = vadd.f32 %v7475_v59, %v1960_v56 }
 0x314   : > { %2382 = vperm.xlu0 %6650, %v2309_v57  }
 0x315   : > { %v1957_v58 = vpop.xlane.xlu1 %1956 }
 0x316   : > { %v2311_v61 = vadd.f32 %v7469_v45, %v1957_v58 }
 0x317   : > { %v1963_v62 = vpop.xlane.xlu0 %1962 }
 0x318   : > { %2388 = vperm.xlu1 %6649, %v2311_v61   ;;  %2391 = vperm.xlu0 %6650, %v2312_v60   ;;  %v2313_v0 = vadd.f32 %v7478_v3, %v1963_v62 }
 0x319   : > { %v1966_v63 = vpop.xlane.xlu1 %1965 }
 0x31a   : > { %v2314_v1 = vadd.f32 %v2094_v11, %v1966_v63 }
 0x31b   : > { %v1972_v2 = vpop.xlane.xlu0 %1971 }
 0x31c   : > { %2394 = vperm.xlu1 %6649, %v2313_v0   ;;  %2397 = vperm.xlu0 %6650, %v2314_v1   ;;  %v2316_v4 = vadd.f32 %v2108_v31, %v1972_v2 }
 0x31d   : > { %v1978_v18 = vpop.xlane.xlu1 %1977 }
 0x31e   : > { %v2318_v5 = vadd.f32 %v2122_v27, %v1978_v18 }
 0x31f   : > { %v1969_v20 = vpop.xlane.xlu0 %1968 }
 0x320   : > { %2403 = vperm.xlu1 %6649, %v2316_v4   ;;  %2409 = vperm.xlu0 %6650, %v2318_v5   ;;  %v2315_v59 = vadd.f32 %v2101_v28, %v1969_v20 }
 0x321   : > { %v1984_v6 = vpop.xlane.xlu1 %1983 }
 0x322   : > { %v2320_v8 = vadd.f32 %v2136_v33, %v1984_v6 }
 0x323   : > { %v1975_v45 = vpop.xlane.xlu0 %1974 }
 0x324   : > { %2400 = vperm.xlu1 %6649, %v2315_v59   ;;  %2415 = vperm.xlu0 %6650, %v2320_v8   ;;  %v2317_v10 = vadd.f32 %v7485_v23, %v1975_v45 }
 0x325   : > { %v1981_v9 = vpop.xlane.xlu1 %1980 }
 0x326   : > { %v2319_v3 = vadd.f32 %v2129_v30, %v1981_v9 }
 0x327   : > { %v1987_v11 = vpop.xlane.xlu0 %1986 }
 0x328   : > { %2406 = vperm.xlu1 %6649, %v2317_v10   ;;  %2412 = vperm.xlu0 %6650, %v2319_v3   ;;  %v2321_v13 = vadd.f32 %v2143_v34, %v1987_v11  ;;  %v2341_v11 = vld [vmem:[%s7560_s5] sm:$0xff] }
 0x329   : > { %v1990_v12 = vpop.xlane.xlu1 %1989  ;;  %vm2345_vm2 = vcmp.gt.f32.partialorder %v2341_v11, 0.0 }
 0x32a   : > { %v2322_v14 = vadd.f32 %v2150_v35, %v1990_v12 }
 0x32b   : > { %v1993_v19 = vpop.xlane.xlu0 %1992 }
 0x32c   : > { %2418 = vperm.xlu1 %6649, %v2321_v13   ;;  %2421 = vperm.xlu0 %6650, %v2322_v14   ;;  %v2323_v25 = vadd.f32 %v2157_v16, %v1993_v19 }
 0x32d   : > { %v1996_v24 = vpop.xlane.xlu1 %1995 }
 0x32e   : > { %v2324_v26 = vadd.f32 %v2164_v43, %v1996_v24 }
 0x32f   : > { %v1999_v27 = vpop.xlane.xlu0 %1998 }
 0x330   : > { %2424 = vperm.xlu1 %6649, %v2323_v25   ;;  %2427 = vperm.xlu0 %6650, %v2324_v26   ;;  %v2325_v29 = vadd.f32 %v7491_v32, %v1999_v27 }
 0x331   : > { %v2002_v28 = vpop.xlane.xlu1 %2001 }
 0x332   : > { %v2326_v23 = vadd.f32 %v7493_v36, %v2002_v28 }
 0x333   : > { %v2008_v30 = vpop.xlane.xlu0 %2007 }
 0x334   : > { %2430 = vperm.xlu1 %6649, %v2325_v29   ;;  %2433 = vperm.xlu0 %6650, %v2326_v23   ;;  %v2328_v33 = vadd.f32 %v7503_v39, %v2008_v30 }
 0x335   : > { %v2005_v31 = vpop.xlane.xlu1 %2004 }
 0x336   : > { %v2327_v34 = vadd.f32 %v7499_v40, %v2005_v31 }
 0x337   : > { %v2014_v35 = vpop.xlane.xlu0 %2013 }
 0x338   : > { %2439 = vperm.xlu1 %6649, %v2328_v33   ;;  %2436 = vperm.xlu0 %6650, %v2327_v34   ;;  %v2330_v43 = vadd.f32 %v7511_v49, %v2014_v35 }
 0x339   : > { %v2020_v16 = vpop.xlane.xlu1 %2019 }
 0x33b   : > { %v2011_v53 = vpop.xlane.xlu0 %2010 }
 0x33c   : > { %2445 = vperm.xlu1 %6649, %v2330_v43   ;;  %v2329_v32 = vadd.f32 %v7507_v46, %v2011_v53 }
 0x33d   : > { %v2017_v54 = vpop.xlane.xlu1 %2016 }
 0x33e   : > { %v2331_v46 = vadd.f32 %v7515_v47, %v2017_v54  ;;  %v2478_v47 = vand.u32 127, %v2053_v21 }
 0x33f   : > { %v2023_v36 = vpop.xlane.xlu0 %2022 }
 0x340   : > { %2442 = vperm.xlu1 %6649, %v2329_v32   ;;  %v2333_v56 = vadd.f32 %v7495_v37, %v2023_v36  ;;  %v7547_v2 = vsub.s32 %v2478_v47, %v7072_v22 }
 0x341   : > { %v2026_v55 = vpop.xlane.xlu1 %2025 }
 0x342   : > { %v2334_v39 = vadd.f32 %v7497_v38, %v2026_v55  ;;  %v2332_v38 = vadd.f32 %v7519_v51, %v2020_v16 }
 0x343   : > { %v2029_v57 = vpop.xlane.xlu0 %2028 }
 0x344   : > { %2454 = vperm.xlu1 %6649, %v2333_v56   ;;  %2457 = vperm.xlu0 %6650, %v2334_v39   ;;  %v2335_v58 = vadd.f32 %v7501_v41, %v2029_v57  ;;  %v2342_v56 = vld [vmem:[%s7560_s5 + $0x8] sm:$0xff] }
 0x345   : > { %v2032_v40 = vpop.xlane.xlu1 %2031  ;;  %vm2346_vm4 = vcmp.gt.f32.partialorder %v2342_v56, 0.0 }
 0x346   : > { %v2336_v49 = vadd.f32 %v7505_v44, %v2032_v40 }
 0x348   : > { %2460 = vperm.xlu1 %6649, %v2335_v58   ;;  %2463 = vperm.xlu0 %6650, %v2336_v49  }
 0x349   : > { %v2038_v60 = vpop.xlane.xlu1 %2037 }
 0x34a   : > { %v2338_v61 = vadd.f32 %v7513_v42, %v2038_v60 }
 0x34b   : > { %v2041_v63 = vpop.xlane.xlu0 %2040 }
 0x34c   : > { %2448 = vperm.xlu1 %6649, %v2331_v46   ;;  %2469 = vperm.xlu0 %6650, %v2338_v61   ;;  %v2339_v41 = vadd.f32 %v7517_v50, %v2041_v63 }
 0x34d   : > { %v2035_v37 = vpop.xlane.xlu1 %2034 }
 0x34e   : > { %v2337_v62 = vadd.f32 %v7509_v48, %v2035_v37 }
 0x350   : > { %2451 = vperm.xlu1 %6649, %v2332_v38   ;;  %2466 = vperm.xlu0 %6650, %v2337_v62   ;;  %v7595_v62 = vpop.f32.mrf.mxu1 }
 0x351   : > { %v2044_v44 = vpop.xlane.xlu1 %2043 }
 0x352   : > { %v2340_v0 = vadd.f32 %v7521_v52, %v2044_v44  ;;  %v2764_v44 = vpop.f32.mrf.mxu1 }
 0x354   : > { %2472 = vperm.xlu0 %6650, %v2339_v41  }
 0x358   : > { %2475 = vperm.xlu0 %6650, %v2340_v0  }
 0x38b   : > { %v2386_v42 = vpop.permute.xlu1 %2385 }
 0x38c   : > { %v2486_v4 = vrot.slane %v2386_v42, %v7547_v2 }
 0x38f   : > { %v2383_v1 = vpop.permute.xlu0 %2382 }
 0x390   : > { %v2482_v48 = vrot.slane %v2383_v1, %v7547_v2 }
 0x392   : > { %v2608_v21 = vsel %vm2607_vm9, %v2486_v4, %v2482_v48 }
 0x393   : > { %v2389_v51 = vpop.permute.xlu1 %2388  ;;  %v2392_v18 = vpop.permute.xlu0 %2391 }
 0x394   : > { %v2490_v50 = vrot.slane %v2389_v51, %v7547_v2  ;;  %v2494_v20 = vrot.slane %v2392_v18, %v7547_v2 }
 0x396   : > { %v2610_v6 = vsel %vm2609_vm10, %v2490_v50, %v2608_v21 }
 0x397   : > { %v2395_v52 = vpop.permute.xlu1 %2394  ;;  %v2398_v5 = vpop.permute.xlu0 %2397  ;;  %v2612_v9 = vsel %vm2611_vm11, %v2494_v20, %v2610_v6 }
 0x398   : > { %v2498_v59 = vrot.slane %v2395_v52, %v7547_v2  ;;  %v2502_v10 = vrot.slane %v2398_v5, %v7547_v2 }
 0x39a   : > { %v2614_v3 = vsel %vm2613_vm12, %v2498_v59, %v2612_v9 }
 0x39b   : > { %v2404_v8 = vpop.permute.xlu1 %2403  ;;  %v2410_v45 = vpop.permute.xlu0 %2409  ;;  %v2616_v19 = vsel %vm2615_vm13, %v2502_v10, %v2614_v3  ;;  %v2343_v3 = vld [vmem:[%s7560_s5 + $0x10] sm:$0xff] }
 0x39c   : > { %v2510_v24 = vrot.slane %v2404_v8, %v7547_v2  ;;  %v2518_v29 = vrot.slane %v2410_v45, %v7547_v2  ;;  %vm2347_vm5 = vcmp.gt.f32.partialorder %v2343_v3, 0.0 }
 0x39f   : > { %v2401_v12 = vpop.permute.xlu1 %2400  ;;  %v2416_v13 = vpop.permute.xlu0 %2415 }
 0x3a0   : > { %v2506_v14 = vrot.slane %v2401_v12, %v7547_v2  ;;  %v2526_v34 = vrot.slane %v2416_v13, %v7547_v2 }
 0x3a2   : > { %v2618_v25 = vsel %vm2617_vm14, %v2506_v14, %v2616_v19 }
 0x3a3   : > { %v2407_v26 = vpop.permute.xlu1 %2406  ;;  %v2413_v27 = vpop.permute.xlu0 %2412  ;;  %v2620_v28 = vsel %vm2619_vm15, %v2510_v24, %v2618_v25 }
 0x3a4   : > { %v2514_v23 = vrot.slane %v2407_v26, %v7547_v2  ;;  %v2522_v30 = vrot.slane %v2413_v27, %v7547_v2  ;;  %v7574_v31 = vsel %vm2345_vm2, %v2620_v28, -9e+15 }
 0x3a5   : > { %v2650_v33 = vsel %vm1948_vm3, %v7574_v31, -inf }
 0x3a6   : > { %v2621_v35 = vsel %vm2607_vm9, %v2518_v29, %v2514_v23  ;;  %2651 = vmax.xlane.f32.xlu1 %v2650_v33 }
 0x3a7   : > { %v2622_v16 = vsel %vm2609_vm10, %v2522_v30, %v2621_v35  ;;  %v2419_v43 = vpop.permute.xlu1 %2418  ;;  %v2422_v53 = vpop.permute.xlu0 %2421 }
 0x3a8   : > { %v2530_v54 = vrot.slane %v2419_v43, %v7547_v2  ;;  %v2623_v32 = vsel %vm2611_vm11, %v2526_v34, %v2622_v16  ;;  %v2534_v36 = vrot.slane %v2422_v53, %v7547_v2 }
 0x3aa   : > { %v2624_v55 = vsel %vm2613_vm12, %v2530_v54, %v2623_v32  ;;  %v2344_v32 = vld [vmem:[%s7560_s5 + $0x18] sm:$0xff]  ;;  %s5760_s5 = sshll.u32 %s790_s26, 5 }
 0x3ab   : > { %v2425_v39 = vpop.permute.xlu1 %2424  ;;  %v2428_v57 = vpop.permute.xlu0 %2427  ;;  %v2625_v49 = vsel %vm2615_vm13, %v2534_v36, %v2624_v55  ;;  %vm2348_vm6 = vcmp.gt.f32.partialorder %v2344_v32, 0.0  ;;  %s792_s4 = scalar_lea.vmem [#allocation5], %s5760_s5  ;;  %s6743_s5 = sshll.u32 %s6808_s3, 4  ;;  %s6744_s5 = int_to_ptr.vmem [resolvable:$false] %s6743_s5 }
 0x3ac   : > { %v2538_v40 = vrot.slane %v2425_v39, %v7547_v2  ;;  %v2542_v58 = vrot.slane %v2428_v57, %v7547_v2  ;;  %s5670_s25 = sshll.u32 %s792_s4, 4  ;;  %s8077_s25 = int_to_ptr.vmem [resolvable:$true] %s5670_s25 }
 0x3ad   : > { %p6746_p0 = scmp.lt.s32.totalorder %s8077_s25, %s6744_s5 }
 0x3ae   : > { %v2626_v60 = vsel %vm2617_vm14, %v2538_v40, %v2625_v49 }
 0x3af   : > { %v2431_v46 = vpop.permute.xlu1 %2430  ;;  %v2627_v61 = vsel %vm2619_vm15, %v2542_v58, %v2626_v60  ;;  %v2434_v41 = vpop.permute.xlu0 %2433 }
 0x3b0   : > { %v7591_v37 = vsel %vm2346_vm4, %v2627_v61, -9e+15  ;;  %v2546_v18 = vrot.slane %v2431_v46, %v7547_v2  ;;  %v2550_v48 = vrot.slane %v2434_v41, %v7547_v2 }
 0x3b1   : > { %v2653_v38 = vsel %vm1948_vm3, %v7591_v37, -inf }
 0x3b2   : > { %2654 = vmax.xlane.f32.xlu0 %v2653_v38  ;;  %v2628_v5 = vsel %vm2607_vm9, %v2550_v48, %v2546_v18 }
 0x3b3   : > { %v2440_v63 = vpop.permute.xlu1 %2439  ;;  %v2437_v47 = vpop.permute.xlu0 %2436 }
 0x3b4   : > { %v2554_v50 = vrot.slane %v2437_v47, %v7547_v2  ;;  %v2558_v21 = vrot.slane %v2440_v63, %v7547_v2 }
 0x3b6   : > { %v2629_v20 = vsel %vm2609_vm10, %v2554_v50, %v2628_v5  ;;  %v5848_v5 = vld [vmem:[#allocation4] ss:$0 sm:$0xff] }
 0x3b7   : > { %v2446_v0 = vpop.permute.xlu1 %2445  ;;  %2785 = vperm.xlu1 %6649, %v2764_v44   ;;  %v2630_v45 = vsel %vm2611_vm11, %v2558_v21, %v2629_v20  ;;  %v6334_v21 = vpop.f32.mrf.mxu1 }
 0x3b8   : > { %v2566_v14 = vrot.slane %v2446_v0, %v7547_v2 }
 0x3b9   : > { %v2774_v20 = vpop.f32.mrf.mxu1 }
 0x3bb   : > { %v2443_v42 = vpop.permute.xlu1 %2442 }
 0x3bc   : > { %v2562_v6 = vrot.slane %v2443_v42, %v7547_v2 }
 0x3be   : > { %v2631_v11 = vsel %vm2613_vm12, %v2562_v6, %v2630_v45  ;;  %v3125_v6 = vld [vmem:[%s8131_s11] sm:$0xff] }
 0x3bf   : > { %v2455_v1 = vpop.permute.xlu1 %2454  ;;  %v2458_v51 = vpop.permute.xlu0 %2457  ;;  %v2632_v28 = vsel %vm2615_vm13, %v2566_v14, %v2631_v11  ;;  %6355 = vmatprep.subr.mxu1 %v3125_v6  ;;  %v3230_v11 = vld [vmem:[%s8132_s12] sm:$0xff] }
 0x3c0   : > { %v2578_v9 = vrot.slane %v2455_v1, %v7547_v2  ;;  %v2582_v10 = vrot.slane %v2458_v51, %v7547_v2 }
 0x3c2   : > { %v2635_v25 = vsel %vm2607_vm9, %v2582_v10, %v2578_v9 }
 0x3c3   : > { %v2461_v4 = vpop.permute.xlu1 %2460  ;;  %v2464_v52 = vpop.permute.xlu0 %2463 }
 0x3c4   : > { %v2586_v12 = vrot.slane %v2461_v4, %v7547_v2  ;;  %v2590_v26 = vrot.slane %v2464_v52, %v7547_v2 }
 0x3c6   : > { %v2636_v29 = vsel %vm2609_vm10, %v2586_v12, %v2635_v25 }
 0x3c7   : > { %v2449_v59 = vpop.permute.xlu1 %2448  ;;  %v2470_v8 = vpop.permute.xlu0 %2469  ;;  %v2637_v16 = vsel %vm2611_vm11, %v2590_v26, %v2636_v29 }
 0x3c8   : > { %v2570_v13 = vrot.slane %v2449_v59, %v7547_v2  ;;  %v2598_v36 = vrot.slane %v2470_v8, %v7547_v2 }
 0x3ca   : > { %v2633_v30 = vsel %vm2617_vm14, %v2570_v13, %v2632_v28 }
 0x3cb   : > { %v2452_v19 = vpop.permute.xlu1 %2451  ;;  %v2467_v24 = vpop.permute.xlu0 %2466 }
 0x3cc   : > { %v2574_v27 = vrot.slane %v2452_v19, %v7547_v2  ;;  %v2594_v23 = vrot.slane %v2467_v24, %v7547_v2 }
 0x3ce   : > { %v2634_v33 = vsel %vm2619_vm15, %v2574_v27, %v2633_v30  ;;  %v2638_v53 = vsel %vm2613_vm12, %v2594_v23, %v2637_v16  ;;  %vm3597_vm12 = vcmask 523264  }
 0x3cf   : > { %v2473_v34 = vpop.permute.xlu0 %2472  ;;  %v2648_v35 = vsel %vm2347_vm5, %v2634_v33, -9e+15  ;;  %v2639_v56 = vsel %vm2615_vm13, %v2598_v36, %v2638_v53 }
 0x3d0   : > { %v2656_v43 = vsel %vm1948_vm3, %v2648_v35, -inf  ;;  %v2602_v54 = vrot.slane %v2473_v34, %v7547_v2 }
 0x3d1   : > { %2657 = vmax.xlane.f32.xlu0 %v2656_v43 }
 0x3d2   : > { %v2640_v57 = vsel %vm2617_vm14, %v2602_v54, %v2639_v56 }
 0x3d3   : > { %v2476_v55 = vpop.permute.xlu0 %2475 }
 0x3d4   : > { %v2606_v39 = vrot.slane %v2476_v55, %v7547_v2 }
 0x3d6   : > { %v2641_v40 = vsel %vm2619_vm15, %v2606_v39, %v2640_v57  ;;  %v3331_v57 = vld [vmem:[%s8138_s18] sm:$0xff] }
 0x3d7   : > { %v2649_v58 = vsel %vm2348_vm6, %v2641_v40, -9e+15  ;;  %v3323_v40 = vld [vmem:[%s8137_s17] sm:$0xff] }
 0x3d8   : > { %v2659_v49 = vsel %vm1948_vm3, %v2649_v58, -inf }
 0x3d9   : > { %2660 = vmax.xlane.f32.xlu0 %v2659_v49 }
 0x42f   : > { %v2652_v60 = vpop.xlane.xlu1 %2651 }
 0x430   : > { %v2662_v46 = vsub.f32 %v7574_v31, %v2652_v60 }
 0x432   : > { %v2666_v61 = vmul.f32 1.442695, %v2662_v46 }
 0x433   : > { %v2786_v59 = vpop.permute.xlu1 %2785 }
 0x434   : > { %6651 = vpow2.f32 %v2666_v61 }
 0x43b   : > { %v2655_v38 = vpop.xlane.xlu0 %2654 }
 0x43c   : > { %v2663_v63 = vsub.f32 %v7591_v37, %v2655_v38 }
 0x43e   : > { %v2668_v41 = vmul.f32 1.442695, %v2663_v63 }
 0x440   : > { %6653 = vpow2.f32 %v2668_v41 }
 0x441   : > { %v6652_v2 = vpop.eup %6651 }
 0x442   : > { %v2674_v44 = vsel %vm1948_vm3, %v6652_v2, 0.0 }
 0x443   : > { %2675 = vadd.xlane.f32.xlu1 %v2674_v44 }
 0x44d   : > { %v6654_v0 = vpop.eup %6653 }
 0x44e   : > { %v2677_v47 = vsel %vm1948_vm3, %v6654_v0, 0.0 }
 0x44f   : > { %2678 = vadd.xlane.f32.xlu0 %v2677_v47 }
 0x45a   : > { %v2658_v42 = vpop.xlane.xlu0 %2657 }
 0x45b   : > { %v2664_v1 = vsub.f32 %v2648_v35, %v2658_v42  ;;  %v5853_v42 = vld [vmem:[%s8133_s13] ss:$0 sm:$0xff] }
 0x45d   : > { %v2670_v31 = vmul.f32 1.442695, %v2664_v1 }
 0x45f   : > { %6655 = vpow2.f32 %v2670_v31  ;;  %v5858_v31 = vld [vmem:[%s8134_s14] ss:$0 sm:$0xff] }
 0x462   : > { %v2661_v37 = vpop.xlane.xlu0 %2660 }
 0x463   : > { %v2665_v51 = vsub.f32 %v2649_v58, %v2661_v37 }
 0x465   : > { %v2672_v18 = vmul.f32 1.442695, %v2665_v51 }
 0x467   : > { %6657 = vpow2.f32 %v2672_v18 }
 0x46c   : > { %v6656_v48 = vpop.eup %6655 }
 0x46d   : > { %v2680_v50 = vsel %vm1948_vm3, %v6656_v48, 0.0 }
 0x46e   : > { %2681 = vadd.xlane.f32.xlu1 %v2680_v50 }
 0x474   : > { %v6658_v4 = vpop.eup %6657 }
 0x475   : > { %v2683_v52 = vsel %vm1948_vm3, %v6658_v4, 0.0 }
 0x476   : > { %2684 = vadd.xlane.f32.xlu0 %v2683_v52 }
 0x47f   : > { %2814 = vperm.xlu1 %6649, %v5848_v5  }
 0x483   : > { %2795 = vperm.xlu1 %6649, %v2774_v20  }
 0x487   : > { %2800 = vperm.xlu1 %6649, %v6334_v21  }
 0x48c   : > { %2790 = vperm.xlu0 %6650, %v7595_v62  }
 0x4cc   : > { %v2676_v8 = vpop.xlane.xlu1 %2675 }
 0x4cd   : > { %6659 = vrcp.f32 %v2676_v8  ;;  %v3332_v8 = vld [vmem:[%s8138_s18 + $0x8] sm:$0xff] }
 0x4d8   : > { %v2679_v45 = vpop.xlane.xlu0 %2678 }
 0x4d9   : > { %6661 = vrcp.f32 %v2679_v45  ;;  %v7698_v45 = vld [vmem:[%s8135_s15 + $0x8] sm:$0xff] }
 0x4da   : > { %v6660_v9 = vpop.eup %6659 }
 0x4db   : > { %v2690_v10 = vmul.f32 %v6660_v9, %v6652_v2  ;;  %v3333_v9 = vld [vmem:[%s8138_s18 + $0x10] sm:$0xff] }
 0x4dd   : > { %6338 = vmatmul.mubr.msk.f32.vlgmr.msra.gmra.mxu0 %vm1948_vm3, %v2690_v10  ;;  %v2803_v13 = vmul.f32 %v2786_v59, %v2690_v10  ;;  %v3324_v59 = vld [vmem:[%s8137_s17 + $0x8] sm:$0xff]  ;;  %v3325_v10 = vld [vmem:[%s8137_s17 + $0x10] sm:$0xff] }
 0x4de   : > { %6341 = vmatpush3.msra.mxu0 %v7033_v15  ;;  %6342 = vmatprep.mubr.msk.f32.mxu0 %vm6803_vm7, %v6801_v7 }
 0x4df   : > { %6350 = vmatprep.subr.mxu0 %v6801_v7 }
 0x4e6   : > { %v6662_v62 = vpop.eup %6661 }
 0x4e7   : > { %v2691_v3 = vmul.f32 %v6662_v62, %v6654_v0  ;;  %v7712_v62 = vld [vmem:[%s8136_s16 + $0x8] sm:$0xff] }
 0x4e9   : > { %6343 = vmatmul.mubr.msk.f32.vlgmr.msra.gmra.mxu0 %vm1948_vm3, %v2691_v3 }
 0x4ea   : > { %6351 = vmatpush3.msra.mxu0 %v7041_v17  ;;  %6352 = vmatprep.mubr.msk.f32.mxu0 %vm6803_vm7, %v6801_v7 }
 0x4eb   : > { %6363 = vmatprep.subr.mxu0 %v3230_v11 }
 0x4f7   : > { %v2682_v15 = vpop.xlane.xlu1 %2681 }
 0x4f8   : > { %6663 = vrcp.f32 %v2682_v15  ;;  %v3335_v15 = vld [vmem:[%s8138_s18 + $0x20] sm:$0xff] }
 0x4fb   : > { %v2815_v12 = vpop.permute.xlu1 %2814 }
 0x4fc   : > { %v2817_v19 = vadd.f32 %v2815_v12, %v2803_v13  ;;  %v7736_v13 = vld [vmem:[%s8135_s15] sm:$0xff] }
 0x4fe   : > { %v2825_v24 = vmul.f32 0.01, %v2817_v19  ;;  %vm2821_vm8 = vcmp.ge.f32.partialorder %v2817_v19, 0.0 }
 0x4ff   : > { %v2685_v14 = vpop.xlane.xlu0 %2684  ;;  %v2796_v27 = vpop.permute.xlu1 %2795 }
 0x500   : > { %6665 = vrcp.f32 %v2685_v14  ;;  %v2829_v17 = vsel %vm2821_vm8, %v2817_v19, %v2825_v24  ;;  %v7743_v14 = vld [vmem:[%s8136_s16] sm:$0xff]  ;;  %v3328_v19 = vld [vmem:[%s8137_s17 + $0x28] sm:$0xff] }
 0x503   : > { %v2801_v32 = vpop.permute.xlu1 %2800 }
 0x505   : > { %v6664_v25 = vpop.eup %6663 }
 0x506   : > { %v2692_v26 = vmul.f32 %v6664_v25, %v6656_v48  ;;  %v3337_v25 = vld [vmem:[%s8138_s18 + $0x30] sm:$0xff] }
 0x507   : > { %v2791_v28 = vpop.permute.xlu0 %2790 }
 0x508   : > { %v2805_v29 = vmul.f32 %v2796_v27, %v2692_v26  ;;  %v2804_v23 = vmul.f32 %v2791_v28, %v2691_v3  ;;  %6348 = vmatmul.mubr.msk.f32.vlgmr.msra.gmra.mxu1 %vm1948_vm3, %v2692_v26  ;;  %v3334_v3 = vld [vmem:[%s8138_s18 + $0x18] sm:$0xff]  ;;  %v3329_v26 = vld [vmem:[%s8137_s17 + $0x30] sm:$0xff] }
 0x509   : > { %6357 = vmatprep.mubr.msk.f32.mxu1 %vm1948_vm3, %v2829_v17  ;;  %6356 = vmatpush3.msra.mxu1 %v3125_v6  ;;  %v3338_v28 = vld [vmem:[%s8138_s18 + $0x38] sm:$0xff] }
 0x50a   : > { %v2819_v30 = vadd.f32 %v2815_v12, %v2805_v29  ;;  %v2818_v33 = vadd.f32 %v2815_v12, %v2804_v23  ;;  %v3330_v29 = vld [vmem:[%s8137_s17 + $0x38] sm:$0xff] }
 0x50c   : > { %v2827_v34 = vmul.f32 0.01, %v2819_v30  ;;  %vm2822_vm9 = vcmp.ge.f32.partialorder %v2818_v33, 0.0  ;;  %v2826_v35 = vmul.f32 0.01, %v2818_v33  ;;  %vm2823_vm10 = vcmp.ge.f32.partialorder %v2819_v30, 0.0 }
 0x50d   : > { %v6666_v16 = vpop.eup %6665 }
 0x50e   : > { %v2693_v43 = vmul.f32 %v6666_v16, %v6658_v4  ;;  %v2830_v53 = vsel %vm2822_vm9, %v2818_v33, %v2826_v35  ;;  %v2831_v54 = vsel %vm2823_vm10, %v2819_v30, %v2827_v34 }
 0x50f   : > { %6358 = vmatmul.mubr.msk.f32.vlgmr.msra.gmra.mxu1 %vm1948_vm3, %v2830_v53 }
 0x510   : > { %v2806_v36 = vmul.f32 %v2801_v32, %v2693_v43  ;;  %6353 = vmatmul.mubr.msk.f32.vlgmr.msra.gmra.mxu0 %vm1948_vm3, %v2693_v43  ;;  %6360 = vmatprep.mubr.msk.f32.mxu1 %vm1948_vm3, %v2831_v54 }
 0x511   : > { %6364 = vmatpush3.msra.mxu0 %v3230_v11  ;;  %6365 = vmatprep.mubr.msk.f32.mxu0 %vm1948_vm3, %v2829_v17  ;;  %v3326_v11 = vld [vmem:[%s8137_s17 + $0x18] sm:$0xff] }
 0x512   : > { %v2820_v55 = vadd.f32 %v2815_v12, %v2806_v36  ;;  %v3327_v12 = vld [vmem:[%s8137_s17 + $0x20] sm:$0xff] }
 0x514   : > { %v2828_v56 = vmul.f32 0.01, %v2820_v55  ;;  %6366 = vmatmul.mubr.msk.f32.vlgmr.msra.gmra.mxu0 %vm1948_vm3, %v2830_v53  ;;  %vm2824_vm11 = vcmp.ge.f32.partialorder %v2820_v55, 0.0 }
 0x515   : > { %6368 = vmatprep.mubr.msk.f32.mxu0 %vm1948_vm3, %v2831_v54 }
 0x516   : > { %v2832_v39 = vsel %vm2824_vm11, %v2820_v55, %v2828_v56 }
 0x517   : > { %6361 = vmatmul.mubr.msk.f32.gmra.mxu1 %vm1948_vm3, %v2832_v39 }
 0x518   : > { %6369 = vmatmul.mubr.msk.f32.gmra.mxu0 %vm1948_vm3, %v2832_v39  ;;  %6379 = vmatprep.mubr.msk.f32.mxu1 %vm920_vm1, %v3331_v57  ;;  %vm3608_vm3 = vcmp.lt.s32.totalorder %v7072_v22, 4  ;;  %v3336_v22 = vld [vmem:[%s8138_s18 + $0x28] sm:$0xff] }
 0x519   : > { %6399 = vmatprep.mubr.msk.f32.mxu0 %vm920_vm1, %v3323_v40  ;;  %v7754_v24 = vsel %vm3608_vm3, 1.0, %v6801_v7 }
 0x51a   : > { %v7769_v27 = vsub.f32 1.0, %v7754_v24  ;;  %v3617_v23 = vmul.f32 0.0, %v7754_v24 }
 0x51c   : > { %v3692_v17 = vmul.f32 0.0, %v7769_v27 }
 0x59d   : > { %v7675_v58 = vpop.f32.mrf.mxu0 }
 0x59f   : > { %v6339_v49 = vpop.f32.mrf.mxu0 }
 0x5a9   : > { %v7677_v60 = vpop.f32.mrf.mxu0 }
 0x5ab   : > { %v6344_v46 = vpop.f32.mrf.mxu0 }
 0x5c8   : > { %v7679_v61 = vpop.f32.mrf.mxu1 }
 0x5ca   : > { %v6349_v38 = vpop.f32.mrf.mxu1 }
 0x5cf   : > { %v6359_v41 = vpop.f32.mrf.mxu1 }
 0x5d0   : > { %v7681_v63 = vpop.f32.mrf.mxu0  ;;  %v3217_v5 = vadd.f32 %v6359_v41, %v5853_v42 }
 0x5d1   : > { %v3211_v0 = vpop.f32.mrf.mxu1 }
 0x5d2   : > { %v6354_v2 = vpop.f32.mrf.mxu0  ;;  %v3212_v20 = vadd.f32 %v5853_v42, %v3211_v0 }
 0x5d4   : > { %v6367_v44 = vpop.f32.mrf.mxu0 }
 0x5d5   : > { %v3310_v21 = vadd.f32 %v6367_v44, %v5858_v31 }
 0x5d6   : > { %v3304_v47 = vpop.f32.mrf.mxu0 }
 0x5d7   : > { %v6362_v1 = vpop.f32.mrf.mxu1  ;;  %v3305_v6 = vadd.f32 %v5858_v31, %v3304_v47 }
 0x5d8   : > { %v3227_v37 = vadd.f32 %v6362_v1, %v5853_v42  ;;  %v6370_v51 = vpop.f32.mrf.mxu0 }
 0x5d9   : > { %v3320_v18 = vadd.f32 %v6370_v51, %v5858_v31  ;;  %v3221_v48 = vpop.f32.mrf.mxu1 }
 0x5da   : > { %v3222_v50 = vadd.f32 %v5853_v42, %v3221_v48  ;;  %v3314_v4 = vpop.f32.mrf.mxu0  ;;  %6391 = vmatprep.subr.mxu0 %v3227_v37 }
 0x5db   : > { %v3315_v52 = vadd.f32 %v5858_v31, %v3314_v4  ;;  %6371 = vmatprep.subr.mxu1 %v3320_v18  ;;  %6392 = vmatpush3.msra.mxu0 %v3227_v37 }
 0x5dc   : > { %6372 = vmatpush3.msra.mxu1 %v3320_v18  ;;  %6393 = vmatprep.subr.mxu0 %v3222_v50 }
 0x5dd   : > { %6373 = vmatprep.subr.mxu1 %v3315_v52  ;;  %6394 = vmatpush3.msra.mxu0 %v3222_v50 }
 0x5de   : > { %6374 = vmatpush3.msra.mxu1 %v3315_v52  ;;  %6395 = vmatprep.subr.mxu0 %v3217_v5 }
 0x5df   : > { %6375 = vmatprep.subr.mxu1 %v3310_v21  ;;  %6396 = vmatpush3.msra.mxu0 %v3217_v5 }
 0x5e0   : > { %6376 = vmatpush3.msra.mxu1 %v3310_v21  ;;  %6397 = vmatprep.subr.mxu0 %v3212_v20 }
 0x5e1   : > { %6377 = vmatprep.subr.mxu1 %v3305_v6  ;;  %6398 = vmatpush3.msra.mxu0 %v3212_v20 }
 0x5e2   : > { %6378 = vmatpush3.msra.mxu1 %v3305_v6  ;;  %6400 = vmatmul.mubr.msk.f32.vlgmr.msra.gmra.mxu0 %vm920_vm1, %v3324_v59 }
 0x5e3   : > { %6380 = vmatmul.mubr.msk.f32.vlgmr.msra.gmra.mxu1 %vm920_vm1, %v3332_v8  ;;  %6411 = vmatprep.subr.mxu1 %v6801_v7 }
 0x5e4   : > { %6412 = vmatpush3.msra.mxu1 %v7698_v45  ;;  %6418 = vmatprep.subr.mxu0 %v6801_v7 }
 0x5e5   : > { %6382 = vmatprep.mubr.msk.f32.mxu1 %vm920_vm1, %v3333_v9  ;;  %6402 = vmatprep.mubr.msk.f32.mxu0 %vm920_vm1, %v3325_v10 }
 0x5e6   : > { %6419 = vmatpush3.msra.mxu0 %v7712_v62  ;;  %6413 = vmatprep.subr.mxu1 %v6801_v7 }
 0x5e7   : > { %6383 = vmatmul.mubr.msk.f32.gmra.mxu1 %vm920_vm1, %v3334_v3  ;;  %6403 = vmatmul.mubr.msk.f32.gmra.mxu0 %vm920_vm1, %v3326_v11 }
 0x5e8   : > { %6385 = vmatprep.mubr.msk.f32.mxu1 %vm920_vm1, %v3335_v15  ;;  %6405 = vmatprep.mubr.msk.f32.mxu0 %vm920_vm1, %v3327_v12 }
 0x5e9   : > { %6414 = vmatpush3.msra.mxu1 %v7736_v13  ;;  %6420 = vmatprep.subr.mxu0 %v6801_v7 }
 0x5ea   : > { %6421 = vmatpush3.msra.mxu0 %v7743_v14  ;;  %6425 = vmatprep.subr.mxu1 %v6801_v7 }
 0x5eb   : > { %6386 = vmatmul.mubr.msk.f32.gmra.mxu1 %vm920_vm1, %v3336_v22  ;;  %6406 = vmatmul.mubr.msk.f32.gmra.mxu0 %vm920_vm1, %v3328_v19 }
 0x5ec   : > { %6388 = vmatprep.mubr.msk.f32.mxu1 %vm920_vm1, %v3337_v25  ;;  %6408 = vmatprep.mubr.msk.f32.mxu0 %vm920_vm1, %v3329_v26 }
 0x5ed   : > { %6432 = vmatprep.subr.mxu0 %v6801_v7 }
 0x5ef   : > { %6389 = vmatmul.mubr.msk.f32.gmra.mxu1 %vm920_vm1, %v3338_v28  ;;  %6409 = vmatmul.mubr.msk.f32.gmra.mxu0 %vm920_vm1, %v3330_v29 }
 0x5f0   : > { %6415 = vmatprep.mubr.msk.f32.mxu1 %vm6803_vm7, %v6801_v7  ;;  %6422 = vmatprep.mubr.msk.f32.mxu0 %vm6803_vm7, %v6801_v7 }
 0x5f3   : > { %6416 = vmatmul.mubr.msk.f32.vlgmr.msra.gmra.mxu1 %vm818_vm0, %v3617_v23  ;;  %6423 = vmatmul.mubr.msk.f32.vlgmr.msra.gmra.mxu0 %vm818_vm0, %v3692_v17 }
 0x5f4   : > { %6426 = vmatpush3.msra.mxu1 %v7698_v45  ;;  %6433 = vmatpush3.msra.mxu0 %v7712_v62 }
 0x5f5   : > { %6427 = vmatprep.subr.mxu1 %v6801_v7  ;;  %6434 = vmatprep.subr.mxu0 %v6801_v7 }
 0x5f6   : > { %6428 = vmatpush3.msra.mxu1 %v7736_v13  ;;  %6429 = vmatprep.mubr.msk.f32.mxu1 %vm6803_vm7, %v6801_v7 }
 0x5f7   : > { %6435 = vmatpush3.msra.mxu0 %v7743_v14  ;;  %6436 = vmatprep.mubr.msk.f32.mxu0 %vm6803_vm7, %v6801_v7 }
 0x5f8   : > { %6439 = vmatprep.subr.mxu1 %v6801_v7  ;;  %6446 = vmatprep.subr.mxu0 %v6801_v7 }
 0x6a2   : > { %v6401_v30 = vpop.f32.mrf.mxu0 }
 0x6a3   : > { %v6381_v33 = vpop.f32.mrf.mxu1 }
 0x6a4   : > { %v3564_v34 = vadd.f32 %v6401_v30, %v6381_v33  ;;  %v3558_v35 = vpop.f32.mrf.mxu0 }
 0x6a5   : > { %v3429_v16 = vpop.f32.mrf.mxu1 }
 0x6a6   : > { %3599 = vst.msk [vmem:[#allocation2 + $0x8] sm:$0xff] %vm3597_vm12, %v3564_v34  ;;  %v3559_v43 = vadd.f32 %v3558_v35, %v3429_v16 }
 0x6a7   : > { %v6384_v53 = vpop.f32.mrf.mxu1  ;;  %v6404_v54 = vpop.f32.mrf.mxu0 }
 0x6a8   : > { %3598 = vst.msk [vmem:[#allocation2] sm:$0xff] %vm3597_vm12, %v3559_v43  ;;  %v3574_v32 = vadd.f32 %v6404_v54, %v6384_v53 }
 0x6a9   : > { %v3439_v36 = vpop.f32.mrf.mxu1  ;;  %v3568_v55 = vpop.f32.mrf.mxu0 }
 0x6aa   : > { %3601 = vst.msk [vmem:[#allocation2 + $0x18] sm:$0xff] %vm3597_vm12, %v3574_v32  ;;  %v3569_v56 = vadd.f32 %v3568_v55, %v3439_v36 }
 0x6ab   : > { %v6387_v39 = vpop.f32.mrf.mxu1  ;;  %v6407_v57 = vpop.f32.mrf.mxu0 }
 0x6ac   : > { %3600 = vst.msk [vmem:[#allocation2 + $0x10] sm:$0xff] %vm3597_vm12, %v3569_v56  ;;  %v3584_v40 = vadd.f32 %v6407_v57, %v6387_v39 }
 0x6ad   : > { %v3449_v49 = vpop.f32.mrf.mxu1  ;;  %v3578_v46 = vpop.f32.mrf.mxu0  ;;  %v3796_v26 = vld [vmem:[#allocation2 + $0x8] sm:$0xff] }
 0x6ae   : > { %3603 = vst.msk [vmem:[#allocation2 + $0x28] sm:$0xff] %vm3597_vm12, %v3584_v40  ;;  %v3579_v38 = vadd.f32 %v3578_v46, %v3449_v49 }
 0x6af   : > { %v6390_v41 = vpop.f32.mrf.mxu1  ;;  %v6410_v2 = vpop.f32.mrf.mxu0  ;;  %v3616_v1 = vld [vmem:[#allocation2] sm:$0xff] }
 0x6b0   : > { %3602 = vst.msk [vmem:[#allocation2 + $0x20] sm:$0xff] %vm3597_vm12, %v3579_v38  ;;  %v3594_v44 = vadd.f32 %v6410_v2, %v6390_v41 }
 0x6b1   : > { %v3459_v0 = vpop.f32.mrf.mxu1  ;;  %v3588_v47 = vpop.f32.mrf.mxu0 }
 0x6b2   : > { %3605 = vst.msk [vmem:[#allocation2 + $0x38] sm:$0xff] %vm3597_vm12, %v3594_v44  ;;  %v3589_v42 = vadd.f32 %v3588_v47, %v3459_v0 }
 0x6b3   : > { %v3687_v31 = vpop.f32.mrf.mxu1  ;;  %v3762_v37 = vpop.f32.mrf.mxu0  ;;  %v3980_v2 = vld [vmem:[#allocation2 + $0x10] sm:$0xff] }
 0x6b4   : > { %3604 = vst.msk [vmem:[#allocation2 + $0x30] sm:$0xff] %vm3597_vm12, %v3589_v42  ;;  %v3691_v51 = vadd.f32 %v3687_v31, %v3616_v1 }
 0x6b5   : > { %v6417_v18 = vpop.f32.mrf.mxu1  ;;  %v6424_v48 = vpop.f32.mrf.mxu0 }
 0x6b6   : > { %v3766_v50 = vadd.f32 %v3762_v37, %v3691_v51 }
 0x6b8   : > { %6667 = vtanh.f32 %v3766_v50  ;;  %v5882_v52 = vmul.f32 -1.442695, %v3766_v50 }
 0x6ba   : > { %6669 = vpow2.f32 %v5882_v52 }
 0x6c5   : > { %v6668_v4 = vpop.eup %6667 }
 0x6c6   : > { %3776 = vrot.lane.b32.xlu0 %v6668_v4, %s6804_s1 }
 0x6c7   : > { %v6670_v5 = vpop.eup %6669 }
 0x6c8   : > { %v3770_v21 = vadd.f32 1.0, %v6670_v5 }
 0x6ca   : > { %6671 = vrcp.f32 %v3770_v21 }
 0x6d7   : > { %v6672_v20 = vpop.eup %6671 }
 0x6d8   : > { %v3774_v8 = vmul.f32 0.0, %v6672_v20 }
 0x738   : > { %v3777_v6 = vpop.permute.xlu0 %3776 }
 0x739   : > { %v3779_v59 = vmul.f32 %v6672_v20, %v3777_v6 }
 0x73b   : > { %3781 = vrot.lane.b32.xlu1 %v3779_v59, %s6805_s2 }
 0x7ad   : > { %v3782_v9 = vpop.permute.xlu1 %3781 }
 0x7ae   : > { %v3784_v10 = vadd.f32 %v3782_v9, %v3774_v8 }
 0x7b0   : > { %6673 = vtanh.f32 %v3784_v10 }
 0x7bd   : > { %v6674_v3 = vpop.eup %6673 }
 0x7be   : > { %3787 = vrot.lane.b32.xlu0 %v6674_v3, %s6806_s6 }
 0x830   : > { %v3788_v11 = vpop.permute.xlu0 %3787 }
 0x831   : > { %v7813_v15 = vmul.f32 %v6672_v20, %v3788_v11 }
 0x833   : > { %v3797_v12 = vmul.f32 %v7754_v24, %v7813_v15  ;;  %v3874_v22 = vmul.f32 %v7813_v15, %v7769_v27 }
 0x835   : > { %3876 = vrot.lane.b32.xlu0 %v3874_v22, %s6807_s9  ;;  %3799 = vrot.lane.b32.xlu1 %v3797_v12, %s6807_s9  ;;  %v4164_v12 = vld [vmem:[#allocation2 + $0x18] sm:$0xff] }
 0x8a7   : > { %v3877_v19 = vpop.permute.xlu0 %3876  ;;  %v3800_v25 = vpop.permute.xlu1 %3799 }
 0x8a8   : > { %6430 = vmatmul.mubr.msk.f32.vlgmr.msra.gmra.mxu1 %vm818_vm0, %v3800_v25  ;;  %6437 = vmatmul.mubr.msk.f32.vlgmr.msra.gmra.mxu0 %vm818_vm0, %v3877_v19 }
 0x8a9   : > { %6440 = vmatpush3.msra.mxu1 %v7698_v45  ;;  %6447 = vmatpush3.msra.mxu0 %v7712_v62 }
 0x8aa   : > { %6441 = vmatprep.subr.mxu1 %v6801_v7  ;;  %6448 = vmatprep.subr.mxu0 %v6801_v7 }
 0x8ab   : > { %6442 = vmatpush3.msra.mxu1 %v7736_v13  ;;  %6443 = vmatprep.mubr.msk.f32.mxu1 %vm6803_vm7, %v6801_v7 }
 0x8ac   : > { %6449 = vmatpush3.msra.mxu0 %v7743_v14  ;;  %6450 = vmatprep.mubr.msk.f32.mxu0 %vm6803_vm7, %v6801_v7 }
 0x8ad   : > { %6453 = vmatprep.subr.mxu1 %v6801_v7  ;;  %6460 = vmatprep.subr.mxu0 %v6801_v7 }
 0x968   : > { %v3869_v28 = vpop.f32.mrf.mxu1  ;;  %v3946_v29 = vpop.f32.mrf.mxu0 }
 0x969   : > { %v3873_v23 = vadd.f32 %v3869_v28, %v3796_v26 }
 0x96a   : > { %v6431_v17 = vpop.f32.mrf.mxu1  ;;  %v6438_v30 = vpop.f32.mrf.mxu0 }
 0x96b   : > { %v3950_v33 = vadd.f32 %v3946_v29, %v3873_v23 }
 0x96d   : > { %6675 = vtanh.f32 %v3950_v33  ;;  %v5885_v35 = vmul.f32 -1.442695, %v3950_v33 }
 0x96f   : > { %6677 = vpow2.f32 %v5885_v35 }
 0x97a   : > { %v6676_v34 = vpop.eup %6675 }
 0x97b   : > { %3960 = vrot.lane.b32.xlu1 %v6676_v34, %s6804_s1 }
 0x97c   : > { %v6678_v16 = vpop.eup %6677 }
 0x97d   : > { %v3954_v43 = vadd.f32 1.0, %v6678_v16 }
 0x97f   : > { %6679 = vrcp.f32 %v3954_v43 }
 0x98c   : > { %v6680_v53 = vpop.eup %6679 }
 0x98d   : > { %v3958_v36 = vmul.f32 %v6680_v53, %v3784_v10 }
 0x9ed   : > { %v3961_v54 = vpop.permute.xlu1 %3960 }
 0x9ee   : > { %v3963_v32 = vmul.f32 %v6680_v53, %v3961_v54 }
 0x9f0   : > { %3965 = vrot.lane.b32.xlu0 %v3963_v32, %s6805_s2 }
 0xa62   : > { %v3966_v55 = vpop.permute.xlu0 %3965 }
 0xa63   : > { %v3968_v56 = vadd.f32 %v3966_v55, %v3958_v36 }
 0xa65   : > { %6681 = vtanh.f32 %v3968_v56 }
 0xa72   : > { %v6682_v39 = vpop.eup %6681 }
 0xa73   : > { %3971 = vrot.lane.b32.xlu1 %v6682_v39, %s6806_s6 }
 0xae5   : > { %v3972_v57 = vpop.permute.xlu1 %3971 }
 0xae6   : > { %v7838_v40 = vmul.f32 %v6680_v53, %v3972_v57 }
 0xae8   : > { %v3981_v49 = vmul.f32 %v7754_v24, %v7838_v40  ;;  %v4058_v46 = vmul.f32 %v7838_v40, %v7769_v27 }
 0xaea   : > { %4060 = vrot.lane.b32.xlu1 %v4058_v46, %s6807_s9  ;;  %3983 = vrot.lane.b32.xlu0 %v3981_v49, %s6807_s9  ;;  %v4348_v46 = vld [vmem:[#allocation2 + $0x20] sm:$0xff] }
 0xb5c   : > { %v4061_v38 = vpop.permute.xlu1 %4060  ;;  %v3984_v41 = vpop.permute.xlu0 %3983 }
 0xb5d   : > { %6444 = vmatmul.mubr.msk.f32.vlgmr.msra.gmra.mxu1 %vm818_vm0, %v3984_v41  ;;  %6451 = vmatmul.mubr.msk.f32.vlgmr.msra.gmra.mxu0 %vm818_vm0, %v4061_v38 }
 0xb5e   : > { %6454 = vmatpush3.msra.mxu1 %v7698_v45  ;;  %6461 = vmatpush3.msra.mxu0 %v7712_v62 }
 0xb5f   : > { %6455 = vmatprep.subr.mxu1 %v6801_v7  ;;  %6462 = vmatprep.subr.mxu0 %v6801_v7 }
 0xb60   : > { %6456 = vmatpush3.msra.mxu1 %v7736_v13  ;;  %6457 = vmatprep.mubr.msk.f32.mxu1 %vm6803_vm7, %v6801_v7 }
 0xb61   : > { %6463 = vmatpush3.msra.mxu0 %v7743_v14  ;;  %6464 = vmatprep.mubr.msk.f32.mxu0 %vm6803_vm7, %v6801_v7 }
 0xb62   : > { %6467 = vmatprep.subr.mxu1 %v6801_v7  ;;  %6474 = vmatprep.subr.mxu0 %v6801_v7 }
 0xc1d   : > { %v4053_v44 = vpop.f32.mrf.mxu1  ;;  %v4130_v0 = vpop.f32.mrf.mxu0 }
 0xc1e   : > { %v4057_v47 = vadd.f32 %v4053_v44, %v3980_v2 }
 0xc1f   : > { %v6445_v42 = vpop.f32.mrf.mxu1  ;;  %v6452_v1 = vpop.f32.mrf.mxu0 }
 0xc20   : > { %v4134_v31 = vadd.f32 %v4130_v0, %v4057_v47 }
 0xc22   : > { %6683 = vtanh.f32 %v4134_v31  ;;  %v5888_v51 = vmul.f32 -1.442695, %v4134_v31 }
 0xc24   : > { %6685 = vpow2.f32 %v5888_v51 }
 0xc2f   : > { %v6684_v37 = vpop.eup %6683 }
 0xc30   : > { %4144 = vrot.lane.b32.xlu0 %v6684_v37, %s6804_s1 }
 0xc31   : > { %v6686_v18 = vpop.eup %6685 }
 0xc32   : > { %v4138_v48 = vadd.f32 1.0, %v6686_v18 }
 0xc34   : > { %6687 = vrcp.f32 %v4138_v48 }
 0xc41   : > { %v6688_v50 = vpop.eup %6687 }
 0xc42   : > { %v4142_v5 = vmul.f32 %v6688_v50, %v3968_v56 }
 0xca2   : > { %v4145_v4 = vpop.permute.xlu0 %4144 }
 0xca3   : > { %v4147_v52 = vmul.f32 %v6688_v50, %v4145_v4 }
 0xca5   : > { %4149 = vrot.lane.b32.xlu1 %v4147_v52, %s6805_s2 }
 0xd17   : > { %v4150_v21 = vpop.permute.xlu1 %4149 }
 0xd18   : > { %v4152_v20 = vadd.f32 %v4150_v21, %v4142_v5 }
 0xd1a   : > { %6689 = vtanh.f32 %v4152_v20 }
 0xd27   : > { %v6690_v6 = vpop.eup %6689 }
 0xd28   : > { %4155 = vrot.lane.b32.xlu0 %v6690_v6, %s6806_s6 }
 0xd9a   : > { %v4156_v59 = vpop.permute.xlu0 %4155 }
 0xd9b   : > { %v7863_v8 = vmul.f32 %v6688_v50, %v4156_v59 }
 0xd9d   : > { %v4165_v9 = vmul.f32 %v7754_v24, %v7863_v8  ;;  %v4242_v10 = vmul.f32 %v7863_v8, %v7769_v27 }
 0xd9f   : > { %4244 = vrot.lane.b32.xlu0 %v4242_v10, %s6807_s9  ;;  %4167 = vrot.lane.b32.xlu1 %v4165_v9, %s6807_s9 }
 0xe11   : > { %v4245_v3 = vpop.permute.xlu0 %4244  ;;  %v4168_v11 = vpop.permute.xlu1 %4167 }
 0xe12   : > { %6458 = vmatmul.mubr.msk.f32.vlgmr.msra.gmra.mxu1 %vm818_vm0, %v4168_v11  ;;  %6465 = vmatmul.mubr.msk.f32.vlgmr.msra.gmra.mxu0 %vm818_vm0, %v4245_v3  ;;  %v4532_v3 = vld [vmem:[#allocation2 + $0x28] sm:$0xff] }
 0xe13   : > { %6468 = vmatpush3.msra.mxu1 %v7698_v45  ;;  %6475 = vmatpush3.msra.mxu0 %v7712_v62 }
 0xe14   : > { %6469 = vmatprep.subr.mxu1 %v6801_v7  ;;  %6476 = vmatprep.subr.mxu0 %v6801_v7 }
 0xe15   : > { %6470 = vmatpush3.msra.mxu1 %v7736_v13  ;;  %6471 = vmatprep.mubr.msk.f32.mxu1 %vm6803_vm7, %v6801_v7 }
 0xe16   : > { %6477 = vmatpush3.msra.mxu0 %v7743_v14  ;;  %6478 = vmatprep.mubr.msk.f32.mxu0 %vm6803_vm7, %v6801_v7 }
 0xe17   : > { %6481 = vmatprep.subr.mxu1 %v6801_v7  ;;  %6488 = vmatprep.subr.mxu0 %v6801_v7 }
 0xed2   : > { %v4237_v22 = vpop.f32.mrf.mxu1  ;;  %v4314_v19 = vpop.f32.mrf.mxu0 }
 0xed3   : > { %v4241_v25 = vadd.f32 %v4237_v22, %v4164_v12 }
 0xed4   : > { %v6459_v26 = vpop.f32.mrf.mxu1  ;;  %v6466_v28 = vpop.f32.mrf.mxu0 }
 0xed5   : > { %v4318_v29 = vadd.f32 %v4314_v19, %v4241_v25 }
 0xed7   : > { %6691 = vtanh.f32 %v4318_v29  ;;  %v5891_v17 = vmul.f32 -1.442695, %v4318_v29 }
 0xed9   : > { %6693 = vpow2.f32 %v5891_v17 }
 0xee4   : > { %v6692_v23 = vpop.eup %6691 }
 0xee5   : > { %4328 = vrot.lane.b32.xlu1 %v6692_v23, %s6804_s1 }
 0xee6   : > { %v6694_v30 = vpop.eup %6693 }
 0xee7   : > { %v4322_v33 = vadd.f32 1.0, %v6694_v30 }
 0xee9   : > { %6695 = vrcp.f32 %v4322_v33 }
 0xef6   : > { %v6696_v34 = vpop.eup %6695 }
 0xef7   : > { %v4326_v43 = vmul.f32 %v6696_v34, %v4152_v20 }
 0xf57   : > { %v4329_v35 = vpop.permute.xlu1 %4328 }
 0xf58   : > { %v4331_v16 = vmul.f32 %v6696_v34, %v4329_v35 }
 0xf5a   : > { %4333 = vrot.lane.b32.xlu0 %v4331_v16, %s6805_s2 }
 0xfcc   : > { %v4334_v53 = vpop.permute.xlu0 %4333 }
 0xfcd   : > { %v4336_v54 = vadd.f32 %v4334_v53, %v4326_v43 }
 0xfcf   : > { %6697 = vtanh.f32 %v4336_v54 }
 0xfdc   : > { %v6698_v32 = vpop.eup %6697 }
 0xfdd   : > { %4339 = vrot.lane.b32.xlu1 %v6698_v32, %s6806_s6 }
0x104f   : > { %v4340_v36 = vpop.permute.xlu1 %4339 }
0x1050   : > { %v7888_v55 = vmul.f32 %v6696_v34, %v4340_v36 }
0x1052   : > { %v4349_v56 = vmul.f32 %v7754_v24, %v7888_v55  ;;  %v4426_v39 = vmul.f32 %v7888_v55, %v7769_v27 }
0x1054   : > { %4428 = vrot.lane.b32.xlu1 %v4426_v39, %s6807_s9  ;;  %4351 = vrot.lane.b32.xlu0 %v4349_v56, %s6807_s9 }
0x10c6   : > { %v4429_v57 = vpop.permute.xlu1 %4428  ;;  %v4352_v49 = vpop.permute.xlu0 %4351 }
0x10c7   : > { %6472 = vmatmul.mubr.msk.f32.vlgmr.msra.gmra.mxu1 %vm818_vm0, %v4352_v49  ;;  %6479 = vmatmul.mubr.msk.f32.vlgmr.msra.gmra.mxu0 %vm818_vm0, %v4429_v57  ;;  %v4716_v49 = vld [vmem:[#allocation2 + $0x30] sm:$0xff] }
0x10c8   : > { %6482 = vmatpush3.msra.mxu1 %v7698_v45  ;;  %6489 = vmatpush3.msra.mxu0 %v7712_v62 }
0x10c9   : > { %6483 = vmatprep.subr.mxu1 %v6801_v7  ;;  %6490 = vmatprep.subr.mxu0 %v6801_v7 }
0x10ca   : > { %6484 = vmatpush3.msra.mxu1 %v7736_v13  ;;  %6485 = vmatprep.mubr.msk.f32.mxu1 %vm6803_vm7, %v6801_v7 }
0x10cb   : > { %6491 = vmatpush3.msra.mxu0 %v7743_v14  ;;  %6492 = vmatprep.mubr.msk.f32.mxu0 %vm6803_vm7, %v6801_v7 }
0x10cc   : > { %6495 = vmatprep.subr.mxu1 %v6801_v7  ;;  %6502 = vmatprep.subr.mxu0 %v6801_v7 }
0x1187   : > { %v4421_v38 = vpop.f32.mrf.mxu1  ;;  %v4498_v41 = vpop.f32.mrf.mxu0 }
0x1188   : > { %v4425_v2 = vadd.f32 %v4421_v38, %v4348_v46 }
0x1189   : > { %v6473_v44 = vpop.f32.mrf.mxu1  ;;  %v6480_v0 = vpop.f32.mrf.mxu0 }
0x118a   : > { %v4502_v47 = vadd.f32 %v4498_v41, %v4425_v2 }
0x118c   : > { %6699 = vtanh.f32 %v4502_v47  ;;  %v5894_v1 = vmul.f32 -1.442695, %v4502_v47 }
0x118e   : > { %6701 = vpow2.f32 %v5894_v1 }
0x1199   : > { %v6700_v42 = vpop.eup %6699 }
0x119a   : > { %4512 = vrot.lane.b32.xlu0 %v6700_v42, %s6804_s1 }
0x119b   : > { %v6702_v31 = vpop.eup %6701 }
0x119c   : > { %v4506_v37 = vadd.f32 1.0, %v6702_v31 }
0x119e   : > { %6703 = vrcp.f32 %v4506_v37 }
0x11ab   : > { %v6704_v51 = vpop.eup %6703 }
0x11ac   : > { %v4510_v50 = vmul.f32 %v6704_v51, %v4336_v54 }
0x120c   : > { %v4513_v18 = vpop.permute.xlu0 %4512 }
0x120d   : > { %v4515_v48 = vmul.f32 %v6704_v51, %v4513_v18 }
0x120f   : > { %4517 = vrot.lane.b32.xlu1 %v4515_v48, %s6805_s2 }
0x1281   : > { %v4518_v4 = vpop.permute.xlu1 %4517 }
0x1282   : > { %v4520_v52 = vadd.f32 %v4518_v4, %v4510_v50 }
0x1284   : > { %6705 = vtanh.f32 %v4520_v52 }
0x1291   : > { %v6706_v5 = vpop.eup %6705 }
0x1292   : > { %4523 = vrot.lane.b32.xlu0 %v6706_v5, %s6806_s6 }
0x1304   : > { %v4524_v21 = vpop.permute.xlu0 %4523 }
0x1305   : > { %v7913_v20 = vmul.f32 %v6704_v51, %v4524_v21  ;;  %v4900_v21 = vld [vmem:[#allocation2 + $0x38] sm:$0xff] }
0x1307   : > { %v4533_v6 = vmul.f32 %v7754_v24, %v7913_v20  ;;  %v4610_v59 = vmul.f32 %v7913_v20, %v7769_v27 }
0x1309   : > { %4612 = vrot.lane.b32.xlu0 %v4610_v59, %s6807_s9  ;;  %4535 = vrot.lane.b32.xlu1 %v4533_v6, %s6807_s9 }
0x137b   : > { %v4613_v9 = vpop.permute.xlu0 %4612  ;;  %v4536_v10 = vpop.permute.xlu1 %4535 }
0x137c   : > { %6486 = vmatmul.mubr.msk.f32.vlgmr.msra.gmra.mxu1 %vm818_vm0, %v4536_v10  ;;  %6493 = vmatmul.mubr.msk.f32.vlgmr.msra.gmra.mxu0 %vm818_vm0, %v4613_v9 }
0x137d   : > { %6496 = vmatpush3.msra.mxu1 %v7698_v45  ;;  %6503 = vmatpush3.msra.mxu0 %v7712_v62 }
0x137e   : > { %6497 = vmatprep.subr.mxu1 %v6801_v7  ;;  %6504 = vmatprep.subr.mxu0 %v6801_v7 }
0x137f   : > { %6498 = vmatpush3.msra.mxu1 %v7736_v13  ;;  %6499 = vmatprep.mubr.msk.f32.mxu1 %vm6803_vm7, %v6801_v7 }
0x1380   : > { %6505 = vmatpush3.msra.mxu0 %v7743_v14  ;;  %6506 = vmatprep.mubr.msk.f32.mxu0 %vm6803_vm7, %v6801_v7 }
0x1381   : > { %6509 = vmatprep.subr.mxu1 %v6801_v7  ;;  %6516 = vmatprep.subr.mxu0 %v6801_v7 }
0x143c   : > { %v4605_v11 = vpop.f32.mrf.mxu1  ;;  %v4682_v12 = vpop.f32.mrf.mxu0 }
0x143d   : > { %v4609_v22 = vadd.f32 %v4605_v11, %v4532_v3 }
0x143e   : > { %v6487_v19 = vpop.f32.mrf.mxu1  ;;  %v6494_v25 = vpop.f32.mrf.mxu0 }
0x143f   : > { %v4686_v26 = vadd.f32 %v4682_v12, %v4609_v22 }
0x1441   : > { %6707 = vtanh.f32 %v4686_v26  ;;  %v5897_v29 = vmul.f32 -1.442695, %v4686_v26 }
0x1443   : > { %6709 = vpow2.f32 %v5897_v29 }
0x144e   : > { %v6708_v28 = vpop.eup %6707 }
0x144f   : > { %4696 = vrot.lane.b32.xlu1 %v6708_v28, %s6804_s1 }
0x1450   : > { %v6710_v23 = vpop.eup %6709 }
0x1451   : > { %v4690_v17 = vadd.f32 1.0, %v6710_v23 }
0x1453   : > { %6711 = vrcp.f32 %v4690_v17 }
0x1460   : > { %v6712_v30 = vpop.eup %6711 }
0x1461   : > { %v4694_v35 = vmul.f32 %v6712_v30, %v4520_v52 }
0x14c1   : > { %v4697_v33 = vpop.permute.xlu1 %4696 }
0x14c2   : > { %v4699_v34 = vmul.f32 %v6712_v30, %v4697_v33 }
0x14c4   : > { %4701 = vrot.lane.b32.xlu0 %v4699_v34, %s6805_s2 }
0x1536   : > { %v4702_v16 = vpop.permute.xlu0 %4701 }
0x1537   : > { %v4704_v43 = vadd.f32 %v4702_v16, %v4694_v35  ;;  %v5217_v16 = vld [vmem:[%s8140_s20] sm:$0xff] }
0x1539   : > { %6713 = vtanh.f32 %v4704_v43 }
0x1546   : > { %v6714_v53 = vpop.eup %6713 }
0x1547   : > { %4707 = vrot.lane.b32.xlu1 %v6714_v53, %s6806_s6 }
0x15b9   : > { %v4708_v54 = vpop.permute.xlu1 %4707 }
0x15ba   : > { %v7938_v32 = vmul.f32 %v6712_v30, %v4708_v54 }
0x15bc   : > { %v4717_v36 = vmul.f32 %v7754_v24, %v7938_v32  ;;  %v4794_v56 = vmul.f32 %v7938_v32, %v7769_v27 }
0x15be   : > { %4796 = vrot.lane.b32.xlu1 %v4794_v56, %s6807_s9  ;;  %4719 = vrot.lane.b32.xlu0 %v4717_v36, %s6807_s9 }
0x1630   : > { %v4797_v39 = vpop.permute.xlu1 %4796  ;;  %v4720_v57 = vpop.permute.xlu0 %4719 }
0x1631   : > { %6500 = vmatmul.mubr.msk.f32.vlgmr.msra.gmra.mxu1 %vm818_vm0, %v4720_v57  ;;  %6507 = vmatmul.mubr.msk.f32.vlgmr.msra.gmra.mxu0 %vm818_vm0, %v4797_v39 }
0x1632   : > { %6510 = vmatpush3.msra.mxu1 %v7698_v45  ;;  %6517 = vmatpush3.msra.mxu0 %v7712_v62 }
0x1633   : > { %6511 = vmatprep.subr.mxu1 %v6801_v7  ;;  %6518 = vmatprep.subr.mxu0 %v6801_v7 }
0x1634   : > { %6512 = vmatpush3.msra.mxu1 %v7736_v13  ;;  %6513 = vmatprep.mubr.msk.f32.mxu1 %vm6803_vm7, %v6801_v7 }
0x1635   : > { %6519 = vmatpush3.msra.mxu0 %v7743_v14  ;;  %6520 = vmatprep.mubr.msk.f32.mxu0 %vm6803_vm7, %v6801_v7 }
0x16f1   : > { %v4789_v46 = vpop.f32.mrf.mxu1  ;;  %v4866_v38 = vpop.f32.mrf.mxu0 }
0x16f2   : > { %v4793_v45 = vadd.f32 %v4789_v46, %v4716_v49 }
0x16f3   : > { %v6501_v41 = vpop.f32.mrf.mxu1  ;;  %v6508_v62 = vpop.f32.mrf.mxu0 }
0x16f4   : > { %v4870_v2 = vadd.f32 %v4866_v38, %v4793_v45 }
0x16f6   : > { %6715 = vtanh.f32 %v4870_v2  ;;  %v5900_v13 = vmul.f32 -1.442695, %v4870_v2 }
0x16f8   : > { %6717 = vpow2.f32 %v5900_v13 }
0x1703   : > { %v6716_v44 = vpop.eup %6715 }
0x1704   : > { %4880 = vrot.lane.b32.xlu0 %v6716_v44, %s6804_s1 }
0x1705   : > { %v6718_v0 = vpop.eup %6717 }
0x1706   : > { %v4874_v47 = vadd.f32 1.0, %v6718_v0 }
0x1708   : > { %6719 = vrcp.f32 %v4874_v47 }
0x1715   : > { %v6720_v14 = vpop.eup %6719 }
0x1716   : > { %v4878_v7 = vmul.f32 %v6720_v14, %v4704_v43 }
0x1776   : > { %v4881_v42 = vpop.permute.xlu0 %4880 }
0x1777   : > { %v4883_v1 = vmul.f32 %v6720_v14, %v4881_v42 }
0x1779   : > { %4885 = vrot.lane.b32.xlu1 %v4883_v1, %s6805_s2 }
0x17eb   : > { %v4886_v31 = vpop.permute.xlu1 %4885 }
0x17ec   : > { %v4888_v37 = vadd.f32 %v4886_v31, %v4878_v7 }
0x17ee   : > { %6721 = vtanh.f32 %v4888_v37 }
0x17fb   : > { %v6722_v51 = vpop.eup %6721 }
0x17fc   : > { %4891 = vrot.lane.b32.xlu0 %v6722_v51, %s6806_s6 }
0x186e   : > { %v4892_v18 = vpop.permute.xlu0 %4891 }
0x186f   : > { %v4894_v48 = vmul.f32 %v6720_v14, %v4892_v18  ;;  %v5117_v18 = vld [vmem:[%s8139_s19 + $0x8] sm:$0xff] }
0x1871   : > { %v4901_v50 = vmul.f32 %v7754_v24, %v4894_v48  ;;  %v4978_v4 = vmul.f32 %v4894_v48, %v7769_v27 }
0x1873   : > { %4980 = vrot.lane.b32.xlu0 %v4978_v4, %s6807_s9  ;;  %4903 = vrot.lane.b32.xlu1 %v4901_v50, %s6807_s9  ;;  %v5118_v50 = vld [vmem:[%s8139_s19 + $0x10] sm:$0xff] }
0x1874   : > { %v5219_v4 = vld [vmem:[%s8140_s20 + $0x10] sm:$0xff] }
0x18e5   : > { %v4981_v52 = vpop.permute.xlu0 %4980  ;;  %v4904_v5 = vpop.permute.xlu1 %4903 }
0x18e6   : > { %6514 = vmatmul.mubr.msk.f32.vlgmr.msra.gmra.mxu1 %vm818_vm0, %v4904_v5  ;;  %6521 = vmatmul.mubr.msk.f32.vlgmr.msra.gmra.mxu0 %vm818_vm0, %v4981_v52  ;;  %v5321_v52 = vld [vmem:[%s8142_s22 + $0x8] sm:$0xff]  ;;  %v5119_v5 = vld [vmem:[%s8139_s19 + $0x18] sm:$0xff] }
0x18e7   : > { %6561 = vmatprep.mubr.msk.f32.mxu0 %vm3597_vm12, %v5217_v16 }
0x19a6   : > { %v4973_v6 = vpop.f32.mrf.mxu1  ;;  %v5050_v59 = vpop.f32.mrf.mxu0 }
0x19a7   : > { %v4977_v9 = vadd.f32 %v4973_v6, %v4900_v21  ;;  %v5220_v21 = vld [vmem:[%s8140_s20 + $0x18] sm:$0xff]  ;;  %v5320_v6 = vld [vmem:[%s8142_s22] sm:$0xff] }
0x19a8   : > { %v6515_v10 = vpop.f32.mrf.mxu1  ;;  %v6522_v3 = vpop.f32.mrf.mxu0 }
0x19a9   : > { %v5054_v11 = vadd.f32 %v5050_v59, %v4977_v9  ;;  %v5319_v59 = vld [vmem:[%s8141_s21 + $0x8] sm:$0xff]  ;;  %v5318_v9 = vld [vmem:[%s8141_s21] sm:$0xff]  ;;  %v5519_v10 = vld [vmem:[%s8143_s23 + $0x18] sm:$0xff] }
0x19ab   : > { %6723 = vtanh.f32 %v5054_v11  ;;  %v5903_v27 = vmul.f32 -1.442695, %v5054_v11 }
0x19ad   : > { %6725 = vpow2.f32 %v5903_v27 }
0x19b8   : > { %v6724_v24 = vpop.eup %6723 }
0x19b9   : > { %5064 = vrot.lane.b32.xlu1 %v6724_v24, %s6804_s1 }
0x19ba   : > { %v6726_v12 = vpop.eup %6725 }
0x19bb   : > { %v5058_v22 = vadd.f32 1.0, %v6726_v12  ;;  %v5518_v12 = vld [vmem:[%s8143_s23 + $0x10] sm:$0xff] }
0x19bd   : > { %6727 = vrcp.f32 %v5058_v22 }
0x19ca   : > { %v6728_v19 = vpop.eup %6727 }
0x19cb   : > { %v5062_v28 = vmul.f32 %v6728_v19, %v4888_v37 }
0x1a2b   : > { %v5065_v25 = vpop.permute.xlu1 %5064 }
0x1a2c   : > { %v5067_v26 = vmul.f32 %v6728_v19, %v5065_v25 }
0x1a2e   : > { %5069 = vrot.lane.b32.xlu0 %v5067_v26, %s6805_s2  ;;  %s8195_s2 = sld [smem:[#allocation24_spill]] }
0x1aa0   : > { %v5070_v29 = vpop.permute.xlu0 %5069 }
0x1aa1   : > { %v5072_v23 = vadd.f32 %v5070_v29, %v5062_v28  ;;  %v5517_v28 = vld [vmem:[%s8143_s23 + $0x8] sm:$0xff]  ;;  %v5516_v29 = vld [vmem:[%s8143_s23] sm:$0xff] }
0x1aa3   : > { %6729 = vtanh.f32 %v5072_v23 }
0x1ab0   : > { %v6730_v17 = vpop.eup %6729 }
0x1ab1   : > { %5075 = vrot.lane.b32.xlu1 %v6730_v17, %s6806_s6  ;;  %s8075_s6 = scalar_lea.hbm %s8195_s2, %s5934_s7  ;;  %s6745_s7 = scalar_lea.vmem %s6744_s5, 1024 }
0x1ab5   : > { %4896 = vrot.lane.b32.xlu1 %v4894_v48, %s6807_s9  ;;  %v5218_v48 = vld [vmem:[%s8140_s20 + $0x8] sm:$0xff] }
0x1ab9   : > { %4528 = vrot.lane.b32.xlu1 %v7913_v20, %s6807_s9  ;;  %v5116_v20 = vld [vmem:[%s8139_s19] sm:$0xff] }
0x1aba   : > { %6539 = vmatprep.mubr.msk.f32.mxu1 %vm3597_vm12, %v5116_v20  ;;  %v5924_v20 = vld [vmem:[%s8144_s24] ss:$0 sm:$0xff] }
0x1abd   : > { %4160 = vrot.lane.b32.xlu1 %v7863_v8, %s6807_s9 }
0x1ac1   : > { %3792 = vrot.lane.b32.xlu1 %v7813_v15, %s6807_s9 }
0x1b23   : > { %v5076_v30 = vpop.permute.xlu1 %5075 }
0x1b24   : > { %v5078_v33 = vmul.f32 %v6728_v19, %v5076_v30 }
0x1b26   : > { %5080 = vrot.lane.b32.xlu0 %v5078_v33, %s6807_s9 }
0x1b27   : > { %v4897_v34 = vpop.permute.xlu1 %4896 }
0x1b28   : > { %4899 = vst.msk [vmem:[#allocation3 + $0x30] sm:$0xff] %vm818_vm0, %v4897_v34 }
0x1b2a   : > { %4712 = vrot.lane.b32.xlu0 %v7938_v32, %s6807_s9 }
0x1b2b   : > { %v4529_v35 = vpop.permute.xlu1 %4528 }
0x1b2c   : > { %4531 = vst.msk [vmem:[#allocation3 + $0x20] sm:$0xff] %vm818_vm0, %v4529_v35 }
0x1b2e   : > { %4344 = vrot.lane.b32.xlu0 %v7888_v55, %s6807_s9 }
0x1b2f   : > { %v4161_v8 = vpop.permute.xlu1 %4160 }
0x1b30   : > { %4163 = vst.msk [vmem:[#allocation3 + $0x10] sm:$0xff] %vm818_vm0, %v4161_v8 }
0x1b32   : > { %3976 = vrot.lane.b32.xlu0 %v7838_v40, %s6807_s9  ;;  %v5090_v40 = vld [vmem:[#allocation3 + $0x30] sm:$0xff]  ;;  %s6739_s9 = scalar_lea.vmem %s8077_s25, 512 }
0x1b33   : > { %v3793_v15 = vpop.permute.xlu1 %3792  ;;  %v5106_v36 = vmul.f32 0.01, %v5090_v40  ;;  %vm5098_vm14 = vcmp.ge.f32.partialorder %v5090_v40, 0.0  ;;  %v5088_v56 = vld [vmem:[#allocation3 + $0x20] sm:$0xff]  ;;  %p6740_p11 = scmp.ne.s32.totalorder %s8077_s25, %s6739_s9  ;;  %p6747_p1 = scmp.lt.s32.totalorder %s6745_s7, %s6739_s9 }
0x1b34   : > { %3795 = vst.msk [vmem:[#allocation3] sm:$0xff] %vm818_vm0, %v3793_v15  ;;  %v5104_v45 = vmul.f32 0.01, %v5088_v56  ;;  %vm5096_vm2 = vcmp.ge.f32.partialorder %v5088_v56, 0.0 }
0x1b35   : > { %v5114_v46 = vsel %vm5098_vm14, %v5090_v40, %v5106_v36  ;;  %p6741_p12 = pnand %p6740_p11, %p6982_p5  ;;  %p6748_p2 = por %p6747_p1, %p6746_p0 }
0x1b36   : > { %v5112_v44 = vsel %vm5096_vm2, %v5088_v56, %v5104_v45 }
0x1b37   : > { %v5086_v41 = vld [vmem:[#allocation3 + $0x10] sm:$0xff]  ;;  %p6742_p13 = pneg %p6741_p12 }
0x1b38   : > { %v5102_v0 = vmul.f32 0.01, %v5086_v41  ;;  %vm5094_vm5 = vcmp.ge.f32.partialorder %v5086_v41, 0.0 }
0x1b39   : > { %p6749_p3 = pnand %p6748_p2, %p6742_p13 }
0x1b3a   : > { %v5110_v1 = vsel %vm5094_vm5, %v5086_v41, %v5102_v0 }
0x1b3b   : > { %v5084_v47 = vld [vmem:[#allocation3] sm:$0xff] }
0x1b3c   : > { %v5100_v31 = vmul.f32 0.01, %v5084_v47  ;;  %vm5092_vm7 = vcmp.ge.f32.partialorder %v5084_v47, 0.0 }
0x1b3e   : > { %v5108_v51 = vsel %vm5092_vm7, %v5084_v47, %v5100_v31 }
0x1b98   : > { %v5081_v55 = vpop.permute.xlu0 %5080 }
0x1b99   : > { %5083 = vst.msk [vmem:[#allocation3 + $0x38] sm:$0xff] %vm818_vm0, %v5081_v55 }
0x1b9c   : > { %v4713_v43 = vpop.permute.xlu0 %4712 }
0x1b9d   : > { %4715 = vst.msk [vmem:[#allocation3 + $0x28] sm:$0xff] %vm818_vm0, %v4713_v43 }
0x1ba0   : > { %v4345_v53 = vpop.permute.xlu0 %4344  ;;  %v5091_v54 = vld [vmem:[#allocation3 + $0x38] sm:$0xff] }
0x1ba1   : > { %4347 = vst.msk [vmem:[#allocation3 + $0x18] sm:$0xff] %vm818_vm0, %v4345_v53  ;;  %vm5099_vm13 = vcmp.ge.f32.partialorder %v5091_v54, 0.0  ;;  %v5107_v32 = vmul.f32 0.01, %v5091_v54 }
0x1ba3   : > { %v5115_v39 = vsel %vm5099_vm13, %v5091_v54, %v5107_v32 }
0x1ba4   : > { %6523 = vmatprep.subr.mxu1 %v5115_v39  ;;  %6545 = vmatprep.subr.mxu0 %v5115_v39  ;;  %v3977_v57 = vpop.permute.xlu0 %3976  ;;  %v5089_v49 = vld [vmem:[#allocation3 + $0x28] sm:$0xff] }
0x1ba5   : > { %3979 = vst.msk [vmem:[#allocation3 + $0x8] sm:$0xff] %vm818_vm0, %v3977_v57  ;;  %6524 = vmatpush3.msra.mxu1 %v5115_v39  ;;  %6546 = vmatpush3.msra.mxu0 %v5115_v39  ;;  %vm5097_vm15 = vcmp.ge.f32.partialorder %v5089_v49, 0.0  ;;  %v5105_v38 = vmul.f32 0.01, %v5089_v49 }
0x1ba6   : > { %6525 = vmatprep.subr.mxu1 %v5114_v46  ;;  %6547 = vmatprep.subr.mxu0 %v5114_v46 }
0x1ba7   : > { %6526 = vmatpush3.msra.mxu1 %v5114_v46  ;;  %6548 = vmatpush3.msra.mxu0 %v5114_v46  ;;  %v5113_v62 = vsel %vm5097_vm15, %v5089_v49, %v5105_v38 }
0x1ba8   : > { %6527 = vmatprep.subr.mxu1 %v5113_v62  ;;  %6549 = vmatprep.subr.mxu0 %v5113_v62  ;;  %v5087_v2 = vld [vmem:[#allocation3 + $0x18] sm:$0xff] }
0x1ba9   : > { %6528 = vmatpush3.msra.mxu1 %v5113_v62  ;;  %6550 = vmatpush3.msra.mxu0 %v5113_v62  ;;  %vm5095_vm4 = vcmp.ge.f32.partialorder %v5087_v2, 0.0  ;;  %v5103_v13 = vmul.f32 0.01, %v5087_v2 }
0x1baa   : > { %6529 = vmatprep.subr.mxu1 %v5112_v44  ;;  %6551 = vmatprep.subr.mxu0 %v5112_v44 }
0x1bab   : > { %6530 = vmatpush3.msra.mxu1 %v5112_v44  ;;  %6552 = vmatpush3.msra.mxu0 %v5112_v44  ;;  %v5111_v14 = vsel %vm5095_vm4, %v5087_v2, %v5103_v13 }
0x1bac   : > { %6531 = vmatprep.subr.mxu1 %v5111_v14  ;;  %6553 = vmatprep.subr.mxu0 %v5111_v14  ;;  %v5085_v42 = vld [vmem:[#allocation3 + $0x8] sm:$0xff] }
0x1bad   : > { %6532 = vmatpush3.msra.mxu1 %v5111_v14  ;;  %6554 = vmatpush3.msra.mxu0 %v5111_v14  ;;  %vm5093_vm6 = vcmp.ge.f32.partialorder %v5085_v42, 0.0  ;;  %v5101_v7 = vmul.f32 0.01, %v5085_v42 }
0x1bae   : > { %6533 = vmatprep.subr.mxu1 %v5110_v1  ;;  %6555 = vmatprep.subr.mxu0 %v5110_v1 }
0x1baf   : > { %6534 = vmatpush3.msra.mxu1 %v5110_v1  ;;  %6556 = vmatpush3.msra.mxu0 %v5110_v1  ;;  %v5109_v37 = vsel %vm5093_vm6, %v5085_v42, %v5101_v7 }
0x1bb0   : > { %6535 = vmatprep.subr.mxu1 %v5109_v37  ;;  %6557 = vmatprep.subr.mxu0 %v5109_v37 }
0x1bb1   : > { %6536 = vmatpush3.msra.mxu1 %v5109_v37  ;;  %6558 = vmatpush3.msra.mxu0 %v5109_v37 }
0x1bb2   : > { %6537 = vmatprep.subr.mxu1 %v5108_v51  ;;  %6559 = vmatprep.subr.mxu0 %v5108_v51 }
0x1bb3   : > { %6538 = vmatpush3.msra.mxu1 %v5108_v51  ;;  %6560 = vmatpush3.msra.mxu0 %v5108_v51 }
0x1bb4   : > { %6540 = vmatmul.mubr.msk.f32.vlgmr.msra.gmra.mxu1 %vm3597_vm12, %v5117_v18  ;;  %6562 = vmatmul.mubr.msk.f32.vlgmr.msra.gmra.mxu0 %vm3597_vm12, %v5218_v48 }
0x1bb5   : > { %6542 = vmatprep.mubr.msk.f32.mxu1 %vm3597_vm12, %v5118_v50  ;;  %6564 = vmatprep.mubr.msk.f32.mxu0 %vm3597_vm12, %v5219_v4 }
0x1bb6   : > { %6567 = vmatprep.subr.mxu1 %v5321_v52  ;;  %6577 = vmatprep.subr.mxu0 %v5319_v59 }
0x1bb7   : > { %6568 = vmatpush3.msra.mxu1 %v5321_v52  ;;  %6578 = vmatpush3.msra.mxu0 %v5319_v59 }
0x1bb8   : > { %6543 = vmatmul.mubr.msk.f32.gmra.mxu1 %vm3597_vm12, %v5119_v5  ;;  %6565 = vmatmul.mubr.msk.f32.gmra.mxu0 %vm3597_vm12, %v5220_v21 }
0x1bb9   : > { %6569 = vmatprep.subr.mxu1 %v5320_v6  ;;  %6579 = vmatprep.subr.mxu0 %v5318_v9 }
0x1bba   : > { %6570 = vmatpush3.msra.mxu1 %v5320_v6  ;;  %6580 = vmatpush3.msra.mxu0 %v5318_v9 }
0x1bbb   : > { %6587 = vmatprep.subr.mxu1 %v5519_v10 }
0x1c74   : > { %v6541_v3 = vpop.f32.mrf.mxu1  ;;  %v6563_v11 = vpop.f32.mrf.mxu0 }
0x1c76   : > { %v5198_v24 = vpop.f32.mrf.mxu1  ;;  %v5299_v27 = vpop.f32.mrf.mxu0 }
0x1c77   : > { %6571 = vmatprep.mubr.msk.f32.mxu1 %vm818_vm0, %v5299_v27  ;;  %6581 = vmatprep.mubr.msk.f32.mxu0 %vm818_vm0, %v5198_v24 }
0x1c78   : > { %v6544_v22 = vpop.f32.mrf.mxu1  ;;  %v6566_v19 = vpop.f32.mrf.mxu0  ;;  %6572 = vmatmul.mubr.msk.f32.vlgmr.msra.gmra.mxu1 %vm818_vm0, %v6563_v11  ;;  %6582 = vmatmul.mubr.msk.f32.vlgmr.msra.gmra.mxu0 %vm818_vm0, %v6541_v3 }
0x1c79   : > { %6588 = vmatpush3.msra.mxu1 %v5519_v10 }
0x1c7a   : > { %v5208_v25 = vpop.f32.mrf.mxu1  ;;  %v5309_v26 = vpop.f32.mrf.mxu0  ;;  %6589 = vmatprep.subr.mxu1 %v5518_v12 }
0x1c7b   : > { %6574 = vmatprep.mubr.msk.f32.mxu1 %vm818_vm0, %v5309_v26  ;;  %6584 = vmatprep.mubr.msk.f32.mxu0 %vm818_vm0, %v5208_v25 }
0x1c7c   : > { %6590 = vmatpush3.msra.mxu1 %v5518_v12  ;;  %6585 = vmatmul.mubr.msk.f32.gmra.mxu0 %vm818_vm0, %v6544_v22 }
0x1c7d   : > { %6575 = vmatmul.mubr.msk.f32.gmra.mxu1 %vm818_vm0, %v6566_v19  ;;  %6591 = vmatprep.subr.mxu1 %v5517_v28 }
0x1c7e   : > { %6592 = vmatpush3.msra.mxu1 %v5517_v28  ;;  %6595 = vmatprep.mubr.msk.f32.mxu1 %vm920_vm1, %v7675_v58 }
0x1c7f   : > { %6593 = vmatprep.subr.mxu1 %v5516_v29 }
0x1c80   : > { %6594 = vmatpush3.msra.mxu1 %v5516_v29 }
0x1c81   : > { %6596 = vmatmul.mubr.msk.f32.vlgmr.msra.gmra.mxu1 %vm920_vm1, %v7677_v60 }
0x1c82   : > { %6598 = vmatprep.mubr.msk.f32.mxu1 %vm920_vm1, %v7679_v61 }
0x1c85   : > { %6599 = vmatmul.mubr.msk.f32.gmra.mxu1 %vm920_vm1, %v7681_v63 }
0x1d38   : > { %v6573_v23 = vpop.f32.mrf.mxu1  ;;  %v6583_v17 = vpop.f32.mrf.mxu0 }
0x1d39   : > { %v5503_v8 = vadd.f32 %v6583_v17, %v6573_v23 }
0x1d3a   : > { %v5400_v30 = vpop.f32.mrf.mxu1  ;;  %v5497_v33 = vpop.f32.mrf.mxu0 }
0x1d3b   : > { %v5498_v60 = vadd.f32 %v5497_v33, %v5400_v30 }
0x1d3c   : > { %v6586_v15 = vpop.f32.mrf.mxu0 }
0x1d3d   : > { %v6576_v34 = vpop.f32.mrf.mxu1 }
0x1d3e   : > { %v5513_v61 = vadd.f32 %v6586_v15, %v6576_v34  ;;  %v5507_v43 = vpop.f32.mrf.mxu0 }
0x1d3f   : > { %v5410_v35 = vpop.f32.mrf.mxu1 }
0x1d40   : > { %v5508_v56 = vadd.f32 %v5507_v43, %v5410_v35 }
0x1d41   : > { %v6597_v58 = vpop.f32.mrf.mxu1 }
0x1d42   : > { %v5618_v16 = vadd.f32 %v6597_v58, %v5503_v8 }
0x1d43   : > { %v5598_v55 = vpop.f32.mrf.mxu1 }
0x1d44   : > { %v5629_v40 = vadd.f32 %v5924_v20, %v5618_v16  ;;  %v5617_v63 = vadd.f32 %v5598_v55, %v5498_v60 }
0x1d45   : > { %v6600_v53 = vpop.f32.mrf.mxu1 }
0x1d46   : > { %v5638_v54 = vmul.f32 1.442695, %v5629_v40  ;;  %v5628_v32 = vadd.f32 %v5924_v20, %v5617_v63  ;;  %v5620_v36 = vadd.f32 %v6600_v53, %v5513_v61  ;;  %vm5633_vm1 = vcmp.gt.f32.partialorder %v5629_v40, 0.0 }
0x1d47   : > { %v5608_v39 = vpop.f32.mrf.mxu1 }
0x1d48   : > { %6731 = vpow2.f32 %v5638_v54  ;;  %v5636_v57 = vmul.f32 1.442695, %v5628_v32  ;;  %v5631_v49 = vadd.f32 %v5924_v20, %v5620_v36  ;;  %v5619_v46 = vadd.f32 %v5608_v39, %v5508_v56 }
0x1d49   : > { %vm5632_vm8 = vcmp.gt.f32.partialorder %v5628_v32, 0.0 }
0x1d4a   : > { %6733 = vpow2.f32 %v5636_v57  ;;  %v5642_v38 = vmul.f32 1.442695, %v5631_v49  ;;  %v5630_v45 = vadd.f32 %v5924_v20, %v5619_v46  ;;  %vm5635_vm9 = vcmp.gt.f32.partialorder %v5631_v49, 0.0 }
0x1d4c   : > { %6735 = vpow2.f32 %v5642_v38  ;;  %v5640_v41 = vmul.f32 1.442695, %v5630_v45  ;;  %vm5634_vm10 = vcmp.gt.f32.partialorder %v5630_v45, 0.0 }
0x1d4e   : > { %6737 = vpow2.f32 %v5640_v41 }
0x1d55   : > { %v6732_v62 = vpop.eup %6731 }
0x1d56   : > { %v5926_v2 = vadd.f32 -1.0, %v6732_v62 }
0x1d57   : > { %v6734_v44 = vpop.eup %6733 }
0x1d58   : > { %v5649_v13 = vsel %vm5633_vm1, %v5629_v40, %v5926_v2  ;;  %v5925_v0 = vadd.f32 -1.0, %v6734_v44 }
0x1d59   : > { %v6736_v47 = vpop.eup %6735  ;;  %5653 = vst.msk [vmem:[%s792_s4 + $0x8] sm:$0xff] %vm818_vm0, %v5649_v13 }
0x1d5a   : > { %v5648_v14 = vsel %vm5632_vm8, %v5628_v32, %v5925_v0  ;;  %v5928_v42 = vadd.f32 -1.0, %v6736_v47 }
0x1d5b   : > { %5652 = vst.msk [vmem:[%s792_s4] sm:$0xff] %vm818_vm0, %v5648_v14  ;;  %v6738_v1 = vpop.eup %6737 }
0x1d5c   : > { %v5651_v7 = vsel %vm5635_vm9, %v5631_v49, %v5928_v42  ;;  %v5927_v31 = vadd.f32 -1.0, %v6738_v1 }
0x1d5d   : > { %5655 = vst.msk [vmem:[%s792_s4 + $0x18] sm:$0xff] %vm818_vm0, %v5651_v7 }
0x1d5e   : > { %v5650_v37 = vsel %vm5634_vm10, %v5630_v45, %v5927_v31 }
0x1d5f   : > { %5654 = vst.msk [vmem:[%s792_s4 + $0x10] sm:$0xff] %vm818_vm0, %v5650_v37 }
0x1d60   : > { %6752 = shalt.err (!%p6749_p3)
}
0x1d61   : > { %s6753_s26 = scalar_lea.hbm %s8075_s6, 512  ;;  %s6757_s1 = scalar_lea.hbm %s8195_s2, 1024 }
0x1d62   : > { %p6754_p4 = scmp.ne.s32.totalorder %s8075_s6, %s6753_s26  ;;  %p6758_p9 = scmp.lt.s32.totalorder %s8075_s6, %s8195_s2 }
0x1d63   : > { %p6759_p10 = scmp.lt.s32.totalorder %s6757_s1, %s6753_s26 }
0x1d64   : > { %p6755_p7 = pnand %p6754_p4, %p6982_p5 }
0x1d65   : > { %p6760_p11 = por %p6759_p10, %p6758_p9 }
0x1d66   : > { %p6756_p8 = pneg %p6755_p7 }
0x1d68   : > { %p6761_p12 = pnand %p6760_p11, %p6756_p8 }
0x1d6a   : > { %6764 = shalt.err (!%p6761_p12)
}
0x1d6b   : > { %s6809_s9 = smov 128   ;;  %s6810_s5 = smov 8  }
0x1d6c   : > { %6601 = dma.vmem_to_hbm [thread:$0]  (%p6982_p5), %s8077_s25, 512, %s8075_s6, %s8080_s10, %s6809_s9, %s6809_s9, %s6810_s5  }
0x1d6d PF: > { %s8196_s7 = sld [smem:[#allocation10_spill]] }
0x1d6e   : > { %s8197_s4 = sld [smem:[#allocation8_spill]] }
0x1d73   : > { %p6607_p13 = scmp.ge.s32.totalorder %s8196_s7, 2 }
0x1d74   : > { %s5685_s8 = sand.u32 1, %s8197_s4  }
0x1d75   : > { %p6604_p0 = pnand %p6607_p13, %p6986_p6  ;;  %s5686_s0 = scalar_lea.sflag [#allocation6], %s5685_s8 }
0x1d77   : > { %p6605_p1 = pneg %p6604_p0 }
0x1d79   : > { %6782 = dma.done.wait (%p6605_p1), %s5686_s0, 512  }
0x1d7a   : > { %6784 = vsyncadd (%p6605_p1), %s5686_s0, 4294966784  ;;  %s8199_s3 = sld [smem:[#allocation11_spill]]  ;;  %s8202_s6 = smov %s6791_s30 }
0x1d7b   : > { %s8200_s26 = sld [smem:[#allocation9_spill]] }
0x1d7c   : > { %s8201_s7 = sld [smem:[#allocation12_spill]] }
0x1d80   : > { %p37_p2 = scmp.ge.s32.totalorder %s8199_s3, 4  }
0x1d81   : > { %s8203_s30 = smov %s8200_s26 }
0x1d82   :  { %39 = sbr.rel (!%p37_p2) target bundleno = 15 (0xf), region = 161 }
0x1d87   :  { %5691 = vsyncpa [#allocation6], 1 }
0x1d88   :  { %5693 = vsyncpa [#allocation6 + $0x1], 1 }

</bundles_post_ra>
